<compile_context>
chip_gen: v7x
topology: tpu7x:2x2x1
jax: 0.10.0
libtpu: 0.0.40
codegen_flags: <defaults>
</compile_context>

<pallas_src>
import functools

import jax
import jax.numpy as jnp
from jax.experimental import pallas as pl
from jax.experimental.pallas import tpu as pltpu


# ---------------------------------------------------------------------------
# Host-side weight preparation (pure jnp -> jit/trace friendly).
# ---------------------------------------------------------------------------
def _band_conv_weight(w_dhwio, w_len, dtype):
    """(3,3,3,Cin,Cout) -> (3_kh, 3_kd*W*Cin, W*Cout) banded weight.

    The kw taps and the W 'same' zero padding are folded into a banded matmul;
    the 3 kd taps are stacked along K so each conv becomes 3 MXU matmuls with
    K = 3*W*Cin (fills the 256-deep MXU on v6e/v7x; harmless on v5e).
    """
    kd_, kh_, kw_, cin, cout = w_dhwio.shape
    # shift[k, wi, wo] = 1 where wi == wo + k - 1   ('same' conv band along W)
    shift = jnp.stack([jnp.eye(w_len, k=1 - k, dtype=w_dhwio.dtype)
                       for k in range(kw_)])
    band = jnp.einsum("kvw,dhkio->dhviwo", shift, w_dhwio)
    band = band.reshape(kd_, kh_, w_len * cin, w_len * cout)
    # stack kd along K, keep kh as the outer (3-iteration) loop axis
    band = band.transpose(1, 0, 2, 3).reshape(kh_, kd_ * w_len * cin,
                                              w_len * cout)
    return band.astype(dtype)


def _band_point_weight(ws, w_len, dtype):
    """(Cin, Cout) 1x1x1 projection -> block-diagonal (W*Cin, W*Cout)."""
    return jnp.kron(jnp.eye(w_len, dtype=ws.dtype), ws).astype(dtype)


# ---------------------------------------------------------------------------
# Kernel helpers.
# ---------------------------------------------------------------------------
def _zero_h_halo(pad_ref):
    """Zero the two H-halo rows of every D plane (stays valid afterwards)."""
    dp, hp, wc = pad_ref.shape
    z = jnp.zeros((dp, 1, wc), pad_ref.dtype)
    pad_ref[:, 0:1, :] = z
    pad_ref[:, hp - 1:hp, :] = z


def _band_conv3d(pad_ref, wb_ref, dd, h):
    """'same' 3x3x3 conv: W folded into banded weights, D/H via padded ref.

    pad_ref: (>= dd+2, h+2, W*Cin) padded activations, H-halo rows are zero.
    wb_ref:  (3, 3*W*Cin, W*Cout) banded weights (kd stacked along K).
    Returns f32 (dd*h, W*Cout).
    """
    n_out = wb_ref.shape[-1]
    acc = jnp.zeros((dd * h, n_out), jnp.float32)
    for kh in range(3):
        patch = jnp.concatenate(
            [pad_ref[kd:kd + dd, kh:kh + h, :].reshape(dd * h, -1)
             for kd in range(3)],
            axis=-1)
        acc = acc + jnp.dot(patch, wb_ref[kh],
                            preferred_element_type=jnp.float32)
    return acc


def _residual_block_kernel(*refs, use_projection, td, compute_dtype):
    if use_projection:
        (x_ref, xlo_ref, xhi_ref, w1_ref, w2_ref, ws_ref,
         out_ref, xpad_ref, midpad_ref) = refs
    else:
        (x_ref, xlo_ref, xhi_ref, w1_ref, w2_ref,
         out_ref, xpad_ref) = refs
        ws_ref = None
        midpad_ref = xpad_ref          # sequential lifetimes -> reuse scratch

    t = pl.program_id(1)               # D-tile index (sequential / "arbitrary")
    nt = pl.num_programs(1)
    _, _, h, wcin = x_ref.shape        # x block: (1, td, H, W*Cin)
    wcout = out_ref.shape[-1]          # out block: (1, td*H, W*Cout)
    cdt = compute_dtype

    # H-halo rows are zeroed once per batch element (t == 0); every later
    # write only touches rows 1..h.  Requires the tile axis to be sequential.
    @pl.when(t == 0)
    def _():
        _zero_h_halo(xpad_ref)
        if use_projection:
            _zero_h_halo(midpad_ref)

    # --- stage x tile + 2-plane D halos into the padded VMEM buffer ---------
    xpad_ref[2:2 + td, 1:1 + h, :] = x_ref[0].astype(cdt)

    @pl.when(t > 0)
    def _():
        xpad_ref[0:2, 1:1 + h, :] = xlo_ref[0].astype(cdt)

    @pl.when(t == 0)
    def _():
        xpad_ref[0:2, 1:1 + h, :] = jnp.zeros((2, h, wcin), cdt)

    @pl.when(t < nt - 1)
    def _():
        xpad_ref[2 + td:4 + td, 1:1 + h, :] = xhi_ref[0].astype(cdt)

    @pl.when(t == nt - 1)
    def _():
        xpad_ref[2 + td:4 + td, 1:1 + h, :] = jnp.zeros((2, h, wcin), cdt)

    # --- conv1 + ReLU over td+2 planes (tile + 1-plane hidden halo) ---------
    hid = jnp.maximum(_band_conv3d(xpad_ref, w1_ref, td + 2, h), 0.0)

    # Stage hidden into the conv2 padded buffer (xpad is dead by now, so when
    # Cin == Cout this overwrites the same scratch).
    midpad_ref[0:td + 2, 1:1 + h, :] = (
        hid.reshape(td + 2, h, wcout).astype(cdt))

    # conv2's 'same' zero padding along D at the volume boundary.
    @pl.when(t == 0)
    def _():
        midpad_ref[0:1, 1:1 + h, :] = jnp.zeros((1, h, wcout), cdt)

    @pl.when(t == nt - 1)
    def _():
        midpad_ref[td + 1:td + 2, 1:1 + h, :] = jnp.zeros((1, h, wcout), cdt)

    # --- conv2 ---------------------------------------------------------------
    acc2 = _band_conv3d(midpad_ref, w2_ref, td, h)

    # --- shortcut: re-read x from its VMEM block (not held live across convs)
    if use_projection:
        sc = jnp.dot(x_ref[0].reshape(td * h, wcin), ws_ref[...],
                     preferred_element_type=jnp.float32)
    else:
        sc = x_ref[0].reshape(td * h, wcin).astype(jnp.float32)

    out_ref[0] = jnp.maximum(acc2 + sc, 0.0).astype(out_ref.dtype)


# ---------------------------------------------------------------------------
# Wrapper.
# ---------------------------------------------------------------------------
def _pick_tile_d(d):
    # Largest candidate that divides D and still gives >= 2 tiles per batch
    # element, so the pipeline can overlap DMA with compute.
    for td in (16, 8, 4, 2):
        if d % td == 0 and d // td >= 2:
            return td
    return d


def residual_block(x_ndhwc, w1, w2, ws=None, *, tile_d=None,
                   compute_dtype=jnp.bfloat16):
    """Fused ResidualBlock forward.

    x_ndhwc: (N, D, H, W, Cin) float32
    w1:      (3, 3, 3, Cin, Cout)
    w2:      (3, 3, 3, Cout, Cout)
    ws:      optional (Cin, Cout) 1x1x1 shortcut projection (required if Cin != Cout)
    returns: (N, D, H, W, Cout)
    """
    n, d, h, w, cin = x_ndhwc.shape
    cout = w1.shape[-1]
    use_projection = ws is not None
    if cin != cout and not use_projection:
        raise ValueError("shortcut projection weight required when Cin != Cout")
    if d % 2 != 0:
        raise ValueError("D must be even (2-plane halo blocks)")

    td = _pick_tile_d(d) if tile_d is None else tile_d
    assert d % td == 0 and td % 2 == 0, (d, td)
    nt = d // td
    hd = td // 2                       # halo block stride in 2-plane units
    wcin, wcout = w * cin, w * cout

    # Banded (kw + W-pad folded, kd stacked along K) bf16 weights.
    w1b = _band_conv_weight(w1, w, compute_dtype)     # (3, 3*W*Cin,  W*Cout)
    w2b = _band_conv_weight(w2, w, compute_dtype)     # (3, 3*W*Cout, W*Cout)

    # Channels folded into the lane axis; cast once on the host so HBM->VMEM
    # DMA moves bf16 instead of f32.
    x_fold = x_ndhwc.reshape(n, d, h, wcin).astype(compute_dtype)

    # x is passed three times: the td-plane tile plus 2-plane lower/upper D
    # halos via clamped overlapping index maps.  Clamped boundary blocks are
    # ignored (halo is zero-filled in the kernel there).
    in_specs = [
        pl.BlockSpec((1, td, h, wcin), lambda b, t: (b, t, 0, 0)),
        pl.BlockSpec((1, 2, h, wcin),
                     lambda b, t: (b, jnp.maximum(t * hd - 1, 0), 0, 0)),
        pl.BlockSpec((1, 2, h, wcin),
                     lambda b, t: (b, jnp.minimum((t + 1) * hd, d // 2 - 1),
                                   0, 0)),
        # Grid-invariant weights: whole-array VMEM residency, no double buffer.
        pl.BlockSpec(memory_space=pltpu.MemorySpace.VMEM),
        pl.BlockSpec(memory_space=pltpu.MemorySpace.VMEM),
    ]
    args = [x_fold, x_fold, x_fold, w1b, w2b]

    scratch_shapes = [pltpu.VMEM((td + 4, h + 2, wcin), compute_dtype)]
    if use_projection:
        wsb = _band_point_weight(ws, w, compute_dtype)   # (W*Cin, W*Cout)
        in_specs.append(pl.BlockSpec(memory_space=pltpu.MemorySpace.VMEM))
        args.append(wsb)
        # Separate conv2 padded buffer (different lane width than xpad).
        scratch_shapes.append(pltpu.VMEM((td + 2, h + 2, wcout), compute_dtype))

    # Advisory cost estimate (true conv FLOPs, not the banded-MAC count).
    flops = 2 * 27 * n * d * h * w * (cin * cout + cout * cout)
    if use_projection:
        flops += 2 * n * d * h * w * cin * cout
    itemsz = jnp.dtype(compute_dtype).itemsize
    weight_bytes = sum(int(a.size) * a.dtype.itemsize for a in args[3:])
    out_bytes = n * d * h * wcout * jnp.dtype(x_ndhwc.dtype).itemsize
    x_bytes = int(x_fold.size) * itemsz
    cost = pl.CostEstimate(
        flops=int(flops), transcendentals=0,
        bytes_accessed=int(x_bytes * (1.0 + 4.0 / td) + out_bytes
                           + weight_bytes))

    # VMEM budget computed from the actual buffers (weights single-buffered,
    # activation/out blocks double-buffered) + headroom, capped for v7x.
    scratch_bytes = ((td + 4) * (h + 2) * wcin
                     + ((td + 2) * (h + 2) * wcout if use_projection else 0)
                     ) * itemsz
    pipeline_bytes = 2 * ((td + 4) * h * wcin * itemsz
                          + td * h * wcout
                          * jnp.dtype(x_ndhwc.dtype).itemsize)
    need = weight_bytes + scratch_bytes + pipeline_bytes
    vmem_limit = int(min(96 * 1024 * 1024, max(32 * 1024 * 1024, 2 * need)))

    kernel = functools.partial(_residual_block_kernel,
                               use_projection=use_projection, td=td,
                               compute_dtype=compute_dtype)

    out = pl.pallas_call(
        kernel,
        # Lane-dense output: last dim is W*Cout (128 / 256 in the demo).
        out_shape=jax.ShapeDtypeStruct((n, d * h, wcout), x_ndhwc.dtype),
        grid=(n, nt),
        in_specs=in_specs,
        out_specs=pl.BlockSpec((1, td * h, wcout), lambda b, t: (b, t, 0)),
        scratch_shapes=scratch_shapes,
        compiler_params=pltpu.CompilerParams(
            # Tile axis must stay sequential ("arbitrary") for the once-per-
            # batch-element halo zeroing; batch axis parallel for megacore.
            dimension_semantics=("parallel", "arbitrary"),
            vmem_limit_bytes=vmem_limit),
        cost_estimate=cost,
    )(*args)

    return out.reshape(n, d, h, w, cout)


# ---------------------------------------------------------------------------
# Pure-JAX reference (matches the PyTorch forward, channels-last layout).
# ---------------------------------------------------------------------------
def _reference_block(x, w1, w2, ws=None):
    conv = lambda a, wt: jax.lax.conv_general_dilated(
        a, wt, window_strides=(1, 1, 1), padding="SAME",
        dimension_numbers=("NDHWC", "DHWIO", "NDHWC"),
        precision=jax.lax.Precision.HIGHEST)
    out = jax.nn.relu(conv(x, w1))
    out = conv(out, w2)
    sc = x if ws is None else jnp.einsum("ndhwc,co->ndhwo", x, ws,
                                         precision=jax.lax.Precision.HIGHEST)
    return jax.nn.relu(out + sc)


def _check(name, out, ref):
    assert out.shape == ref.shape, (name, out.shape, ref.shape)
    err = float(jnp.max(jnp.abs(out - ref)))
    scale = float(jnp.max(jnp.abs(ref))) + 1e-6
    # bf16 inputs/weights/intermediate with f32 accumulation -> loose tolerance.
    if err > 3e-2 * scale:
        raise AssertionError(f"{name}: max abs err {err:.4g} vs scale {scale:.4g}")


if __name__ == "__main__":
    key = jax.random.PRNGKey(0)
    k1, k2, k3, k4, k5 = jax.random.split(key, 5)

    # Small shapes consistent with the module.  C=8, W=16 -> folded lane
    # width W*C = 128 (fully lane-dense tiles); D=8 -> 2 D-tiles of 4 planes.
    N, D, H, W, C = 2, 8, 16, 16, 8

    # PyTorch-style NCDHW input, transposed to the kernel's NDHWC layout.
    x_ncdhw = jax.random.normal(k1, (N, C, D, H, W), jnp.float32)
    x = jnp.transpose(x_ncdhw, (0, 2, 3, 4, 1))

    # PyTorch conv weights (Cout, Cin, kD, kH, kW) -> (kD, kH, kW, Cin, Cout).
    w1_pt = 0.1 * jax.random.normal(k2, (C, C, 3, 3, 3), jnp.float32)
    w2_pt = 0.1 * jax.random.normal(k3, (C, C, 3, 3, 3), jnp.float32)
    w1 = jnp.transpose(w1_pt, (2, 3, 4, 1, 0))
    w2 = jnp.transpose(w2_pt, (2, 3, 4, 1, 0))

    # Case 1: identity shortcut (Cin == Cout, stride 1).
    out = jax.block_until_ready(residual_block(x, w1, w2))
    _check("identity shortcut", out, _reference_block(x, w1, w2))

    # Case 2: projection shortcut (Cin != Cout -> 1x1x1 conv shortcut);
    # W*Cout = 256 exercises the wide-N MXU path.
    Cin, Cout = 8, 16
    xp = jax.random.normal(k4, (N, D, H, W, Cin), jnp.float32)
    w1p = 0.1 * jax.random.normal(k5, (3, 3, 3, Cin, Cout), jnp.float32)
    w2p = 0.1 * jax.random.normal(k2, (3, 3, 3, Cout, Cout), jnp.float32)
    wsp = 0.1 * jax.random.normal(k3, (Cin, Cout), jnp.float32)
    outp = jax.block_until_ready(residual_block(xp, w1p, w2p, wsp))
    _check("projection shortcut", outp, _reference_block(xp, w1p, w2p, wsp))

    print("KERNEL_OK")
</pallas_src>

<mosaic_0001>
module attributes {stable_mosaic.version = 11 : i64} {
  func.func @_residual_block_kernel(%arg0: i32, %arg1: i32, %arg2: memref<1x4x16x128xbf16, #tpu.memory_space<vmem>>, %arg3: memref<1x2x16x128xbf16, #tpu.memory_space<vmem>>, %arg4: memref<1x2x16x128xbf16, #tpu.memory_space<vmem>>, %arg5: memref<3x384x128xbf16, #tpu.memory_space<vmem>>, %arg6: memref<3x384x128xbf16, #tpu.memory_space<vmem>>, %arg7: memref<1x64x128xf32, #tpu.memory_space<vmem>>, %arg8: memref<8x18x128xbf16, #tpu.memory_space<vmem>>) attributes {dimension_semantics = [#tpu.dimension_semantics<parallel>, #tpu.dimension_semantics<arbitrary>], iteration_bounds = array<i64: 2, 2>, scalar_prefetch = 0 : i64, scratch_operands = 1 : i64, tpu.core_type = #tpu.core_type<tc>, window_params = [{transform_indices = @transform_0, window_bounds = array<i64: 1, 4, 16, 128>}, {transform_indices = @transform_1, window_bounds = array<i64: 1, 2, 16, 128>}, {transform_indices = @transform_2, window_bounds = array<i64: 1, 2, 16, 128>}, {pipeline_mode = #tpu.pipeline_mode<synchronous>, transform_indices = @transform_3, window_bounds = array<i64: 3, 384, 128>}, {pipeline_mode = #tpu.pipeline_mode<synchronous>, transform_indices = @transform_4, window_bounds = array<i64: 3, 384, 128>}, {transform_indices = @transform_5, window_bounds = array<i64: 1, 64, 128>}]} {
    %c0_i32 = arith.constant 0 : i32
    %0 = arith.cmpi eq, %arg1, %c0_i32 : i32
    %1 = arith.extui %0 : i1 to i32
    %c0_i32_0 = arith.constant 0 : i32
    %2 = arith.cmpi ne, %1, %c0_i32_0 : i32
    scf.if %2 {
      %cst_107 = arith.constant 0.000000e+00 : bf16
      %107 = vector.broadcast %cst_107 : bf16 to vector<8x1x128xbf16>
      %c0_108 = arith.constant 0 : index
      %c0_109 = arith.constant 0 : index
      %c0_110 = arith.constant 0 : index
      %108 = vector.load %arg8[%c0_108, %c0_109, %c0_110] : memref<8x18x128xbf16, #tpu.memory_space<vmem>>, vector<8x1x128xbf16>
      tpu.vector_store %arg8[%c0_108, %c0_109, %c0_110], %107 {strides = array<i32>} : memref<8x18x128xbf16, #tpu.memory_space<vmem>>, vector<8x1x128xbf16>,
      %c0_111 = arith.constant 0 : index
      %c17 = arith.constant 17 : index
      %c0_112 = arith.constant 0 : index
      %109 = vector.load %arg8[%c0_111, %c17, %c0_112] : memref<8x18x128xbf16, #tpu.memory_space<vmem>>, vector<8x1x128xbf16>
      tpu.vector_store %arg8[%c0_111, %c17, %c0_112], %107 {strides = array<i32>} : memref<8x18x128xbf16, #tpu.memory_space<vmem>>, vector<8x1x128xbf16>,
    } else {
    }
    %c0 = arith.constant 0 : index
    %c0_1 = arith.constant 0 : index
    %c0_2 = arith.constant 0 : index
    %c0_3 = arith.constant 0 : index
    %3 = vector.load %arg2[%c0, %c0_1, %c0_2, %c0_3] : memref<1x4x16x128xbf16, #tpu.memory_space<vmem>>, vector<1x4x16x128xbf16>
    %4 = vector.shape_cast %3 : vector<1x4x16x128xbf16> to vector<4x16x128xbf16>
    %c2 = arith.constant 2 : index
    %c1 = arith.constant 1 : index
    %c0_4 = arith.constant 0 : index
    %5 = vector.load %arg8[%c2, %c1, %c0_4] : memref<8x18x128xbf16, #tpu.memory_space<vmem>>, vector<4x16x128xbf16>
    tpu.vector_store %arg8[%c2, %c1, %c0_4], %4 {strides = array<i32>} : memref<8x18x128xbf16, #tpu.memory_space<vmem>>, vector<4x16x128xbf16>,
    %c0_i32_5 = arith.constant 0 : i32
    %6 = arith.cmpi sgt, %arg1, %c0_i32_5 : i32
    %7 = arith.extui %6 : i1 to i32
    %c0_i32_6 = arith.constant 0 : i32
    %8 = arith.cmpi ne, %7, %c0_i32_6 : i32
    scf.if %8 {
      %c0_107 = arith.constant 0 : index
      %c0_108 = arith.constant 0 : index
      %c0_109 = arith.constant 0 : index
      %c0_110 = arith.constant 0 : index
      %107 = vector.load %arg3[%c0_107, %c0_108, %c0_109, %c0_110] : memref<1x2x16x128xbf16, #tpu.memory_space<vmem>>, vector<1x2x16x128xbf16>
      %108 = vector.shape_cast %107 : vector<1x2x16x128xbf16> to vector<2x16x128xbf16>
      %c0_111 = arith.constant 0 : index
      %c1_112 = arith.constant 1 : index
      %c0_113 = arith.constant 0 : index
      %109 = vector.load %arg8[%c0_111, %c1_112, %c0_113] : memref<8x18x128xbf16, #tpu.memory_space<vmem>>, vector<2x16x128xbf16>
      tpu.vector_store %arg8[%c0_111, %c1_112, %c0_113], %108 {strides = array<i32>} : memref<8x18x128xbf16, #tpu.memory_space<vmem>>, vector<2x16x128xbf16>,
    } else {
    }
    %c0_i32_7 = arith.constant 0 : i32
    %9 = arith.cmpi eq, %arg1, %c0_i32_7 : i32
    %10 = arith.extui %9 : i1 to i32
    %c0_i32_8 = arith.constant 0 : i32
    %11 = arith.cmpi ne, %10, %c0_i32_8 : i32
    scf.if %11 {
      %cst_107 = arith.constant 0.000000e+00 : bf16
      %107 = vector.broadcast %cst_107 : bf16 to vector<2x16x128xbf16>
      %c0_108 = arith.constant 0 : index
      %c1_109 = arith.constant 1 : index
      %c0_110 = arith.constant 0 : index
      %108 = vector.load %arg8[%c0_108, %c1_109, %c0_110] : memref<8x18x128xbf16, #tpu.memory_space<vmem>>, vector<2x16x128xbf16>
      tpu.vector_store %arg8[%c0_108, %c1_109, %c0_110], %107 {strides = array<i32>} : memref<8x18x128xbf16, #tpu.memory_space<vmem>>, vector<2x16x128xbf16>,
    } else {
    }
    %c1_i32 = arith.constant 1 : i32
    %12 = arith.cmpi slt, %arg1, %c1_i32 : i32
    %13 = arith.extui %12 : i1 to i32
    %c0_i32_9 = arith.constant 0 : i32
    %14 = arith.cmpi ne, %13, %c0_i32_9 : i32
    scf.if %14 {
      %c0_107 = arith.constant 0 : index
      %c0_108 = arith.constant 0 : index
      %c0_109 = arith.constant 0 : index
      %c0_110 = arith.constant 0 : index
      %107 = vector.load %arg4[%c0_107, %c0_108, %c0_109, %c0_110] : memref<1x2x16x128xbf16, #tpu.memory_space<vmem>>, vector<1x2x16x128xbf16>
      %108 = vector.shape_cast %107 : vector<1x2x16x128xbf16> to vector<2x16x128xbf16>
      %c6 = arith.constant 6 : index
      %c1_111 = arith.constant 1 : index
      %c0_112 = arith.constant 0 : index
      %109 = vector.load %arg8[%c6, %c1_111, %c0_112] : memref<8x18x128xbf16, #tpu.memory_space<vmem>>, vector<2x16x128xbf16>
      tpu.vector_store %arg8[%c6, %c1_111, %c0_112], %108 {strides = array<i32>} : memref<8x18x128xbf16, #tpu.memory_space<vmem>>, vector<2x16x128xbf16>,
    } else {
    }
    %c1_i32_10 = arith.constant 1 : i32
    %15 = arith.cmpi eq, %arg1, %c1_i32_10 : i32
    %16 = arith.extui %15 : i1 to i32
    %c0_i32_11 = arith.constant 0 : i32
    %17 = arith.cmpi ne, %16, %c0_i32_11 : i32
    scf.if %17 {
      %cst_107 = arith.constant 0.000000e+00 : bf16
      %107 = vector.broadcast %cst_107 : bf16 to vector<2x16x128xbf16>
      %c6 = arith.constant 6 : index
      %c1_108 = arith.constant 1 : index
      %c0_109 = arith.constant 0 : index
      %108 = vector.load %arg8[%c6, %c1_108, %c0_109] : memref<8x18x128xbf16, #tpu.memory_space<vmem>>, vector<2x16x128xbf16>
      tpu.vector_store %arg8[%c6, %c1_108, %c0_109], %107 {strides = array<i32>} : memref<8x18x128xbf16, #tpu.memory_space<vmem>>, vector<2x16x128xbf16>,
    } else {
    }
    %cst = arith.constant 0.000000e+00 : f32
    %18 = vector.broadcast %cst : f32 to vector<96x128xf32>
    %c0_12 = arith.constant 0 : index
    %c0_13 = arith.constant 0 : index
    %c0_14 = arith.constant 0 : index
    %19 = vector.load %arg8[%c0_12, %c0_13, %c0_14] : memref<8x18x128xbf16, #tpu.memory_space<vmem>>, vector<6x16x128xbf16>
    %20 = vector.shape_cast %19 : vector<6x16x128xbf16> to vector<96x128xbf16>
    %c1_15 = arith.constant 1 : index
    %c0_16 = arith.constant 0 : index
    %c0_17 = arith.constant 0 : index
    %21 = vector.load %arg8[%c1_15, %c0_16, %c0_17] : memref<8x18x128xbf16, #tpu.memory_space<vmem>>, vector<6x16x128xbf16>
    %22 = vector.shape_cast %21 : vector<6x16x128xbf16> to vector<96x128xbf16>
    %c2_18 = arith.constant 2 : index
    %c0_19 = arith.constant 0 : index
    %c0_20 = arith.constant 0 : index
    %23 = vector.load %arg8[%c2_18, %c0_19, %c0_20] : memref<8x18x128xbf16, #tpu.memory_space<vmem>>, vector<6x16x128xbf16>
    %24 = vector.shape_cast %23 : vector<6x16x128xbf16> to vector<96x128xbf16>
    %25 = tpu.concatenate %20, %22, %24 in 1 : vector<96x128xbf16>, vector<96x128xbf16>, vector<96x128xbf16> -> vector<96x384xbf16>
    %c0_21 = arith.constant 0 : index
    %c0_22 = arith.constant 0 : index
    %c0_23 = arith.constant 0 : index
    %26 = vector.load %arg5[%c0_21, %c0_22, %c0_23] : memref<3x384x128xbf16, #tpu.memory_space<vmem>>, vector<1x384x128xbf16>
    %27 = vector.shape_cast %26 : vector<1x384x128xbf16> to vector<384x128xbf16>
    %cst_24 = arith.constant dense<0.000000e+00> : vector<96x128xf32>
    %28 = tpu.matmul %25, %27, %cst_24 {dimension_numbers = #tpu.dot_dimension_numbers<[1], [0], [0], [1], [0, 0, 1, 1], [], []>} : vector<96x384xbf16>, vector<384x128xbf16>, vector<96x128xf32> -> vector<96x128xf32>
    %29 = arith.addf %18, %28 : vector<96x128xf32>
    %c0_25 = arith.constant 0 : index
    %c1_26 = arith.constant 1 : index
    %c0_27 = arith.constant 0 : index
    %30 = vector.load %arg8[%c0_25, %c1_26, %c0_27] : memref<8x18x128xbf16, #tpu.memory_space<vmem>>, vector<6x16x128xbf16>
    %31 = vector.shape_cast %30 : vector<6x16x128xbf16> to vector<96x128xbf16>
    %c1_28 = arith.constant 1 : index
    %c1_29 = arith.constant 1 : index
    %c0_30 = arith.constant 0 : index
    %32 = vector.load %arg8[%c1_28, %c1_29, %c0_30] : memref<8x18x128xbf16, #tpu.memory_space<vmem>>, vector<6x16x128xbf16>
    %33 = vector.shape_cast %32 : vector<6x16x128xbf16> to vector<96x128xbf16>
    %c2_31 = arith.constant 2 : index
    %c1_32 = arith.constant 1 : index
    %c0_33 = arith.constant 0 : index
    %34 = vector.load %arg8[%c2_31, %c1_32, %c0_33] : memref<8x18x128xbf16, #tpu.memory_space<vmem>>, vector<6x16x128xbf16>
    %35 = vector.shape_cast %34 : vector<6x16x128xbf16> to vector<96x128xbf16>
    %36 = tpu.concatenate %31, %33, %35 in 1 : vector<96x128xbf16>, vector<96x128xbf16>, vector<96x128xbf16> -> vector<96x384xbf16>
    %c1_34 = arith.constant 1 : index
    %c0_35 = arith.constant 0 : index
    %c0_36 = arith.constant 0 : index
    %37 = vector.load %arg5[%c1_34, %c0_35, %c0_36] : memref<3x384x128xbf16, #tpu.memory_space<vmem>>, vector<1x384x128xbf16>
    %38 = vector.shape_cast %37 : vector<1x384x128xbf16> to vector<384x128xbf16>
    %cst_37 = arith.constant dense<0.000000e+00> : vector<96x128xf32>
    %39 = tpu.matmul %36, %38, %cst_37 {dimension_numbers = #tpu.dot_dimension_numbers<[1], [0], [0], [1], [0, 0, 1, 1], [], []>} : vector<96x384xbf16>, vector<384x128xbf16>, vector<96x128xf32> -> vector<96x128xf32>
    %40 = arith.addf %29, %39 : vector<96x128xf32>
    %c0_38 = arith.constant 0 : index
    %c2_39 = arith.constant 2 : index
    %c0_40 = arith.constant 0 : index
    %41 = vector.load %arg8[%c0_38, %c2_39, %c0_40] : memref<8x18x128xbf16, #tpu.memory_space<vmem>>, vector<6x16x128xbf16>
    %42 = vector.shape_cast %41 : vector<6x16x128xbf16> to vector<96x128xbf16>
    %c1_41 = arith.constant 1 : index
    %c2_42 = arith.constant 2 : index
    %c0_43 = arith.constant 0 : index
    %43 = vector.load %arg8[%c1_41, %c2_42, %c0_43] : memref<8x18x128xbf16, #tpu.memory_space<vmem>>, vector<6x16x128xbf16>
    %44 = vector.shape_cast %43 : vector<6x16x128xbf16> to vector<96x128xbf16>
    %c2_44 = arith.constant 2 : index
    %c2_45 = arith.constant 2 : index
    %c0_46 = arith.constant 0 : index
    %45 = vector.load %arg8[%c2_44, %c2_45, %c0_46] : memref<8x18x128xbf16, #tpu.memory_space<vmem>>, vector<6x16x128xbf16>
    %46 = vector.shape_cast %45 : vector<6x16x128xbf16> to vector<96x128xbf16>
    %47 = tpu.concatenate %42, %44, %46 in 1 : vector<96x128xbf16>, vector<96x128xbf16>, vector<96x128xbf16> -> vector<96x384xbf16>
    %c2_47 = arith.constant 2 : index
    %c0_48 = arith.constant 0 : index
    %c0_49 = arith.constant 0 : index
    %48 = vector.load %arg5[%c2_47, %c0_48, %c0_49] : memref<3x384x128xbf16, #tpu.memory_space<vmem>>, vector<1x384x128xbf16>
    %49 = vector.shape_cast %48 : vector<1x384x128xbf16> to vector<384x128xbf16>
    %cst_50 = arith.constant dense<0.000000e+00> : vector<96x128xf32>
    %50 = tpu.matmul %47, %49, %cst_50 {dimension_numbers = #tpu.dot_dimension_numbers<[1], [0], [0], [1], [0, 0, 1, 1], [], []>} : vector<96x384xbf16>, vector<384x128xbf16>, vector<96x128xf32> -> vector<96x128xf32>
    %51 = arith.addf %40, %50 : vector<96x128xf32>
    %cst_51 = arith.constant 0.000000e+00 : f32
    %52 = vector.broadcast %cst_51 : f32 to vector<96x128xf32>
    %53 = arith.maximumf %51, %52 : vector<96x128xf32>
    %54 = vector.shape_cast %53 : vector<96x128xf32> to vector<6x16x128xf32>
    %55 = arith.truncf %54 : vector<6x16x128xf32> to vector<6x16x128xbf16>
    %c0_52 = arith.constant 0 : index
    %c1_53 = arith.constant 1 : index
    %c0_54 = arith.constant 0 : index
    %56 = vector.load %arg8[%c0_52, %c1_53, %c0_54] : memref<8x18x128xbf16, #tpu.memory_space<vmem>>, vector<6x16x128xbf16>
    tpu.vector_store %arg8[%c0_52, %c1_53, %c0_54], %55 {strides = array<i32>} : memref<8x18x128xbf16, #tpu.memory_space<vmem>>, vector<6x16x128xbf16>,
    %c0_i32_55 = arith.constant 0 : i32
    %57 = arith.cmpi eq, %arg1, %c0_i32_55 : i32
    %58 = arith.extui %57 : i1 to i32
    %c0_i32_56 = arith.constant 0 : i32
    %59 = arith.cmpi ne, %58, %c0_i32_56 : i32
    scf.if %59 {
      %cst_107 = arith.constant 0.000000e+00 : bf16
      %107 = vector.broadcast %cst_107 : bf16 to vector<1x16x128xbf16>
      %c0_108 = arith.constant 0 : index
      %c1_109 = arith.constant 1 : index
      %c0_110 = arith.constant 0 : index
      %108 = vector.load %arg8[%c0_108, %c1_109, %c0_110] : memref<8x18x128xbf16, #tpu.memory_space<vmem>>, vector<1x16x128xbf16>
      tpu.vector_store %arg8[%c0_108, %c1_109, %c0_110], %107 {strides = array<i32>} : memref<8x18x128xbf16, #tpu.memory_space<vmem>>, vector<1x16x128xbf16>,
    } else {
    }
    %c1_i32_57 = arith.constant 1 : i32
    %60 = arith.cmpi eq, %arg1, %c1_i32_57 : i32
    %61 = arith.extui %60 : i1 to i32
    %c0_i32_58 = arith.constant 0 : i32
    %62 = arith.cmpi ne, %61, %c0_i32_58 : i32
    scf.if %62 {
      %cst_107 = arith.constant 0.000000e+00 : bf16
      %107 = vector.broadcast %cst_107 : bf16 to vector<1x16x128xbf16>
      %c5 = arith.constant 5 : index
      %c1_108 = arith.constant 1 : index
      %c0_109 = arith.constant 0 : index
      %108 = vector.load %arg8[%c5, %c1_108, %c0_109] : memref<8x18x128xbf16, #tpu.memory_space<vmem>>, vector<1x16x128xbf16>
      tpu.vector_store %arg8[%c5, %c1_108, %c0_109], %107 {strides = array<i32>} : memref<8x18x128xbf16, #tpu.memory_space<vmem>>, vector<1x16x128xbf16>,
    } else {
    }
    %cst_59 = arith.constant 0.000000e+00 : f32
    %63 = vector.broadcast %cst_59 : f32 to vector<64x128xf32>
    %c0_60 = arith.constant 0 : index
    %c0_61 = arith.constant 0 : index
    %c0_62 = arith.constant 0 : index
    %64 = vector.load %arg8[%c0_60, %c0_61, %c0_62] : memref<8x18x128xbf16, #tpu.memory_space<vmem>>, vector<4x16x128xbf16>
    %65 = vector.shape_cast %64 : vector<4x16x128xbf16> to vector<64x128xbf16>
    %c1_63 = arith.constant 1 : index
    %c0_64 = arith.constant 0 : index
    %c0_65 = arith.constant 0 : index
    %66 = vector.load %arg8[%c1_63, %c0_64, %c0_65] : memref<8x18x128xbf16, #tpu.memory_space<vmem>>, vector<4x16x128xbf16>
    %67 = vector.shape_cast %66 : vector<4x16x128xbf16> to vector<64x128xbf16>
    %c2_66 = arith.constant 2 : index
    %c0_67 = arith.constant 0 : index
    %c0_68 = arith.constant 0 : index
    %68 = vector.load %arg8[%c2_66, %c0_67, %c0_68] : memref<8x18x128xbf16, #tpu.memory_space<vmem>>, vector<4x16x128xbf16>
    %69 = vector.shape_cast %68 : vector<4x16x128xbf16> to vector<64x128xbf16>
    %70 = tpu.concatenate %65, %67, %69 in 1 : vector<64x128xbf16>, vector<64x128xbf16>, vector<64x128xbf16> -> vector<64x384xbf16>
    %c0_69 = arith.constant 0 : index
    %c0_70 = arith.constant 0 : index
    %c0_71 = arith.constant 0 : index
    %71 = vector.load %arg6[%c0_69, %c0_70, %c0_71] : memref<3x384x128xbf16, #tpu.memory_space<vmem>>, vector<1x384x128xbf16>
    %72 = vector.shape_cast %71 : vector<1x384x128xbf16> to vector<384x128xbf16>
    %cst_72 = arith.constant dense<0.000000e+00> : vector<64x128xf32>
    %73 = tpu.matmul %70, %72, %cst_72 {dimension_numbers = #tpu.dot_dimension_numbers<[1], [0], [0], [1], [0, 0, 1, 1], [], []>} : vector<64x384xbf16>, vector<384x128xbf16>, vector<64x128xf32> -> vector<64x128xf32>
    %74 = arith.addf %63, %73 : vector<64x128xf32>
    %c0_73 = arith.constant 0 : index
    %c1_74 = arith.constant 1 : index
    %c0_75 = arith.constant 0 : index
    %75 = vector.load %arg8[%c0_73, %c1_74, %c0_75] : memref<8x18x128xbf16, #tpu.memory_space<vmem>>, vector<4x16x128xbf16>
    %76 = vector.shape_cast %75 : vector<4x16x128xbf16> to vector<64x128xbf16>
    %c1_76 = arith.constant 1 : index
    %c1_77 = arith.constant 1 : index
    %c0_78 = arith.constant 0 : index
    %77 = vector.load %arg8[%c1_76, %c1_77, %c0_78] : memref<8x18x128xbf16, #tpu.memory_space<vmem>>, vector<4x16x128xbf16>
    %78 = vector.shape_cast %77 : vector<4x16x128xbf16> to vector<64x128xbf16>
    %c2_79 = arith.constant 2 : index
    %c1_80 = arith.constant 1 : index
    %c0_81 = arith.constant 0 : index
    %79 = vector.load %arg8[%c2_79, %c1_80, %c0_81] : memref<8x18x128xbf16, #tpu.memory_space<vmem>>, vector<4x16x128xbf16>
    %80 = vector.shape_cast %79 : vector<4x16x128xbf16> to vector<64x128xbf16>
    %81 = tpu.concatenate %76, %78, %80 in 1 : vector<64x128xbf16>, vector<64x128xbf16>, vector<64x128xbf16> -> vector<64x384xbf16>
    %c1_82 = arith.constant 1 : index
    %c0_83 = arith.constant 0 : index
    %c0_84 = arith.constant 0 : index
    %82 = vector.load %arg6[%c1_82, %c0_83, %c0_84] : memref<3x384x128xbf16, #tpu.memory_space<vmem>>, vector<1x384x128xbf16>
    %83 = vector.shape_cast %82 : vector<1x384x128xbf16> to vector<384x128xbf16>
    %cst_85 = arith.constant dense<0.000000e+00> : vector<64x128xf32>
    %84 = tpu.matmul %81, %83, %cst_85 {dimension_numbers = #tpu.dot_dimension_numbers<[1], [0], [0], [1], [0, 0, 1, 1], [], []>} : vector<64x384xbf16>, vector<384x128xbf16>, vector<64x128xf32> -> vector<64x128xf32>
    %85 = arith.addf %74, %84 : vector<64x128xf32>
    %c0_86 = arith.constant 0 : index
    %c2_87 = arith.constant 2 : index
    %c0_88 = arith.constant 0 : index
    %86 = vector.load %arg8[%c0_86, %c2_87, %c0_88] : memref<8x18x128xbf16, #tpu.memory_space<vmem>>, vector<4x16x128xbf16>
    %87 = vector.shape_cast %86 : vector<4x16x128xbf16> to vector<64x128xbf16>
    %c1_89 = arith.constant 1 : index
    %c2_90 = arith.constant 2 : index
    %c0_91 = arith.constant 0 : index
    %88 = vector.load %arg8[%c1_89, %c2_90, %c0_91] : memref<8x18x128xbf16, #tpu.memory_space<vmem>>, vector<4x16x128xbf16>
    %89 = vector.shape_cast %88 : vector<4x16x128xbf16> to vector<64x128xbf16>
    %c2_92 = arith.constant 2 : index
    %c2_93 = arith.constant 2 : index
    %c0_94 = arith.constant 0 : index
    %90 = vector.load %arg8[%c2_92, %c2_93, %c0_94] : memref<8x18x128xbf16, #tpu.memory_space<vmem>>, vector<4x16x128xbf16>
    %91 = vector.shape_cast %90 : vector<4x16x128xbf16> to vector<64x128xbf16>
    %92 = tpu.concatenate %87, %89, %91 in 1 : vector<64x128xbf16>, vector<64x128xbf16>, vector<64x128xbf16> -> vector<64x384xbf16>
    %c2_95 = arith.constant 2 : index
    %c0_96 = arith.constant 0 : index
    %c0_97 = arith.constant 0 : index
    %93 = vector.load %arg6[%c2_95, %c0_96, %c0_97] : memref<3x384x128xbf16, #tpu.memory_space<vmem>>, vector<1x384x128xbf16>
    %94 = vector.shape_cast %93 : vector<1x384x128xbf16> to vector<384x128xbf16>
    %cst_98 = arith.constant dense<0.000000e+00> : vector<64x128xf32>
    %95 = tpu.matmul %92, %94, %cst_98 {dimension_numbers = #tpu.dot_dimension_numbers<[1], [0], [0], [1], [0, 0, 1, 1], [], []>} : vector<64x384xbf16>, vector<384x128xbf16>, vector<64x128xf32> -> vector<64x128xf32>
    %96 = arith.addf %85, %95 : vector<64x128xf32>
    %c0_99 = arith.constant 0 : index
    %c0_100 = arith.constant 0 : index
    %c0_101 = arith.constant 0 : index
    %c0_102 = arith.constant 0 : index
    %97 = vector.load %arg2[%c0_99, %c0_100, %c0_101, %c0_102] : memref<1x4x16x128xbf16, #tpu.memory_space<vmem>>, vector<1x4x16x128xbf16>
    %98 = vector.shape_cast %97 : vector<1x4x16x128xbf16> to vector<4x16x128xbf16>
    %99 = vector.shape_cast %98 : vector<4x16x128xbf16> to vector<64x128xbf16>
    %100 = arith.extf %99 : vector<64x128xbf16> to vector<64x128xf32>
    %101 = arith.addf %96, %100 : vector<64x128xf32>
    %cst_103 = arith.constant 0.000000e+00 : f32
    %102 = vector.broadcast %cst_103 : f32 to vector<64x128xf32>
    %103 = arith.maximumf %101, %102 : vector<64x128xf32>
    %c0_104 = arith.constant 0 : index
    %c0_105 = arith.constant 0 : index
    %c0_106 = arith.constant 0 : index
    %104 = vector.load %arg7[%c0_104, %c0_105, %c0_106] : memref<1x64x128xf32, #tpu.memory_space<vmem>>, vector<1x64x128xf32>
    %105 = vector.shape_cast %104 : vector<1x64x128xf32> to vector<64x128xf32>
    %106 = vector.shape_cast %103 : vector<64x128xf32> to vector<1x64x128xf32>
    tpu.vector_store %arg7[%c0_104, %c0_105, %c0_106], %106 {strides = array<i32>} : memref<1x64x128xf32, #tpu.memory_space<vmem>>, vector<1x64x128xf32>,
    return
  }
  func.func @transform_0(%arg0: i32, %arg1: i32) -> (i32, i32, i32, i32) {
    %c0_i32 = arith.constant 0 : i32
    %c0_i32_0 = arith.constant 0 : i32
    %c0_i32_1 = arith.constant 0 : i32
    return %arg0, %arg1, %c0_i32, %c0_i32_0 : i32, i32, i32, i32
  }
  func.func @transform_1(%arg0: i32, %arg1: i32) -> (i32, i32, i32, i32) {
    %c2_i32 = arith.constant 2 : i32
    %0 = arith.muli %arg1, %c2_i32 : i32
    %c1_i32 = arith.constant 1 : i32
    %1 = arith.subi %0, %c1_i32 : i32
    %c0_i32 = arith.constant 0 : i32
    %2 = arith.maxsi %1, %c0_i32 : i32
    %c0_i32_0 = arith.constant 0 : i32
    %c0_i32_1 = arith.constant 0 : i32
    %c0_i32_2 = arith.constant 0 : i32
    return %arg0, %2, %c0_i32_0, %c0_i32_1 : i32, i32, i32, i32
  }
  func.func @transform_2(%arg0: i32, %arg1: i32) -> (i32, i32, i32, i32) {
    %c1_i32 = arith.constant 1 : i32
    %0 = arith.addi %arg1, %c1_i32 : i32
    %c2_i32 = arith.constant 2 : i32
    %1 = arith.muli %0, %c2_i32 : i32
    %c3_i32 = arith.constant 3 : i32
    %2 = arith.minsi %1, %c3_i32 : i32
    %c0_i32 = arith.constant 0 : i32
    %c0_i32_0 = arith.constant 0 : i32
    %c0_i32_1 = arith.constant 0 : i32
    return %arg0, %2, %c0_i32, %c0_i32_0 : i32, i32, i32, i32
  }
  func.func @transform_3(%arg0: i32, %arg1: i32) -> (i32, i32, i32) {
    %c0_i32 = arith.constant 0 : i32
    %c0_i32_0 = arith.constant 0 : i32
    %c0_i32_1 = arith.constant 0 : i32
    %c0_i32_2 = arith.constant 0 : i32
    return %c0_i32, %c0_i32_0, %c0_i32_1 : i32, i32, i32
  }
  func.func @transform_4(%arg0: i32, %arg1: i32) -> (i32, i32, i32) {
    %c0_i32 = arith.constant 0 : i32
    %c0_i32_0 = arith.constant 0 : i32
    %c0_i32_1 = arith.constant 0 : i32
    %c0_i32_2 = arith.constant 0 : i32
    return %c0_i32, %c0_i32_0, %c0_i32_1 : i32, i32, i32
  }
  func.func @transform_5(%arg0: i32, %arg1: i32) -> (i32, i32, i32) {
    %c0_i32 = arith.constant 0 : i32
    %c0_i32_0 = arith.constant 0 : i32
    return %arg0, %arg1, %c0_i32 : i32, i32, i32
  }
}

</mosaic_0001>

<bundles_post_ra>
// kernel: tpu_custom_call.1
= control target key start
LH: loop header
LB: loop body
LE: loop exit
PB: predicated region body
PF: predicated region fallthrough
CT: control target
= control target key end

     0   :  { %s7888_s0 = inlined_call_operand.hbm [shape: bf16[2,8,16,128], index: 0, kind: input, shape index: {}]   ;;  %s7889_s1 = inlined_call_operand.hbm [shape: bf16[2,8,16,128], index: 1, kind: input, shape index: {}]   ;;  %s7890_s2 = inlined_call_operand.hbm [shape: bf16[2,8,16,128], index: 2, kind: input, shape index: {}]   ;;  %s7891_s3 = inlined_call_operand.hbm [shape: bf16[3,384,128], index: 3, kind: input, shape index: {}]   ;;  %s7892_s4 = inlined_call_operand.hbm [shape: bf16[3,384,128], index: 4, kind: input, shape index: {}]   ;;  %s7893_s5 = inlined_call_operand.hbm [shape: f32[2,128,128], index: 5, kind: output, shape index: {}]  }
   0x1   :  { %7927 = sst [smem:[#allocation34_spill]] %s7888_s0 }
   0x2   :  { %7928 = sst [smem:[#allocation35_spill]] %s7889_s1 }
   0x3   :  { %7929 = sst [smem:[#allocation36_spill]] %s7890_s2 }
   0x4   :  { %7930 = sst [smem:[#allocation37_spill]] %s7891_s3 }
   0x5   :  { %7931 = sst [smem:[#allocation38_spill]] %s7892_s4 }
   0x6   :  { %7932 = sst [smem:[#allocation39_spill]] %s7893_s5 }
   0x7   :  { %10 = vsyncpa [#allocation4], 0 }
   0x8   :  { %12 = vsyncpa [#allocation4 + $0x1], 0 }
   0x9   :  { %13 = vsyncpa [#allocation7], 0 }
   0xa   :  { %15 = vsyncpa [#allocation7 + $0x1], 0 }
   0xb   :  { %16 = vsyncpa [#allocation10], 0 }
   0xc   :  { %17 = vsyncpa [#allocation5], 0 }
   0xd   :  { %19 = vsyncpa [#allocation5 + $0x1], 0  ;;  %s6473_s18 = smov 0   ;;  %s6475_s19 = smov 0  }
   0xe   :  { %s6477_s20 = smov 0   ;;  %s6479_s21 = smov 0  }
   0xf   :  { %s6481_s22 = smov 0   ;;  %s6483_s23 = smov 0  }
  0x10   :  { %s6485_s24 = smov 0   ;;  %s6487_s25 = smov 0  }
  0x11   :  { %s6489_s26 = smov 0   ;;  %s6491_s27 = smov 0  }
  0x12   :  { %s6493_s28 = smov 0   ;;  %s6495_s29 = smov 0  }
  0x13   :  { %s6497_s30 = smov 0   ;;  %s6499_s6 = smov 0  }
  0x14 LB: > { %7933 = sst [smem:[#allocation18_spill]] %s6375_s18  ;;  %s6544_s7 = sadd.s32 4294967295, %s6427_s6   ;;  %s6427_s6 = sphi %s6499_s6, %s25_s6   ;;  %s6423_s30 = sphi %s6497_s30, %s8039_s30   ;;  %s6419_s29 = sphi %s6495_s29, %s8038_s29   ;;  %s6415_s28 = sphi %s6493_s28, %s8037_s28   ;;  %s6411_s27 = sphi %s6491_s27, %s8036_s27   ;;  %s6407_s26 = sphi %s6489_s26, %s8047_s26   ;;  %s6403_s25 = sphi %s6487_s25, %s8046_s25   ;;  %s6399_s24 = sphi %s6485_s24, %s8045_s24   ;;  %s6395_s23 = sphi %s6483_s23, %s8044_s23   ;;  %s6391_s22 = sphi %s6481_s22, %s8043_s22   ;;  %s6387_s21 = sphi %s6479_s21, %s8042_s21   ;;  %s6383_s20 = sphi %s6477_s20, %s8041_s20   ;;  %s6379_s19 = sphi %s6475_s19, %s8033_s19   ;;  %s6375_s18 = sphi %s6473_s18, %s8032_s18  }
  0x15   : > { %7934 = sst [smem:[#allocation19_spill]] %s6379_s19  ;;  %p4799_p0 = scmp.ge.s32.totalorder %s6427_s6, 1 }
  0x16   : > { %7935 = sst [smem:[#allocation20_spill]] %s6383_s20  ;;  %p7894_p1 = scmp.eq.s32.totalorder %s6544_s7, 0 }
  0x17   : > { %7936 = sst [smem:[#allocation21_spill]] %s6391_s22  ;;  %p212_p3 = scmp.lt.s32.totalorder %s6427_s6, 5 }
  0x18   : > { %7937 = sst [smem:[#allocation22_spill]] %s6411_s27  ;;  %s6429_s9 = smov [#allocation9]  }
  0x19   : > { %7938 = sst [smem:[#allocation23_spill]] %s6415_s28  ;;  %p6550_p4 = pnand %p4799_p0, %p212_p3 }
  0x1a   : > { %7939 = sst [smem:[#allocation24_spill]] %s6419_s29  ;;  %s224_s10 = sshll.u32 %s6429_s9, 4  ;;  %s225_s10 = int_to_ptr.vmem [resolvable:$true] %s224_s10 }
  0x1b   : > { %7940 = sst [smem:[#allocation25_spill]] %s6423_s30  ;;  %p5783_p5 = pneg %p6550_p4 }
  0x1c   : > { %s7941_s8 = scalar_select %p6550_p4, 1, 0 }
  0x1d   : > { %p6558_p6 = pnand %p5783_p5, %p7894_p1  ;;  %s7944_s3 = sld [smem:[#allocation37_spill]] }
  0x1e   : > { %7942 = sst [smem:[#allocation26_spill]] %s7941_s8 }
  0x1f   : > { %p7915_p8 = pneg %p6558_p6 }
  0x23   : > { %s6123_s14 = scalar_lea.hbm %s7944_s3, 9216 }
  0x24   : > { %p6124_p7 = scmp.ne.s32.totalorder %s7944_s3, %s6123_s14  ;;  %p6130_p11 = scmp.lt.u32.totalorder %s6123_s14, %s7944_s3 }
  0x26   : > { %p6126_p9 = pnand %p7915_p8, %p6124_p7 }
  0x28   : > { %p6127_p10 = pneg %p6126_p9 }
  0x2a   : > { %p6132_p12 = pnand %p6130_p11, %p6127_p10 }
  0x2c   : > { %6135 = shalt.err (!%p6132_p12)
}
  0x2d   : > { %s6136_s12 = scalar_lea.vmem %s225_s10, 9216  ;;  %p6144_p5 = scmp.lt.s32.totalorder %s225_s10, %s225_s10 }
  0x2e   : > { %p6137_p13 = scmp.ne.s32.totalorder %s225_s10, %s6136_s12  ;;  %p6145_p2 = scmp.lt.s32.totalorder %s6136_s12, %s6136_s12 }
  0x30   : > { %p6139_p0 = pnand %p6137_p13, %p7915_p8  ;;  %p6146_p1 = por %p6145_p2, %p6144_p5 }
  0x32   : > { %p6140_p3 = pneg %p6139_p0 }
  0x34   : > { %p6147_p4 = pnand %p6146_p1, %p6140_p3 }
  0x36   : > { %6150 = shalt.err (!%p6147_p4)
}
  0x37   : > { %s7899_s13 = smov 64   ;;  %s7901_s14 = smov 4  }
  0x38   : > { %5786 = dma.hbm_to_vmem [thread:$0]  (!%p6558_p6), %s7944_s3, 9216, %s225_s10, [#allocation10], %s7899_s13, %s7899_s13, %s7901_s14  }
  0x39   : > { %s34_s17 = sadd.s32 1, %s6419_s29  ;;  %s37_s9 = sadd.s32 1, %s6423_s30 }
  0x3a   : > { %p35_p1 = scmp.ge.s32.totalorder %s34_s17, 2  ;;  %p7914_p2 = scmp.eq.s32.totalorder %s6427_s6, 0 }
  0x3b   : > { %s4793_s12 = sshll.u32 %s6419_s29, 1  ;;  %s82_s5 = sadd.s32 1, %s6395_s23 }
  0x3c   : > { %s8049_s17 = smov (%p35_p1, %s34_s17), 0  ;;  %s8051_s9 = smov (!%p35_p1, %s37_s9), %s6423_s30 }
  0x3d   : > { %7945 = sst [smem:[#allocation27_spill]] %s8049_s17  ;;  %s42_s28 = ssub.s32 %s6419_s29, %s8049_s17 }
  0x3e   : > { %s4794_s27 = sadd.s32 4294967295, %s4793_s12  ;;  %p39_p4 = scmp.ge.s32.totalorder %s8051_s9, 2 }
  0x3f   : > { %p71_p7 = scmp.gt.s32.totalorder %s4794_s27, 0  ;;  %s4795_s10 = sshll.u32 %s8049_s17, 1 }
  0x40   : > { %p89_p9 = scmp.ne.s32.totalorder %s6395_s23, %s6391_s22  ;;  %s8053_s9 = smov (%p39_p4, %s8051_s9), 0 }
  0x41   : > { %7946 = sst [smem:[#allocation28_spill]] %s8053_s9  ;;  %s8055_s27 = smov (!%p71_p7, %s4794_s27), 0 }
  0x42   : > { %s6604_s15 = ssub.s32 %s6423_s30, %s8053_s9  ;;  %s4796_s16 = sadd.s32 4294967295, %s4795_s10 }
  0x43   : > { %7947 = sst [smem:[#allocation29_spill]] %s6604_s15  ;;  %s6607_s13 = sor.u32 %s42_s28, %s6604_s15 }
  0x44   : > { %p75_p10 = scmp.gt.s32.totalorder %s4796_s16, 0  ;;  %p6612_p12 = por %p89_p9, %p7914_p2 }
  0x45   : > { %p95_p13 = scmp.ne.s32.totalorder %s6391_s22, %s6387_s21  ;;  %s6618_s3 = sadd.s32 2, %s4793_s12 }
  0x46   : > { %s8057_s16 = smov (!%p75_p10, %s4796_s16), 0  ;;  %p7949_p3 = scmp.eq.s32.totalorder %s6544_s7, 0 }
  0x47   : > { %s78_s9 = ssub.s32 %s8055_s27, %s8057_s16  ;;  %s6628_s8 = sadd.s32 2, %s4795_s10 }
  0x48   : > { %s79_s28 = sor.u32 %s78_s9, %s6604_s15  ;;  %p6624_p5 = por %p95_p13, %p7949_p3 }
  0x49   : > { %p80_p1 = scmp.eq.s32.totalorder %s79_s28, 0  ;;  %p7913_p7 = scmp.lt.s32.totalorder %s6427_s6, 4 }
  0x4a   : > { %s7950_s17 = scalar_select %p6624_p5, 1, 0 }
  0x4b   : > { %s6633_s21 = scalar_select %p80_p1, %s6395_s23, %s82_s5  }
  0x4c   : > { %7951 = sst [smem:[#allocation30_spill]] %s7950_s17  ;;  %s6636_s12 = sshll.u32 %s6423_s30, 4 }
  0x4d   : > { %s275_s16 = sand.u32 1, %s6427_s6   ;;  %s277_s9 = sand.u32 1, %s6395_s23  }
  0x4e   : > { %s4808_s22 = sshll.u32 %s277_s9, 4  ;;  %s5122_s2 = sshll.u32 %s8055_s27, 2 }
  0x4f   : > { %s290_s15 = sadd.s32 %s5122_s2, %s6636_s12  ;;  %s279_s17 = scalar_lea.vmem [#allocation6], %s4808_s22 }
  0x50   : > { %s4814_s18 = sshll.u32 %s290_s15, 6  ;;  %s293_s28 = sshll.u32 %s279_s17, 4  ;;  %s6646_s28 = int_to_ptr.vmem [resolvable:$true] %s293_s28 }
  0x51   : > { %s7952_s1 = sld [smem:[#allocation35_spill]]  ;;  %p6652_p9 = pnand %p7913_p7, %p6612_p12 }
  0x52   : > { %s6432_s2 = smov [#allocation11]  }
  0x53   : > { %s237_s22 = sshll.u32 %s6432_s2, 4  ;;  %p6153_p13 = pneg %p6652_p9  ;;  %s6656_s22 = int_to_ptr.vmem [resolvable:$true] %s237_s22 }
  0x57   : > { %s6644_s10 = scalar_lea.hbm %s7952_s1, %s4814_s18  ;;  %s6658_s18 = scalar_lea.sflag [#allocation7], %s275_s16 }
  0x58   : > { %s6151_s19 = scalar_lea.hbm %s6644_s10, 256  ;;  %s6156_s14 = scalar_lea.hbm %s7952_s1, 2048 }
  0x59   : > { %p6152_p10 = scmp.ne.s32.totalorder %s6644_s10, %s6151_s19  ;;  %p6157_p12 = scmp.lt.u32.totalorder %s6644_s10, %s7952_s1 }
  0x5a   : > { %p6158_p4 = scmp.lt.u32.totalorder %s6156_s14, %s6151_s19  ;;  %p6160_p7 = scmp.lt.u32.totalorder %s6151_s19, %s6644_s10 }
  0x5b   : > { %p6154_p3 = pnand %p6153_p13, %p6152_p10 }
  0x5c   : > { %p6159_p0 = por %p6158_p4, %p6157_p12 }
  0x5d   : > { %p6155_p1 = pneg %p6154_p3 }
  0x5e   : > { %p6161_p2 = por %p6160_p7, %p6159_p0 }
  0x60   : > { %p6162_p11 = pnand %p6161_p2, %p6155_p1 }
  0x62   : > { %6165 = shalt.err (!%p6162_p11)
}
  0x63   : > { %s6166_s16 = scalar_lea.vmem %s6646_s28, 256  ;;  %s6433_s9 = smov [#allocation6]  }
  0x64   : > { %p6167_p10 = scmp.ne.s32.totalorder %s6646_s28, %s6166_s16  ;;  %s6171_s2 = sshll.u32 %s6433_s9, 4  ;;  %s6172_s2 = int_to_ptr.vmem [resolvable:$false] %s6171_s2 }
  0x65   : > { %s6173_s20 = scalar_lea.vmem %s6172_s2, 512  ;;  %p6174_p5 = scmp.lt.s32.totalorder %s6646_s28, %s6172_s2 }
  0x66   : > { %p6169_p3 = pnand %p6167_p10, %p6153_p13  ;;  %p6175_p4 = scmp.lt.s32.totalorder %s6173_s20, %s6166_s16 }
  0x68   : > { %p6170_p8 = pneg %p6169_p3  ;;  %p6176_p12 = por %p6175_p4, %p6174_p5 }
  0x6a   : > { %p6177_p0 = pnand %p6176_p12, %p6170_p8 }
  0x6c   : > { %6180 = shalt.err (!%p6177_p0)
}
  0x6d   : > { %s7954_s19 = smov 4   ;;  %s7955_s27 = smov 64  }
  0x6e   : > { %5796 = dma.hbm_to_vmem [thread:$0]  (!%p6652_p9), %s6644_s10, 256, %s6646_s28, %s6658_s18, %s7955_s27, %s7955_s27, %s7954_s19  }
  0x6f   : > { %s7956_s4 = sld [smem:[#allocation38_spill]]  ;;  %p7957_p8 = pneg %p6558_p6 }
  0x75   : > { %s6181_s15 = scalar_lea.hbm %s7956_s4, 9216 }
  0x76   : > { %p6182_p2 = scmp.ne.s32.totalorder %s7956_s4, %s6181_s15  ;;  %p6188_p7 = scmp.lt.u32.totalorder %s6181_s15, %s7956_s4 }
  0x78   : > { %p6184_p11 = pnand %p6182_p2, %p7957_p8 }
  0x7a   : > { %p6185_p5 = pneg %p6184_p11 }
  0x7c   : > { %p6190_p13 = pnand %p6188_p7, %p6185_p5 }
  0x7e   : > { %6193 = shalt.err (!%p6190_p13)
}
  0x7f   : > { %s6194_s28 = scalar_lea.vmem %s6656_s22, 9216  ;;  %p7958_p1 = pmov %p7957_p8 }
  0x80   : > { %p6195_p9 = scmp.ne.s32.totalorder %s6656_s22, %s6194_s28  ;;  %p6202_p4 = scmp.lt.s32.totalorder %s6656_s22, %s6656_s22 }
  0x81   : > { %p6203_p12 = scmp.lt.s32.totalorder %s6194_s28, %s6194_s28 }
  0x82   : > { %p6197_p10 = pnand %p6195_p9, %p7958_p1 }
  0x83   : > { %p6204_p0 = por %p6203_p12, %p6202_p4 }
  0x84   : > { %p6198_p3 = pneg %p6197_p10 }
  0x86   : > { %p6205_p2 = pnand %p6204_p0, %p6198_p3 }
  0x88   : > { %6208 = shalt.err (!%p6205_p2)
}
  0x89   : > { %5789 = dma.hbm_to_vmem [thread:$0]  (!%p6558_p6), %s7956_s4, 9216, %s6656_s22, [#allocation10], %s7955_s27, %s7955_s27, %s7954_s19  }
  0x8a   : > { %s4792_s11 = sadd.s32 4294967294, %s6427_s6   ;;  %s46_s14 = sadd.s32 1, %s6407_s26 }
  0x8b   : > { %p53_p8 = scmp.ne.s32.totalorder %s6407_s26, %s6403_s25  ;;  %p7959_p11 = scmp.eq.s32.totalorder %s6607_s13, 0 }
  0x8c   : > { %p7960_p5 = scmp.eq.s32.totalorder %s6427_s6, 0  ;;  %p59_p13 = scmp.ne.s32.totalorder %s6403_s25, %s6399_s24 }
  0x8d   : > { %s6724_s17 = scalar_select %p7959_p11, %s6407_s26, %s46_s14  }
  0x8e   : > { %p6728_p7 = por %p7960_p5, %p53_p8  ;;  %p7962_p9 = scmp.eq.s32.totalorder %s6544_s7, 3 }
  0x8f   : > { %p205_p6 = scmp.eq.s32.totalorder %s4792_s11, 3  ;;  %p7964_p10 = scmp.eq.s32.totalorder %s6544_s7, 0 }
  0x90   : > { %p6736_p1 = por %p7962_p9, %p53_p8  ;;  %s251_s13 = sand.u32 1, %s6407_s26  }
  0x91   : > { %p6742_p3 = por %p7964_p10, %p59_p13  ;;  %p6747_p4 = por %p205_p6, %p59_p13 }
  0x92   : > { %s7963_s9 = scalar_select %p6736_p1, 1, 0 }
  0x93   : > { %s7966_s2 = scalar_select %p6747_p4, 1, 0 }
  0x94   : > { %s4803_s5 = sshll.u32 %s251_s13, 5  ;;  %s5121_s16 = sshll.u32 %s6419_s29, 3 }
  0x95   : > { %s262_s28 = sadd.s32 %s5121_s16, %s6636_s12  ;;  %s255_s20 = scalar_lea.vmem [#allocation3], %s4803_s5 }
  0x96   : > { %s4807_s10 = sshll.u32 %s262_s28, 6  ;;  %s265_s14 = sshll.u32 %s255_s20, 4  ;;  %s6758_s14 = int_to_ptr.vmem [resolvable:$true] %s265_s14 }
  0x97   : > { %s7967_s0 = sld [smem:[#allocation34_spill]]  ;;  %p7968_p12 = scmp.lt.s32.totalorder %s6427_s6, 4 }
  0x98   : > { %s6768_s5 = scalar_lea.sflag [#allocation4], %s251_s13 }
  0x99   : > { %p6764_p0 = pnand %p7968_p12, %p6728_p7 }
  0x9b   : > { %p6211_p8 = pneg %p6764_p0 }
  0x9d   : > { %s6756_s11 = scalar_lea.hbm %s7967_s0, %s4807_s10  ;;  %s6214_s15 = scalar_lea.hbm %s7967_s0, 2048 }
  0x9e   : > { %s6209_s16 = scalar_lea.hbm %s6756_s11, 512  ;;  %p6215_p7 = scmp.lt.u32.totalorder %s6756_s11, %s7967_s0 }
  0x9f   : > { %p6210_p2 = scmp.ne.s32.totalorder %s6756_s11, %s6209_s16  ;;  %p6216_p13 = scmp.lt.u32.totalorder %s6214_s15, %s6209_s16 }
  0xa0   : > { %p6218_p6 = scmp.lt.u32.totalorder %s6209_s16, %s6756_s11 }
  0xa1   : > { %p6212_p11 = pnand %p6211_p8, %p6210_p2  ;;  %p6217_p9 = por %p6216_p13, %p6215_p7 }
  0xa3   : > { %p6213_p5 = pneg %p6212_p11  ;;  %p6219_p10 = por %p6218_p6, %p6217_p9 }
  0xa5   : > { %p6220_p12 = pnand %p6219_p10, %p6213_p5 }
  0xa7   : > { %6223 = shalt.err (!%p6220_p12)
}
  0xa8   : > { %s6224_s13 = scalar_lea.vmem %s6758_s14, 512  ;;  %s6434_s20 = smov [#allocation3]  }
  0xa9   : > { %p6225_p2 = scmp.ne.s32.totalorder %s6758_s14, %s6224_s13  ;;  %s6229_s1 = sshll.u32 %s6434_s20, 4  ;;  %s6230_s1 = int_to_ptr.vmem [resolvable:$false] %s6229_s1 }
  0xaa   : > { %s6231_s4 = scalar_lea.vmem %s6230_s1, 1024  ;;  %p6232_p1 = scmp.lt.s32.totalorder %s6758_s14, %s6230_s1 }
  0xab   : > { %p6227_p11 = pnand %p6225_p2, %p6211_p8  ;;  %p6233_p7 = scmp.lt.s32.totalorder %s6231_s4, %s6224_s13 }
  0xad   : > { %p6228_p4 = pneg %p6227_p11  ;;  %p6234_p13 = por %p6233_p7, %p6232_p1 }
  0xaf   : > { %p6235_p9 = pnand %p6234_p13, %p6228_p4 }
  0xb1   : > { %6238 = shalt.err (!%p6235_p9)
}
  0xb2   : > { %s7970_s16 = sld [smem:[#allocation20_spill]]  ;;  %s7971_s15 = sld [smem:[#allocation19_spill]] }
  0xb3   : > { %s7972_s28 = sld [smem:[#allocation18_spill]]  ;;  %s7973_s10 = sld [smem:[#allocation29_spill]] }
  0xb4   : > { %5793 = dma.hbm_to_vmem [thread:$0]  (!%p6764_p0), %s6756_s11, 512, %s6758_s14, %s6768_s5, %s7955_s27, %s7955_s27, %s7954_s19  }
  0xb5   : > { %p7974_p1 = scmp.lt.s32.totalorder %s6618_s3, 3  ;;  %p7975_p4 = scmp.lt.s32.totalorder %s6628_s8, 3 }
  0xb6   : > { %p7976_p6 = scmp.eq.s32.totalorder %s6427_s6, 0  ;;  %p7978_p2 = scmp.eq.s32.totalorder %s6544_s7, 0 }
  0xb7   : > { %s8059_s3 = smov (!%p7974_p1, %s6618_s3), 3  ;;  %s8061_s8 = smov (!%p7975_p4, %s6628_s8), 3 }
  0xb8   : > { %s118_s30 = sadd.s32 1, %s7970_s16  ;;  %p125_p8 = scmp.ne.s32.totalorder %s7970_s16, %s7971_s15 }
  0xb9   : > { %s114_s13 = ssub.s32 %s8059_s3, %s8061_s8  ;;  %p131_p5 = scmp.ne.s32.totalorder %s7971_s15, %s7972_s28 }
  0xba   : > { %s115_s20 = sor.u32 %s114_s13, %s7973_s10  ;;  %p6813_p10 = por %p125_p8, %p7976_p6 }
  0xbb   : > { %p116_p12 = scmp.eq.s32.totalorder %s115_s20, 0  ;;  %p6819_p11 = por %p131_p5, %p7978_p2 }
  0xbc   : > { %s305_s11 = sand.u32 1, %s7970_s16   ;;  %s5125_s5 = sshll.u32 %s8059_s3, 2 }
  0xbd   : > { %s7979_s14 = scalar_select %p6819_p11, 1, 0 }
  0xbe   : > { %s8063_s16 = smov (!%p116_p12, %s7970_s16), %s118_s30  ;;  %s4815_s8 = sshll.u32 %s305_s11, 4 }
  0xbf   : > { %s318_s4 = sadd.s32 %s5125_s5, %s6636_s12  ;;  %s7980_s13 = sld [smem:[#allocation36_spill]] }
  0xc0   : > { %s4820_s15 = sshll.u32 %s318_s4, 6  ;;  %s307_s20 = scalar_lea.vmem [#allocation8], %s4815_s8 }
  0xc1   : > { %s321_s29 = sshll.u32 %s307_s20, 4  ;;  %p7981_p0 = scmp.lt.s32.totalorder %s6427_s6, 4  ;;  %s6833_s29 = int_to_ptr.vmem [resolvable:$true] %s321_s29 }
  0xc3   : > { %p6839_p7 = pnand %p7981_p0, %p6813_p10 }
  0xc5   : > { %s6831_s0 = scalar_lea.hbm %s7980_s13, %s4820_s15  ;;  %p6241_p9 = pneg %p6839_p7 }
  0xc6   : > { %s6239_s12 = scalar_lea.hbm %s6831_s0, 256  ;;  %s6244_s5 = scalar_lea.hbm %s7980_s13, 2048 }
  0xc7   : > { %p6240_p13 = scmp.ne.s32.totalorder %s6831_s0, %s6239_s12  ;;  %p6245_p8 = scmp.lt.u32.totalorder %s6831_s0, %s7980_s13 }
  0xc8   : > { %p6246_p5 = scmp.lt.u32.totalorder %s6244_s5, %s6239_s12  ;;  %p6248_p10 = scmp.lt.u32.totalorder %s6239_s12, %s6831_s0 }
  0xc9   : > { %p6242_p1 = pnand %p6241_p9, %p6240_p13 }
  0xca   : > { %p6247_p6 = por %p6246_p5, %p6245_p8 }
  0xcb   : > { %p6243_p4 = pneg %p6242_p1 }
  0xcc   : > { %p6249_p12 = por %p6248_p10, %p6247_p6 }
  0xce   : > { %p6250_p2 = pnand %p6249_p12, %p6243_p4 }
  0xd0   : > { %6253 = shalt.err (!%p6250_p2)
}
  0xd1   : > { %s6254_s4 = scalar_lea.vmem %s6833_s29, 256  ;;  %s6435_s15 = smov [#allocation8]  }
  0xd2   : > { %p6255_p0 = scmp.ne.s32.totalorder %s6833_s29, %s6254_s4  ;;  %s6259_s28 = sshll.u32 %s6435_s15, 4  ;;  %s6260_s28 = int_to_ptr.vmem [resolvable:$false] %s6259_s28 }
  0xd3   : > { %s6261_s10 = scalar_lea.vmem %s6260_s28, 512  ;;  %p6262_p11 = scmp.lt.s32.totalorder %s6833_s29, %s6260_s28 }
  0xd4   : > { %p6257_p13 = pnand %p6255_p0, %p6241_p9  ;;  %p6263_p8 = scmp.lt.s32.totalorder %s6261_s10, %s6254_s4 }
  0xd6   : > { %p6258_p1 = pneg %p6257_p13  ;;  %p6264_p5 = por %p6263_p8, %p6262_p11 }
  0xd8   : > { %p6265_p6 = pnand %p6264_p5, %p6258_p1 }
  0xda   : > { %6268 = shalt.err (!%p6265_p6)
}
  0xdb   : > { %5799 = dma.hbm_to_vmem [thread:$0]  (!%p6839_p7), %s6831_s0, 256, %s6833_s29, %s6658_s18, %s7955_s27, %s7955_s27, %s7954_s19  }
  0xdc   : > { %s7983_s20 = sld [smem:[#allocation26_spill]] }
  0xe2   : > { %p7984_p9 = scmp.ne.s32.totalorder %s7983_s20, 0 }
  0xe4   : > { %333 = sbr.rel (%p7984_p9) target bundleno = 1161 (0x489), region = 40 }
  0xeb   : > { %s6875_s12 = sand.u32 1, %s6403_s25  }
  0xec   : > { %s4822_s30 = sshll.u32 %s6875_s12, 5  ;;  %s336_s11 = scalar_lea.sflag [#allocation4], %s6875_s12 }
  0xed   : > { %s6879_s5 = scalar_lea.vmem [#allocation3], %s4822_s30 }
  0xee   : > { %6354 = dma.done.wait (%p6742_p3), %s336_s11, 512  }
  0xef   : > { %6356 = vsyncadd (%p6742_p3), %s336_s11, 4294966784  ;;  %s7985_s0 = sld [smem:[#allocation21_spill]]  ;;  %s7986_s29 = sld [smem:[#allocation30_spill]] }
  0xf0   : > { %s344_s18 = sand.u32 1, %s6544_s7  }
  0xf1   : > { %s345_s3 = scalar_lea.sflag [#allocation7], %s344_s18 }
  0xf5   : > { %s346_s19 = sand.u32 1, %s7985_s0   ;;  %p7987_p11 = scmp.ne.s32.totalorder %s7986_s29, 0 }
  0xf6   : > { %s4823_s27 = sshll.u32 %s346_s19, 4 }
  0xf7   : > { %s6887_s1 = scalar_lea.vmem [#allocation6], %s4823_s27 }
  0xf8   : > { %6358 = dma.done.wait (%p7987_p11), %s345_s3, 256  }
  0xf9   : > { %6360 = vsyncadd (%p7987_p11), %s345_s3, 4294967040  ;;  %s7988_s8 = sld [smem:[#allocation19_spill]]  ;;  %p7989_p3 = scmp.ne.s32.totalorder %s7979_s14, 0 }
  0xff   : > { %s355_s4 = sand.u32 1, %s7988_s8  }
 0x100   : > { %s4824_s15 = sshll.u32 %s355_s4, 4 }
 0x101   : > { %s6894_s22 = scalar_lea.vmem [#allocation8], %s4824_s15 }
 0x102   : > { %6362 = dma.done.wait (%p7989_p3), %s345_s3, 256  }
 0x103   : > { %6364 = vsyncadd (%p7989_p3), %s345_s3, 4294967040  ;;  %p7990_p7 = scmp.eq.s32.totalorder %s6544_s7, 0 }
 0x105   : > { %6366 = dma.done.wait (%p7990_p7), [#allocation10], 18432   ;;  %p7991_p4 = pmov %p7990_p7 }
 0x106   : > { %s4827_s28 = sshll.u32 %s6875_s12, 6  ;;  %s7992_s20 = sld [smem:[#allocation22_spill]] }
 0x107   : > { %6368 = vsyncadd (%p7991_p4), [#allocation10], 4294948864  ;;  %s6905_s10 = scalar_lea.vmem [#allocation12], %s4827_s28 }
 0x10c   : > { %p4828_p10 = scmp.ne.s32.totalorder %s7992_s20, 0 }
 0x10d   : > { %vm419_vm0 = vcmask (!%p4828_p10), 1040384   ;;  %vm420_vm1 = vsmask.f32 (!%p4828_p10), 256  ;;  %v422_v0 = vld [vmem:[#allocation2] sm:$0x1] (!%p4828_p10) }
 0x10e   : > { %418 = sbr.rel (%p4828_p10) target bundleno = 285 (0x11d), region = 64  ;;  %vm6911_vm2 = vmand (!%p4828_p10), %vm419_vm0, %vm420_vm1  ;;  %v425_v2 = vld [vmem:[#allocation2 + $0xc] sm:$0x1] (!%p4828_p10)  ;;  %v428_v3 = vld [vmem:[#allocation2 + $0x18] sm:$0x1] (!%p4828_p10) }
 0x10f   : > { %vm446_vm3 = vsmask.f32 (!%p4828_p10), 7938  ;;  %v423_v4 = vsel (!%p4828_p10), %vm6911_vm2, 0, %v422_v0  ;;  %v426_v5 = vsel (!%p4828_p10), %vm6911_vm2, 0, %v425_v2  ;;  %v429_v6 = vsel (!%p4828_p10), %vm6911_vm2, 0, %v428_v3 }
 0x110   : > { %v431_v7 = vld [vmem:[#allocation2 + $0x24] sm:$0x1] (!%p4828_p10)  ;;  %424 = vst [vmem:[#allocation2] sm:$0x1] (!%p4828_p10), %v423_v4  ;;  %427 = vst [vmem:[#allocation2 + $0xc] sm:$0x1] (!%p4828_p10), %v426_v5 }
 0x111   : > { %430 = vst [vmem:[#allocation2 + $0x18] sm:$0x1] (!%p4828_p10), %v429_v6  ;;  %v432_v8 = vsel (!%p4828_p10), %vm6911_vm2, 0, %v431_v7  ;;  %v434_v9 = vld [vmem:[#allocation2 + $0x30] sm:$0x1] (!%p4828_p10)  ;;  %vm6924_vm4 = vmand (!%p4828_p10), %vm419_vm0, %vm446_vm3 }
 0x112   : > { %v437_v10 = vld [vmem:[#allocation2 + $0x3c] sm:$0x1] (!%p4828_p10)  ;;  %433 = vst [vmem:[#allocation2 + $0x24] sm:$0x1] (!%p4828_p10), %v432_v8  ;;  %v435_v12 = vsel (!%p4828_p10), %vm6911_vm2, 0, %v434_v9 }
 0x113   : > { %v438_v13 = vsel (!%p4828_p10), %vm6911_vm2, 0, %v437_v10  ;;  %v440_v14 = vld [vmem:[#allocation2 + $0x48] sm:$0x1] (!%p4828_p10)  ;;  %v443_v15 = vld [vmem:[#allocation2 + $0x54] sm:$0x1] (!%p4828_p10) }
 0x114   : > { %436 = vst [vmem:[#allocation2 + $0x30] sm:$0x1] (!%p4828_p10), %v435_v12  ;;  %439 = vst [vmem:[#allocation2 + $0x3c] sm:$0x1] (!%p4828_p10), %v438_v13  ;;  %v441_v16 = vsel (!%p4828_p10), %vm6911_vm2, 0, %v440_v14  ;;  %v444_v17 = vsel (!%p4828_p10), %vm6911_vm2, 0, %v443_v15 }
 0x115   : > { %v448_v18 = vld [vmem:[#allocation2 + $0x8] sm:$0x1]  ;;  %v451_v19 = vld [vmem:[#allocation2 + $0x14] sm:$0x1]  ;;  %442 = vst [vmem:[#allocation2 + $0x48] sm:$0x1] %v441_v16 }
 0x116   : > { %445 = vst [vmem:[#allocation2 + $0x54] sm:$0x1] %v444_v17  ;;  %v449_v20 = vsel %vm6924_vm4, 0, %v448_v18  ;;  %v452_v21 = vsel %vm6924_vm4, 0, %v451_v19  ;;  %v454_v22 = vld [vmem:[#allocation2 + $0x20] sm:$0x1] }
 0x117   : > { %v457_v23 = vld [vmem:[#allocation2 + $0x2c] sm:$0x1]  ;;  %450 = vst [vmem:[#allocation2 + $0x8] sm:$0x1] %v449_v20  ;;  %453 = vst [vmem:[#allocation2 + $0x14] sm:$0x1] %v452_v21 }
 0x118   : > { %v455_v24 = vsel %vm6924_vm4, 0, %v454_v22  ;;  %v458_v25 = vsel %vm6924_vm4, 0, %v457_v23  ;;  %v460_v26 = vld [vmem:[#allocation2 + $0x38] sm:$0x1]  ;;  %v463_v27 = vld [vmem:[#allocation2 + $0x44] sm:$0x1] }
 0x119   : > { %456 = vst [vmem:[#allocation2 + $0x20] sm:$0x1] %v455_v24  ;;  %459 = vst [vmem:[#allocation2 + $0x2c] sm:$0x1] %v458_v25  ;;  %v461_v28 = vsel %vm6924_vm4, 0, %v460_v26  ;;  %v464_v29 = vsel %vm6924_vm4, 0, %v463_v27 }
 0x11a   : > { %v466_v30 = vld [vmem:[#allocation2 + $0x50] sm:$0x1]  ;;  %v469_v31 = vld [vmem:[#allocation2 + $0x5c] sm:$0x1]  ;;  %462 = vst [vmem:[#allocation2 + $0x38] sm:$0x1] %v461_v28 }
 0x11b   : > { %465 = vst [vmem:[#allocation2 + $0x44] sm:$0x1] %v464_v29  ;;  %v467_v32 = vsel %vm6924_vm4, 0, %v466_v30  ;;  %v470_v33 = vsel %vm6924_vm4, 0, %v469_v31 }
 0x11c   : > { %468 = vst [vmem:[#allocation2 + $0x50] sm:$0x1] %v467_v32  ;;  %471 = vst [vmem:[#allocation2 + $0x5c] sm:$0x1] %v470_v33 }
 0x11d PF: > { %v472_v34 = vld [vmem:[%s6879_s5] sm:$0xf]  ;;  %vm564_vm5 = vcmask 1043456   ;;  %vm565_vm6 = vsmask.f32 7938  ;;  %vm571_vm7 = vcmask 1040384  }
 0x11e   : > { %v484_v35 = vshrl.u32 %v472_v34, 16  ;;  %v487_v36 = vshll.u32 %v472_v34, 16  ;;  %v473_v37 = vld [vmem:[%s6879_s5 + $0x4] sm:$0xf]  ;;  %vm480_vm8 = vsmask.f32 256  ;;  %vm6954_vm10 = vmand %vm564_vm5, %vm565_vm6 }
 0x11f   : > { %vm481_vm9 = vsmask.f32 4368  ;;  %v492_v38 = vshrl.u32 %v473_v37, 16  ;;  %v495_v39 = vshll.u32 %v473_v37, 16  ;;  %v7997_v41 = vmov 0  ;;  %vm6964_vm12 = vmand %vm571_vm7, %vm480_vm8  ;;  %s8006_s7 = sld [smem:[#allocation22_spill]] }
 0x120   : > { %v486_v40 = vrot.slane %v484_v35, 7  ;;  %v7998_v41 = vsel %vm6954_vm10, 4294967295, %v7997_v41  ;;  %v474_v42 = vld [vmem:[%s6879_s5 + $0x8] sm:$0xf]  ;;  %v567_v43 = vld [vmem:[#allocation2 + $0x18] sm:$0xf]  ;;  %vm6959_vm11 = vmor %vm480_vm8, %vm481_vm9 }
 0x121   : > { %7999 = vst [vmem:[#allocation31_spill] sm:$0xff] %v7998_v41  ;;  %v8000_v44 = vmov 0  ;;  %v494_v45 = vrot.slane %v492_v38, 7  ;;  %v501_v46 = vshrl.u32 %v474_v42, 16  ;;  %v504_v47 = vshll.u32 %v474_v42, 16 }
 0x122   : > { %v8001_v44 = vsel %vm6959_vm11, 4294967295, %v8000_v44  ;;  %v489_v48 = vor.u32 %v487_v36, %v486_v40  ;;  %v490_v49 = vrot.slane %v486_v40, 4  ;;  %v8003_v50 = vmov 0  ;;  %v573_v51 = vld [vmem:[#allocation2 + $0x20] sm:$0x1] }
 0x123   : > { %8002 = vst [vmem:[#allocation32_spill] sm:$0xff] %v8001_v44  ;;  %v8004_v50 = vsel %vm6964_vm12, 4294967295, %v8003_v50  ;;  %v475_v52 = vld [vmem:[%s6879_s5 + $0xc] sm:$0xf]  ;;  %v497_v53 = vor.u32 %v495_v39, %v494_v45  ;;  %v499_v54 = vrot.slane %v494_v45, 4  ;;  %v503_v55 = vrot.slane %v501_v46, 7 }
 0x124   : > { %8005 = vst [vmem:[#allocation33_spill] sm:$0xff] %v8004_v50  ;;  %v509_v56 = vshrl.u32 %v475_v52, 16  ;;  %v476_v57 = vld [vmem:[%s6879_s5 + $0x10] sm:$0xf]  ;;  %v568_v58 = vsel %vm6954_vm10, %v489_v48, %v567_v43  ;;  %v576_v59 = vld [vmem:[#allocation2 + $0x24] sm:$0xf] }
 0x125   : > { %v512_v60 = vshll.u32 %v475_v52, 16  ;;  %v518_v61 = vshrl.u32 %v476_v57, 16  ;;  %v521_v62 = vshll.u32 %v476_v57, 16  ;;  %569 = vst [vmem:[#allocation2 + $0x18] sm:$0xf] %v568_v58  ;;  %v498_v63 = vsel %vm6959_vm11, %v490_v49, %v497_v53  ;;  %p4829_p12 = scmp.le.s32.totalorder %s8006_s7, 0 }
 0x126   : > { %v574_v0 = vsel %vm6964_vm12, %v499_v54, %v573_v51  ;;  %v506_v1 = vor.u32 %v504_v47, %v503_v55  ;;  %v580_v2 = vld [vmem:[#allocation2 + $0x2c] sm:$0x1]  ;;  %v583_v3 = vld [vmem:[#allocation2 + $0x30] sm:$0xf]  ;;  %v477_v4 = vld [vmem:[%s6879_s5 + $0x14] sm:$0xf] }
 0x127   : > { %570 = vst [vmem:[#allocation2 + $0x1c] sm:$0xf] %v498_v63  ;;  %575 = vst [vmem:[#allocation2 + $0x20] sm:$0x1] %v574_v0  ;;  %v507_v5 = vrot.slane %v503_v55, 4  ;;  %v511_v6 = vrot.slane %v509_v56, 7 }
 0x128   : > { %v520_v7 = vrot.slane %v518_v61, 7  ;;  %v526_v8 = vshrl.u32 %v477_v4, 16  ;;  %v478_v9 = vld [vmem:[%s6879_s5 + $0x18] sm:$0xf]  ;;  %v577_v10 = vsel %vm6954_vm10, %v506_v1, %v576_v59  ;;  %v529_v11 = vshll.u32 %v477_v4, 16 }
 0x129   : > { %v535_v12 = vshrl.u32 %v478_v9, 16  ;;  %v538_v13 = vshll.u32 %v478_v9, 16  ;;  %v479_v14 = vld [vmem:[%s6879_s5 + $0x1c] sm:$0xf]  ;;  %578 = vst [vmem:[#allocation2 + $0x24] sm:$0xf] %v577_v10  ;;  %v514_v15 = vor.u32 %v512_v60, %v511_v6 }
 0x12a   : > { %v516_v16 = vrot.slane %v511_v6, 4  ;;  %v523_v17 = vor.u32 %v521_v62, %v520_v7  ;;  %v524_v18 = vrot.slane %v520_v7, 4  ;;  %v528_v19 = vrot.slane %v526_v8, 7  ;;  %v587_v25 = vld [vmem:[#allocation2 + $0x38] sm:$0x1] }
 0x12b   : > { %v537_v20 = vrot.slane %v535_v12, 7  ;;  %v543_v21 = vshrl.u32 %v479_v14, 16  ;;  %v515_v22 = vsel %vm6959_vm11, %v507_v5, %v514_v15  ;;  %v590_v26 = vld [vmem:[#allocation2 + $0x3c] sm:$0xf]  ;;  %v546_v27 = vshll.u32 %v479_v14, 16 }
 0x12c   : > { %v581_v23 = vsel %vm6964_vm12, %v516_v16, %v580_v2  ;;  %v584_v24 = vsel %vm6954_vm10, %v523_v17, %v583_v3  ;;  %579 = vst [vmem:[#allocation2 + $0x28] sm:$0xf] %v515_v22  ;;  %v531_v28 = vor.u32 %v529_v11, %v528_v19  ;;  %v533_v29 = vrot.slane %v528_v19, 4  ;;  %v594_v36 = vld [vmem:[#allocation2 + $0x44] sm:$0x1]  ;;  %600 = sbr.rel (%p4829_p12) target bundleno = 314 (0x13a), region = 68 }
 0x12d   : > { %582 = vst [vmem:[#allocation2 + $0x2c] sm:$0x1] %v581_v23  ;;  %585 = vst [vmem:[#allocation2 + $0x30] sm:$0xf] %v584_v24  ;;  %v540_v30 = vor.u32 %v538_v13, %v537_v20  ;;  %v541_v31 = vrot.slane %v537_v20, 4  ;;  %v545_v32 = vrot.slane %v543_v21, 7 }
 0x12e   : > { %v532_v33 = vsel %vm6959_vm11, %v524_v18, %v531_v28  ;;  %v588_v34 = vsel %vm6964_vm12, %v533_v29, %v587_v25  ;;  %v601_v42 = vld [vmem:[%s6887_s1] sm:$0xf] (!%p4829_p12)  ;;  %v602_v43 = vld [vmem:[%s6887_s1 + $0x4] sm:$0xf] (!%p4829_p12)  ;;  %v603_v49 = vld [vmem:[%s6887_s1 + $0x8] sm:$0xf] (!%p4829_p12) }
 0x12f   : > { %v591_v35 = vsel %vm6954_vm10, %v540_v30, %v590_v26  ;;  %586 = vst [vmem:[#allocation2 + $0x34] sm:$0xf] %v532_v33  ;;  %589 = vst [vmem:[#allocation2 + $0x38] sm:$0x1] %v588_v34  ;;  %v548_v37 = vor.u32 %v546_v27, %v545_v32  ;;  %v550_v38 = vrot.slane %v545_v32, 4  ;;  %v606_v45 = vshrl.u32 (!%p4829_p12), %v601_v42, 16 }
 0x130   : > { %592 = vst [vmem:[#allocation2 + $0x3c] sm:$0xf] %v591_v35  ;;  %v609_v46 = vshll.u32 (!%p4829_p12), %v601_v42, 16  ;;  %v614_v47 = vshrl.u32 (!%p4829_p12), %v602_v43, 16  ;;  %v617_v48 = vshll.u32 (!%p4829_p12), %v602_v43, 16  ;;  %v623_v55 = vshrl.u32 (!%p4829_p12), %v603_v49, 16 }
 0x131   : > { %v549_v39 = vsel %vm6959_vm11, %v541_v31, %v548_v37  ;;  %v595_v40 = vsel %vm6964_vm12, %v550_v38, %v594_v36  ;;  %v604_v51 = vld [vmem:[%s6887_s1 + $0xc] sm:$0xf] (!%p4829_p12)  ;;  %v608_v52 = vrot.slane (!%p4829_p12), %v606_v45, 7  ;;  %v645_v53 = vld [vmem:[#allocation2] sm:$0xf] (!%p4829_p12)  ;;  %v626_v57 = vshll.u32 (!%p4829_p12), %v603_v49, 16 }
 0x132   : > { %593 = vst [vmem:[#allocation2 + $0x40] sm:$0xf] %v549_v39  ;;  %596 = vst [vmem:[#allocation2 + $0x44] sm:$0x1] %v595_v40  ;;  %v616_v54 = vrot.slane (!%p4829_p12), %v614_v47, 7  ;;  %v631_v58 = vshrl.u32 (!%p4829_p12), %v604_v51, 16 }
 0x133   : > { %v649_v56 = vld [vmem:[#allocation2 + $0x8] sm:$0x1]  ;;  %v634_v59 = vshll.u32 %v604_v51, 16  ;;  %v611_v60 = vor.u32 %v609_v46, %v608_v52  ;;  %v612_v61 = vrot.slane %v608_v52, 4  ;;  %v625_v0 = vrot.slane %v623_v55, 7 }
 0x134   : > { %v619_v62 = vor.u32 %v617_v48, %v616_v54  ;;  %v621_v63 = vrot.slane %v616_v54, 4  ;;  %v633_v1 = vrot.slane %v631_v58, 7  ;;  %v652_v5 = vld [vmem:[#allocation2 + $0xc] sm:$0xf]  ;;  %v656_v6 = vld [vmem:[#allocation2 + $0x14] sm:$0x1] }
 0x135   : > { %v646_v2 = vsel %vm6954_vm10, %v611_v60, %v645_v53  ;;  %v628_v7 = vor.u32 %v626_v57, %v625_v0  ;;  %v629_v8 = vrot.slane %v625_v0, 4 }
 0x136   : > { %v620_v3 = vsel %vm6959_vm11, %v612_v61, %v619_v62  ;;  %v650_v4 = vsel %vm6964_vm12, %v621_v63, %v649_v56  ;;  %647 = vst [vmem:[#allocation2] sm:$0xf] %v646_v2  ;;  %v636_v9 = vor.u32 %v634_v59, %v633_v1  ;;  %v638_v10 = vrot.slane %v633_v1, 4 }
 0x137   : > { %648 = vst [vmem:[#allocation2 + $0x4] sm:$0xf] %v620_v3  ;;  %651 = vst [vmem:[#allocation2 + $0x8] sm:$0x1] %v650_v4  ;;  %v653_v11 = vsel %vm6954_vm10, %v628_v7, %v652_v5 }
 0x138   : > { %v637_v12 = vsel %vm6959_vm11, %v629_v8, %v636_v9  ;;  %v657_v13 = vsel %vm6964_vm12, %v638_v10, %v656_v6  ;;  %654 = vst [vmem:[#allocation2 + $0xc] sm:$0xf] %v653_v11 }
 0x139   : > { %655 = vst [vmem:[#allocation2 + $0x10] sm:$0xf] %v637_v12  ;;  %658 = vst [vmem:[#allocation2 + $0x14] sm:$0x1] %v657_v13 }
 0x13a PF: > { %661 = sbr.rel (%p4828_p10) target bundleno = 323 (0x143), region = 72  ;;  %v6436_v17 = vmov (!%p4828_p10), 0  }
 0x13b   : > { %665 = vst [vmem:[#allocation2 + $0x4] sm:$0xf] (!%p4828_p10), %v6436_v17  ;;  %672 = vst [vmem:[#allocation2 + $0x10] sm:$0xf] (!%p4828_p10), %v6436_v17 }
 0x13d   : > { %v662_v14 = vld [vmem:[#allocation2] sm:$0xf] (!%p4828_p10) }
 0x13e   : > { %v666_v15 = vld [vmem:[#allocation2 + $0x8] sm:$0x1] (!%p4828_p10)  ;;  %v663_v16 = vsel (!%p4828_p10), %vm6954_vm10, 0, %v662_v14 }
 0x13f   : > { %v667_v18 = vsel (!%p4828_p10), %vm6964_vm12, 0, %v666_v15  ;;  %v669_v19 = vld [vmem:[#allocation2 + $0xc] sm:$0xf] (!%p4828_p10)  ;;  %664 = vst [vmem:[#allocation2] sm:$0xf] (!%p4828_p10), %v663_v16 }
 0x140   : > { %v673_v20 = vld [vmem:[#allocation2 + $0x14] sm:$0x1] (!%p4828_p10)  ;;  %668 = vst [vmem:[#allocation2 + $0x8] sm:$0x1] (!%p4828_p10), %v667_v18  ;;  %v670_v21 = vsel (!%p4828_p10), %vm6954_vm10, 0, %v669_v19 }
 0x141   : > { %v674_v22 = vsel %vm6964_vm12, 0, %v673_v20  ;;  %671 = vst [vmem:[#allocation2 + $0xc] sm:$0xf] %v670_v21 }
 0x142   : > { %675 = vst [vmem:[#allocation2 + $0x14] sm:$0x1] %v674_v22 }
 0x143 PF: > { %s8008_s30 = sld [smem:[#allocation22_spill]] }
 0x149   : > { %p4831_p2 = scmp.ge.s32.totalorder %s8008_s30, 1 }
 0x14a   : > { %v680_v23 = vld [vmem:[%s6894_s22] sm:$0xf] (!%p4831_p2)  ;;  %v681_v24 = vld [vmem:[%s6894_s22 + $0x4] sm:$0xf] (!%p4831_p2)  ;;  %v682_v29 = vld [vmem:[%s6894_s22 + $0x8] sm:$0xf] (!%p4831_p2) }
 0x14b   : > { %679 = sbr.rel (%p4831_p2) target bundleno = 342 (0x156), region = 76  ;;  %v685_v25 = vshrl.u32 (!%p4831_p2), %v680_v23, 16  ;;  %v688_v26 = vshll.u32 (!%p4831_p2), %v680_v23, 16  ;;  %v693_v27 = vshrl.u32 (!%p4831_p2), %v681_v24, 16  ;;  %v696_v28 = vshll.u32 (!%p4831_p2), %v681_v24, 16 }
 0x14c   : > { %v683_v30 = vld [vmem:[%s6894_s22 + $0xc] sm:$0xf] (!%p4831_p2)  ;;  %v725_v32 = vld [vmem:[#allocation2 + $0x48] sm:$0xf] (!%p4831_p2)  ;;  %v702_v34 = vshrl.u32 (!%p4831_p2), %v682_v29, 16  ;;  %v705_v36 = vshll.u32 (!%p4831_p2), %v682_v29, 16 }
 0x14d   : > { %v687_v31 = vrot.slane (!%p4831_p2), %v685_v25, 7  ;;  %v695_v33 = vrot.slane (!%p4831_p2), %v693_v27, 7  ;;  %v729_v35 = vld [vmem:[#allocation2 + $0x50] sm:$0x1] (!%p4831_p2)  ;;  %v710_v37 = vshrl.u32 (!%p4831_p2), %v683_v30, 16  ;;  %v713_v38 = vshll.u32 (!%p4831_p2), %v683_v30, 16 }
 0x14e   : > { %v704_v45 = vrot.slane (!%p4831_p2), %v702_v34, 7  ;;  %v732_v51 = vld [vmem:[#allocation2 + $0x54] sm:$0xf] (!%p4831_p2)  ;;  %v736_v52 = vld [vmem:[#allocation2 + $0x5c] sm:$0x1] (!%p4831_p2) }
 0x14f   : > { %v690_v39 = vor.u32 (!%p4831_p2), %v688_v26, %v687_v31  ;;  %v691_v40 = vrot.slane (!%p4831_p2), %v687_v31, 4  ;;  %v698_v42 = vor.u32 (!%p4831_p2), %v696_v28, %v695_v33  ;;  %v700_v43 = vrot.slane (!%p4831_p2), %v695_v33, 4 }
 0x150   : > { %v712_v46 = vrot.slane (!%p4831_p2), %v710_v37, 7  ;;  %v707_v53 = vor.u32 (!%p4831_p2), %v705_v36, %v704_v45  ;;  %v708_v54 = vrot.slane (!%p4831_p2), %v704_v45, 4 }
 0x151   : > { %v726_v47 = vsel (!%p4831_p2), %vm6954_vm10, %v690_v39, %v725_v32  ;;  %v699_v48 = vsel (!%p4831_p2), %vm6959_vm11, %v691_v40, %v698_v42  ;;  %v730_v49 = vsel (!%p4831_p2), %vm6964_vm12, %v700_v43, %v729_v35 }
 0x152   : > { %727 = vst [vmem:[#allocation2 + $0x48] sm:$0xf] %v726_v47  ;;  %728 = vst [vmem:[#allocation2 + $0x4c] sm:$0xf] %v699_v48  ;;  %v715_v55 = vor.u32 %v713_v38, %v712_v46  ;;  %v717_v56 = vrot.slane %v712_v46, 4  ;;  %v733_v57 = vsel %vm6954_vm10, %v707_v53, %v732_v51 }
 0x153   : > { %731 = vst [vmem:[#allocation2 + $0x50] sm:$0x1] %v730_v49  ;;  %734 = vst [vmem:[#allocation2 + $0x54] sm:$0xf] %v733_v57 }
 0x154   : > { %v716_v58 = vsel %vm6959_vm11, %v708_v54, %v715_v55  ;;  %v737_v59 = vsel %vm6964_vm12, %v717_v56, %v736_v52 }
 0x155   : > { %735 = vst [vmem:[#allocation2 + $0x58] sm:$0xf] %v716_v58  ;;  %738 = vst [vmem:[#allocation2 + $0x5c] sm:$0x1] %v737_v59 }
 0x156 PF: > { %s8009_s11 = sld [smem:[#allocation22_spill]] }
 0x15c   : > { %p4832_p0 = scmp.ne.s32.totalorder %s8009_s11, 1 }
 0x15d   : > { %v744_v60 = vld [vmem:[#allocation2 + $0x48] sm:$0xf] (!%p4832_p0)  ;;  %v748_v61 = vld [vmem:[#allocation2 + $0x50] sm:$0x1] (!%p4832_p0)  ;;  %v6437_v63 = vmov (!%p4832_p0), 0  }
 0x15e   : > { %742 = sbr.rel (%p4832_p0) target bundleno = 357 (0x165), region = 80  ;;  %v745_v62 = vsel (!%p4832_p0), %vm6954_vm10, 0, %v744_v60  ;;  %747 = vst [vmem:[#allocation2 + $0x4c] sm:$0xf] (!%p4832_p0), %v6437_v63  ;;  %754 = vst [vmem:[#allocation2 + $0x58] sm:$0xf] (!%p4832_p0), %v6437_v63 }
 0x15f   : > { %v749_v0 = vsel (!%p4832_p0), %vm6964_vm12, 0, %v748_v61  ;;  %v751_v1 = vld [vmem:[#allocation2 + $0x54] sm:$0xf] (!%p4832_p0)  ;;  %v755_v2 = vld [vmem:[#allocation2 + $0x5c] sm:$0x1] (!%p4832_p0) }
 0x160   : > { %746 = vst [vmem:[#allocation2 + $0x48] sm:$0xf] (!%p4832_p0), %v745_v62  ;;  %750 = vst [vmem:[#allocation2 + $0x50] sm:$0x1] (!%p4832_p0), %v749_v0  ;;  %v752_v3 = vsel (!%p4832_p0), %vm6954_vm10, 0, %v751_v1  ;;  %v756_v4 = vsel (!%p4832_p0), %vm6964_vm12, 0, %v755_v2 }
 0x161   : > { %753 = vst [vmem:[#allocation2 + $0x54] sm:$0xf] (!%p4832_p0), %v752_v3  ;;  %757 = vst [vmem:[#allocation2 + $0x5c] sm:$0x1] (!%p4832_p0), %v756_v4 }
 0x165 PF: > { %v5932_v5 = vld [vmem:[#allocation9 + $0x100] sm:$0xff]   ;;  %v5935_v8 = vld [vmem:[#allocation9 + $0x108] sm:$0xff]   ;;  %v5938_v11 = vld [vmem:[#allocation9 + $0x110] sm:$0xff]   ;;  %vm957_vm13 = vsmask.f32 3328  ;;  %vm2155_vm0 = vcmask 1042432  }
 0x166   : > { %v5933_v6 = vld [vmem:[#allocation9 + $0x140] sm:$0xff]   ;;  %5157 = vmatprep.subr.bf16.mxu0 %v5932_v5  ;;  %v5936_v9 = vld [vmem:[#allocation9 + $0x148] sm:$0xff]   ;;  %v5939_v12 = vld [vmem:[#allocation9 + $0x150] sm:$0xff]   ;;  %vm958_vm14 = vsmask.f32 7440  ;;  %vm2156_vm1 = vcmask 1046532  }
 0x167   : > { %v5934_v7 = vld [vmem:[#allocation9 + $0xc0] sm:$0xff]   ;;  %5511 = vmatprep.subr.bf16.mxu1 %v5933_v6  ;;  %v5937_v10 = vld [vmem:[#allocation9 + $0xc8] sm:$0xff]   ;;  %v5940_v13 = vld [vmem:[#allocation9 + $0xd0] sm:$0xff]  }
 0x168   : > { %5158 = vmatpush3.bf16.msra.mxu0 %v5934_v7  ;;  %5512 = vmatpush3.bf16.msra.mxu1 %v5933_v6  ;;  %v5941_v14 = vld [vmem:[#allocation9 + $0x118] sm:$0xff]   ;;  %v5944_v17 = vld [vmem:[#allocation9 + $0x120] sm:$0xff]   ;;  %v5947_v20 = vld [vmem:[#allocation9 + $0x128] sm:$0xff]  }
 0x169   : > { %5159 = vmatprep.subr.bf16.mxu0 %v5935_v8  ;;  %5513 = vmatprep.subr.bf16.mxu1 %v5936_v9  ;;  %v5942_v15 = vld [vmem:[#allocation9 + $0x158] sm:$0xff]   ;;  %v5945_v18 = vld [vmem:[#allocation9 + $0x160] sm:$0xff]   ;;  %v5948_v21 = vld [vmem:[#allocation9 + $0x168] sm:$0xff]  }
 0x16a   : > { %v5943_v16 = vld [vmem:[#allocation9 + $0xd8] sm:$0xff]   ;;  %v5946_v19 = vld [vmem:[#allocation9 + $0xe0] sm:$0xff]   ;;  %v5949_v22 = vld [vmem:[#allocation9 + $0xe8] sm:$0xff]  }
 0x16b   : > { %v5950_v23 = vld [vmem:[#allocation9 + $0x130] sm:$0xff]   ;;  %v5953_v26 = vld [vmem:[#allocation9 + $0x138] sm:$0xff]   ;;  %v7052_v28 = vld [vmem:[#allocation2 + $0xc] sm:$0xf] }
 0x16c   : > { %5160 = vmatpush3.bf16.msra.mxu0 %v5937_v10  ;;  %5514 = vmatpush3.bf16.msra.mxu1 %v5936_v9  ;;  %v5951_v24 = vld [vmem:[#allocation9 + $0x170] sm:$0xff]   ;;  %v5954_v27 = vld [vmem:[#allocation9 + $0x178] sm:$0xff]   ;;  %v1111_v31 = vshrl.u32 %v7052_v28, 16  ;;  %v1114_v32 = vshll.u32 %v7052_v28, 16  ;;  %v7060_v36 = vld [vmem:[#allocation2] sm:$0xf] }
 0x16d   : > { %5161 = vmatprep.subr.bf16.mxu0 %v5938_v11  ;;  %5515 = vmatprep.subr.bf16.mxu1 %v5939_v12  ;;  %v5952_v25 = vld [vmem:[#allocation9 + $0xf0] sm:$0xff]   ;;  %v7062_v39 = vld [vmem:[#allocation2 + $0x4] sm:$0xf]  ;;  %v951_v40 = vld [vmem:[#allocation2 + $0x8] sm:$0x1]  ;;  %v961_v46 = vshrl.u32 %v7060_v36, 16 }
 0x16e   : > { %v7054_v29 = vld [vmem:[#allocation2 + $0x10] sm:$0xf]  ;;  %v1104_v30 = vld [vmem:[#allocation2 + $0x14] sm:$0x1]  ;;  %v1113_v37 = vrot.slane %v1111_v31, 4  ;;  %v1116_v38 = vrot.slane %v1114_v32, 5  ;;  %vm7070_vm15 = vmor %vm957_vm13, %vm958_vm14 }
 0x16f   : > { %v1120_v33 = vshll.u32 %v7054_v29, 16  ;;  %v1124_v34 = vshrl.u32 %v7054_v29, 16  ;;  %v1130_v35 = vshll.u32 %v1104_v30, 16  ;;  %v5955_v42 = vld [vmem:[#allocation9 + $0xf8] sm:$0xff]   ;;  %v964_v48 = vshll.u32 %v7060_v36, 16  ;;  %v5956_v53 = vld [vmem:[#allocation9 + $0x40] sm:$0xff]   ;;  %vm7288_vm2 = vmor %vm2155_vm0, %vm2156_vm1 }
 0x170   : > { %5162 = vmatpush3.bf16.msra.mxu0 %v5940_v13  ;;  %5516 = vmatpush3.bf16.msra.mxu1 %v5939_v12  ;;  %v1117_v47 = vor.u32 %v1116_v38, %v1113_v37  ;;  %v970_v49 = vshll.u32 %v7062_v39, 16  ;;  %v974_v51 = vshrl.u32 %v7062_v39, 16  ;;  %v783_v52 = vld [vmem:[#allocation2 + $0x18] sm:$0xf]  ;;  %v963_v57 = vrot.slane %v961_v46, 4 }
 0x171   : > { %5163 = vmatprep.subr.bf16.mxu0 %v5941_v14  ;;  %5517 = vmatprep.subr.bf16.mxu1 %v5942_v15  ;;  %v1122_v43 = vrot.slane %v1120_v33, 5  ;;  %v1126_v45 = vrot.slane %v1124_v34, 4  ;;  %v1132_v56 = vrot.slane %v1130_v35, 5  ;;  %v980_v58 = vshll.u32 %v951_v40, 16  ;;  %v784_v59 = vld [vmem:[#allocation2 + $0x1c] sm:$0xf] }
 0x172   : > { %v1118_v60 = vrot.slane %v1117_v47, 4  ;;  %v966_v61 = vrot.slane %v964_v48, 5  ;;  %v972_v62 = vrot.slane %v970_v49, 5  ;;  %v976_v63 = vrot.slane %v974_v51, 4  ;;  %v1254_v7 = vld [vmem:[#allocation2 + $0x20] sm:$0x1] }
 0x173   : > { %v1127_v55 = vor.u32 %v1126_v45, %v1122_v43  ;;  %v982_v1 = vrot.slane %v980_v58, 5  ;;  %v1261_v2 = vshrl.u32 %v783_v52, 16  ;;  %v1264_v3 = vshll.u32 %v783_v52, 16  ;;  %v785_v9 = vld [vmem:[#allocation2 + $0x24] sm:$0xf] }
 0x174   : > { %5164 = vmatpush3.bf16.msra.mxu0 %v5943_v16  ;;  %5518 = vmatpush3.bf16.msra.mxu1 %v5942_v15  ;;  %v1123_v4 = vsel %vm7070_vm15, %v1118_v60, %v1122_v43  ;;  %v967_v5 = vor.u32 %v966_v61, %v963_v57  ;;  %v977_v6 = vor.u32 %v976_v63, %v972_v62  ;;  %v1270_v8 = vshll.u32 %v784_v59, 16  ;;  %v786_v14 = vld [vmem:[#allocation2 + $0x28] sm:$0xf]  ;;  %v7082_v40 = vld [vmem:[#allocation2 + $0x18] sm:$0xf] }
 0x175   : > { %5165 = vmatprep.subr.bf16.mxu0 %v5944_v17  ;;  %5519 = vmatprep.subr.bf16.mxu1 %v5945_v18  ;;  %v1128_v0 = vrot.slane %v1127_v55, 4  ;;  %v1263_v11 = vrot.slane %v1261_v2, 4  ;;  %v1266_v12 = vrot.slane %v1264_v3, 5  ;;  %v1274_v13 = vshrl.u32 %v784_v59, 16  ;;  %v7086_v46 = vld [vmem:[#allocation2 + $0x1c] sm:$0xf] }
 0x176   : > { %v968_v16 = vrot.slane %v967_v5, 4  ;;  %v978_v17 = vrot.slane %v977_v6, 4  ;;  %v1298_v38 = vshrl.u32 %v786_v14, 16  ;;  %v7088_v49 = vld [vmem:[#allocation2 + $0x20] sm:$0x1]  ;;  %v1135_v51 = vshrl.u32 %v7082_v40, 16 }
 0x177   : > { %v1133_v10 = vsel %vm7070_vm15, %v1128_v0, %v1132_v56  ;;  %v1138_v52 = vshll.u32 %v7082_v40, 16  ;;  %v1144_v56 = vshll.u32 %v7086_v46, 16  ;;  %v1148_v57 = vshrl.u32 %v7086_v46, 16  ;;  %v7096_v58 = vld [vmem:[#allocation2 + $0xc] sm:$0xf]  ;;  %v5965_v59 = vld [vmem:[#allocation9 + $0x1c0] sm:$0xff]  }
 0x178   : > { %5166 = vmatpush3.bf16.msra.mxu0 %v5946_v19  ;;  %5520 = vmatpush3.bf16.msra.mxu1 %v5945_v18  ;;  %v4857_v15 = vcombine.low %v1123_v4, %v1133_v10  ;;  %v1272_v18 = vrot.slane %v1270_v8, 5  ;;  %v1255_v19 = vld [vmem:[#allocation2 + $0x2c] sm:$0x1]  ;;  %v1300_v48 = vrot.slane %v1298_v38, 4  ;;  %v1137_v63 = vrot.slane %v1135_v51, 4  ;;  %v5957_v8 = vld [vmem:[#allocation9] sm:$0xff]  }
 0x179   : > { %5167 = vmatprep.subr.bf16.mxu0 %v5947_v20  ;;  %5521 = vmatprep.subr.bf16.mxu1 %v5948_v21  ;;  %v1267_v20 = vor.u32 %v1266_v12, %v1263_v11  ;;  %v1304_v45 = vshll.u32 %v1255_v19, 16  ;;  %v7098_v0 = vld [vmem:[#allocation2 + $0x10] sm:$0xf]  ;;  %v1146_v2 = vrot.slane %v1144_v56, 5  ;;  %v1150_v3 = vrot.slane %v1148_v57, 4  ;;  %v5967_v19 = vld [vmem:[#allocation9 + $0x180] sm:$0xff]  }
 0x17a   : > { %1701 = vmatprep.mubr.bf16.mxu0 %v4857_v15  ;;  %v1154_v4 = vshll.u32 %v7088_v49, 16  ;;  %v7101_v5 = vld [vmem:[#allocation2 + $0x14] sm:$0x1]  ;;  %v988_v10 = vshll.u32 %v7096_v58, 16  ;;  %v2137_v44 = vld [vmem:[#allocation2] sm:$0xe] }
 0x17b   : > { %v1268_v31 = vrot.slane %v1267_v20, 4  ;;  %v1306_v55 = vrot.slane %v1304_v45, 5  ;;  %v1151_v12 = vor.u32 %v1150_v3, %v1146_v2  ;;  %v5960_v45 = vld [vmem:[#allocation9 + $0x50] sm:$0xff]   ;;  %v6024_v41 = vld [vmem:[#allocation2 + $0x4] sm:$0xf] }
 0x17c   : > { %5168 = vmatpush3.bf16.msra.mxu0 %v5949_v22  ;;  %5522 = vmatpush3.bf16.msra.mxu1 %v5948_v21  ;;  %v1276_v21 = vrot.slane %v1274_v13, 4  ;;  %v1280_v22 = vshll.u32 %v1254_v7, 16  ;;  %v1156_v13 = vrot.slane %v1154_v4, 5  ;;  %v7129_v4 = vld [vmem:[#allocation2 + $0x18] sm:$0xf] }
 0x17d   : > { %5169 = vmatprep.subr.bf16.mxu0 %v5950_v23  ;;  %5523 = vmatprep.subr.bf16.mxu1 %v5951_v24  ;;  %v1285_v23 = vshrl.u32 %v785_v9, 16 }
 0x17e   : > { %v1277_v32 = vor.u32 %v1276_v21, %v1272_v18  ;;  %v1282_v33 = vrot.slane %v1280_v22, 5  ;;  %v5958_v21 = vld [vmem:[#allocation9 + $0x48] sm:$0xff]  }
 0x17f   : > { %v1287_v34 = vrot.slane %v1285_v23, 4  ;;  %v1152_v23 = vrot.slane %v1151_v12, 4  ;;  %v5962_v12 = vld [vmem:[#allocation9 + $0x58] sm:$0xff]  }
 0x180   : > { %5170 = vmatpush3.bf16.msra.mxu0 %v5952_v25  ;;  %5524 = vmatpush3.bf16.msra.mxu1 %v5951_v24  ;;  %v973_v24 = vsel %vm7070_vm15, %v968_v16, %v972_v62  ;;  %v983_v25 = vsel %vm7070_vm15, %v978_v17, %v982_v1  ;;  %v1278_v43 = vrot.slane %v1277_v32, 4  ;;  %v1140_v1 = vrot.slane %v1138_v52, 5  ;;  %v7116_v32 = vld [vmem:[#allocation2 + $0x24] sm:$0xf] }
 0x181   : > { %5171 = vmatprep.subr.bf16.mxu0 %v5953_v26  ;;  %5525 = vmatprep.subr.bf16.mxu1 %v5954_v27  ;;  %v1288_v26 = vshll.u32 %v785_v9, 16  ;;  %v4851_v30 = vcombine.low %v973_v24, %v983_v25  ;;  %v985_v9 = vshrl.u32 %v7096_v58, 16  ;;  %v990_v17 = vrot.slane %v988_v10, 5 }
 0x182   : > { %v1141_v11 = vor.u32 %v1140_v1, %v1137_v63  ;;  %v1162_v51 = vshll.u32 %v7116_v32, 16 }
 0x183   : > { %v1290_v35 = vrot.slane %v1288_v26, 5  ;;  %v987_v16 = vrot.slane %v985_v9, 4 }
 0x184   : > { %5172 = vmatpush3.bf16.msra.mxu0 %v5955_v42  ;;  %5526 = vmatpush3.bf16.msra.mxu1 %v5954_v27  ;;  %v1294_v27 = vshll.u32 %v786_v14, 16  ;;  %v1273_v42 = vsel %vm7070_vm15, %v1268_v31, %v1272_v18  ;;  %v994_v14 = vshll.u32 %v7098_v0, 16  ;;  %v998_v18 = vshrl.u32 %v7098_v0, 16 }
 0x185   : > { %5223 = vmatprep.subr.bf16.mxu1 %v5956_v53  ;;  %v1291_v47 = vor.u32 %v1290_v35, %v1287_v34  ;;  %v1283_v53 = vsel %vm7070_vm15, %v1278_v43, %v1282_v33  ;;  %5289 = vmatprep.subr.bf16.mxu0 %v5965_v59  ;;  %v1142_v22 = vrot.slane %v1141_v11, 4  ;;  %v991_v25 = vor.u32 %v990_v17, %v987_v16  ;;  %v7118_v33 = vld [vmem:[#allocation2 + $0x28] sm:$0xf]  ;;  %v7120_v34 = vld [vmem:[#allocation2 + $0x2c] sm:$0x1] }
 0x186   : > { %v1296_v37 = vrot.slane %v1294_v27, 5  ;;  %v4863_v60 = vcombine.low %v1273_v42, %v1283_v53  ;;  %v996_v24 = vrot.slane %v994_v14, 5  ;;  %v1000_v26 = vrot.slane %v998_v18, 4  ;;  %v5959_v35 = vld [vmem:[#allocation9 + $0x8] sm:$0xff]   ;;  %v7133_v16 = vld [vmem:[#allocation2 + $0x1c] sm:$0xf] }
 0x187   : > { %1702 = vmatmul.mubr.bf16.vlgmr.msra.gmra.mrb[0].mxu0 %v4851_v30  ;;  %v1292_v61 = vrot.slane %v1291_v47, 4  ;;  %v1004_v27 = vshll.u32 %v7101_v5, 16  ;;  %v1147_v30 = vsel %vm7070_vm15, %v1142_v22, %v1146_v2  ;;  %v1157_v31 = vsel %vm7070_vm15, %v1152_v23, %v1156_v13  ;;  %v787_v47 = vld [vmem:[#allocation2 + $0x30] sm:$0xf]  ;;  %v5971_v17 = vld [vmem:[#allocation9 + $0x188] sm:$0xff]   ;;  %v5963_v18 = vld [vmem:[#allocation9 + $0x18] sm:$0xff]  }
 0x188   : > { %v1301_v62 = vor.u32 %v1300_v48, %v1296_v37  ;;  %5527 = vmatprep.mubr.bf16.mxu1 %v4863_v60  ;;  %5290 = vmatpush3.bf16.msra.mxu0 %v5967_v19  ;;  %v992_v38 = vrot.slane %v991_v25, 4  ;;  %v1001_v42 = vor.u32 %v1000_v26, %v996_v24  ;;  %v1159_v48 = vshrl.u32 %v7116_v32, 16  ;;  %v1256_v60 = vld [vmem:[#allocation2 + $0x38] sm:$0x1]  ;;  %v7135_v22 = vld [vmem:[#allocation2 + $0x20] sm:$0x1] }
 0x189   : > { %v1297_v6 = vsel %vm7070_vm15, %v1292_v61, %v1296_v37  ;;  %v4858_v37 = vcombine.low %v1147_v30, %v1157_v31  ;;  %v1006_v43 = vrot.slane %v1004_v27, 5  ;;  %v1168_v52 = vshll.u32 %v7118_v33, 16 }
 0x18a   : > { %v1302_v7 = vrot.slane %v1301_v62, 4  ;;  %v1172_v53 = vshrl.u32 %v7118_v33, 16  ;;  %v997_v56 = vsel %vm7070_vm15, %v992_v38, %v996_v24  ;;  %v1002_v57 = vrot.slane %v1001_v42, 4  ;;  %v5969_v62 = vld [vmem:[#allocation9 + $0x1c8] sm:$0xff]   ;;  %v789_v24 = vld [vmem:[#allocation2 + $0x3c] sm:$0xf] }
 0x18b   : > { %1709 = vmatprep.mubr.bf16.mxu0 %v4858_v37  ;;  %v1178_v59 = vshll.u32 %v7120_v34, 16  ;;  %v1309_v61 = vshrl.u32 %v787_v47, 16  ;;  %v1161_v63 = vrot.slane %v1159_v48, 4  ;;  %v1164_v1 = vrot.slane %v1162_v51, 5  ;;  %5291 = vmatprep.subr.bf16.mxu0 %v5969_v62  ;;  %v790_v42 = vld [vmem:[#allocation2 + $0x40] sm:$0xf] }
 0x18c   : > { %v1307_v15 = vsel %vm7070_vm15, %v1302_v7, %v1306_v55  ;;  %v788_v55 = vld [vmem:[#allocation2 + $0x34] sm:$0xf]  ;;  %v1170_v2 = vrot.slane %v1168_v52, 5  ;;  %v1174_v3 = vrot.slane %v1172_v53, 4  ;;  %v1312_v10 = vshll.u32 %v787_v47, 16  ;;  %5292 = vmatpush3.bf16.msra.mxu0 %v5971_v17 }
 0x18d   : > { %v4864_v20 = vcombine.low %v1297_v6, %v1307_v15  ;;  %v1007_v6 = vsel %vm7070_vm15, %v1002_v57, %v1006_v43  ;;  %v5961_v7 = vld [vmem:[#allocation9 + $0x10] sm:$0xff]   ;;  %v1311_v9 = vrot.slane %v1309_v61, 4  ;;  %v1165_v13 = vor.u32 %v1164_v1, %v1161_v63  ;;  %v5964_v43 = vld [vmem:[#allocation9 + $0x60] sm:$0xff]  }
 0x18e   : > { %v4852_v11 = vcombine.low %v997_v56, %v1007_v6  ;;  %v1175_v14 = vor.u32 %v1174_v3, %v1170_v2  ;;  %v1318_v15 = vshll.u32 %v788_v55, 16  ;;  %v1314_v19 = vrot.slane %v1312_v10, 5  ;;  %v1257_v57 = vld [vmem:[#allocation2 + $0x44] sm:$0x1]  ;;  %v5973_v1 = vld [vmem:[#allocation9 + $0x1d0] sm:$0xff]  }
 0x18f   : > { %5528 = vmatmul.mubr.bf16.vlgmr.msra.gmra.mrb[0].mxu1 %v4864_v20  ;;  %v1322_v20 = vshrl.u32 %v788_v55, 16  ;;  %v1009_v23 = vshrl.u32 %v7129_v4, 16  ;;  %v1166_v25 = vrot.slane %v1165_v13, 4  ;;  %v1012_v30 = vshll.u32 %v7129_v4, 16  ;;  %5293 = vmatprep.subr.bf16.mxu0 %v5973_v1  ;;  %v5977_v1 = vld [vmem:[#allocation9 + $0x1d8] sm:$0xff]  }
 0x190   : > { %5224 = vmatpush3.bf16.msra.mxu1 %v5957_v8  ;;  %v1180_v8 = vrot.slane %v1178_v59, 5  ;;  %1710 = vmatmul.mubr.bf16.gmra.mrb[4].mxu0 %v4852_v11  ;;  %v1176_v26 = vrot.slane %v1175_v14, 4  ;;  %v1320_v27 = vrot.slane %v1318_v15, 5  ;;  %v1315_v31 = vor.u32 %v1314_v19, %v1311_v9  ;;  %v5966_v59 = vld [vmem:[#allocation9 + $0x20] sm:$0xff]  }
 0x191   : > { %5225 = vmatprep.subr.bf16.mxu1 %v5958_v21  ;;  %v1328_v21 = vshll.u32 %v1256_v60, 16  ;;  %v1011_v38 = vrot.slane %v1009_v23, 4  ;;  %v1014_v48 = vrot.slane %v1012_v30, 5  ;;  %v1018_v51 = vshll.u32 %v7133_v16, 16  ;;  %v5972_v23 = vld [vmem:[#allocation9 + $0x70] sm:$0xff]  }
 0x192   : > { %v1181_v47 = vsel %vm7070_vm15, %v1176_v26, %v1180_v8  ;;  %v1316_v53 = vrot.slane %v1315_v31, 4  ;;  %v1022_v56 = vshrl.u32 %v7133_v16, 16  ;;  %v1028_v62 = vshll.u32 %v7135_v22, 16  ;;  %v5968_v8 = vld [vmem:[#allocation9 + $0x68] sm:$0xff]   ;;  %v7152_v31 = vld [vmem:[#allocation2 + $0x30] sm:$0xf] }
 0x193   : > { %v1330_v37 = vrot.slane %v1328_v21, 5  ;;  %v1015_v60 = vor.u32 %v1014_v48, %v1011_v38  ;;  %v1020_v61 = vrot.slane %v1018_v51, 5  ;;  %v1333_v63 = vshrl.u32 %v789_v24, 16  ;;  %v5974_v48 = vld [vmem:[#allocation9 + $0x30] sm:$0xff]  }
 0x194   : > { %5226 = vmatpush3.bf16.msra.mxu1 %v5959_v35  ;;  %v1324_v35 = vrot.slane %v1322_v20, 4  ;;  %v1024_v6 = vrot.slane %v1022_v56, 4  ;;  %v1030_v10 = vrot.slane %v1028_v62, 5  ;;  %v1346_v17 = vshrl.u32 %v790_v42, 16  ;;  %v7164_v56 = vld [vmem:[#allocation2 + $0x48] sm:$0xf] }
 0x195   : > { %5227 = vmatprep.subr.bf16.mxu1 %v5960_v45  ;;  %v1171_v45 = vsel %vm7070_vm15, %v1166_v25, %v1170_v2  ;;  %v1321_v2 = vsel %vm7070_vm15, %v1316_v53, %v1320_v27  ;;  %v1016_v9 = vrot.slane %v1015_v60, 4  ;;  %v1335_v11 = vrot.slane %v1333_v63, 4  ;;  %v7169_v63 = vld [vmem:[#allocation2 + $0x4c] sm:$0xf] }
 0x196   : > { %v4859_v52 = vcombine.low %v1171_v45, %v1181_v47  ;;  %v1325_v55 = vor.u32 %v1324_v35, %v1320_v27  ;;  %v1025_v14 = vor.u32 %v1024_v6, %v1020_v61  ;;  %v1352_v21 = vshll.u32 %v1257_v57, 16  ;;  %v5975_v35 = vld [vmem:[#allocation9 + $0x190] sm:$0xff]   ;;  %v7158_v45 = vld [vmem:[#allocation2 + $0x38] sm:$0x1] }
 0x197   : > { %v1348_v27 = vrot.slane %v1346_v17, 4  ;;  %v1183_v47 = vshrl.u32 %v7152_v31, 16  ;;  %5294 = vmatpush3.bf16.msra.mxu0 %v5975_v35  ;;  %v5976_v57 = vld [vmem:[#allocation9 + $0x78] sm:$0xff]   ;;  %v1202_v62 = vshll.u32 %v7158_v45, 16 }
 0x198   : > { %5228 = vmatpush3.bf16.msra.mxu1 %v5961_v7  ;;  %1717 = vmatprep.mubr.bf16.mxu0 %v4859_v52  ;;  %v1326_v3 = vrot.slane %v1325_v55, 4  ;;  %v1336_v7 = vshll.u32 %v789_v24, 16  ;;  %v1021_v24 = vsel %vm7070_vm15, %v1016_v9, %v1020_v61  ;;  %v1026_v25 = vrot.slane %v1025_v14, 4 }
 0x199   : > { %5229 = vmatprep.subr.bf16.mxu1 %v5962_v12  ;;  %v1342_v12 = vshll.u32 %v790_v42, 16  ;;  %v1354_v30 = vrot.slane %v1352_v21, 5  ;;  %v1186_v52 = vshll.u32 %v7152_v31, 16  ;;  %v1185_v61 = vrot.slane %v1183_v47, 4  ;;  %5295 = vmatprep.subr.bf16.mxu0 %v5977_v1  ;;  %v5979_v21 = vld [vmem:[#allocation9 + $0x198] sm:$0xff]  }
 0x19a   : > { %v1331_v13 = vsel %vm7070_vm15, %v1326_v3, %v1330_v37  ;;  %v1338_v15 = vrot.slane %v1336_v7, 5  ;;  %v1031_v37 = vsel %vm7070_vm15, %v1026_v25, %v1030_v10  ;;  %v7171_v7 = vld [vmem:[#allocation2 + $0x50] sm:$0x1]  ;;  %v1204_v10 = vrot.slane %v1202_v62, 5 }
 0x19b   : > { %v4865_v19 = vcombine.low %v1321_v2, %v1331_v13  ;;  %v1344_v20 = vrot.slane %v1342_v12, 5  ;;  %v4853_v51 = vcombine.low %v1021_v24, %v1031_v37  ;;  %v1188_v2 = vrot.slane %v1186_v52, 5  ;;  %v7178_v13 = vld [vmem:[#allocation2 + $0x24] sm:$0xf]  ;;  %5296 = vmatpush3.bf16.msra.mxu0 %v5979_v21 }
 0x19c   : > { %5230 = vmatpush3.bf16.msra.mxu1 %v5963_v18  ;;  %v5970_v18 = vld [vmem:[#allocation9 + $0x28] sm:$0xff]   ;;  %v1339_v26 = vor.u32 %v1338_v15, %v1335_v11  ;;  %v1360_v11 = vshll.u32 %v7164_v56, 16  ;;  %v1366_v12 = vshll.u32 %v7169_v63, 16  ;;  %v1370_v25 = vshrl.u32 %v7169_v63, 16 }
 0x19d   : > { %5231 = vmatprep.subr.bf16.mxu1 %v5964_v43  ;;  %5531 = vmatprep.mubr.bf16.mxu1 %v4865_v19  ;;  %v1349_v42 = vor.u32 %v1348_v27, %v1344_v20  ;;  %v7156_v43 = vld [vmem:[#allocation2 + $0x34] sm:$0xf]  ;;  %v1189_v15 = vor.u32 %v1188_v2, %v1185_v61  ;;  %v7180_v19 = vld [vmem:[#allocation2 + $0x28] sm:$0xf]  ;;  %v7184_v27 = vld [vmem:[#allocation2 + $0x2c] sm:$0x1] }
 0x19e   : > { %v1340_v38 = vrot.slane %v1339_v26, 4  ;;  %v1192_v53 = vshll.u32 %v7156_v43, 16  ;;  %v1196_v55 = vshrl.u32 %v7156_v43, 16  ;;  %1718 = vmatmul.mubr.bf16.gmra.mrb[8].mxu0 %v4853_v51  ;;  %v1368_v24 = vrot.slane %v1366_v12, 5 }
 0x19f   : > { %v1350_v60 = vrot.slane %v1349_v42, 4  ;;  %v1376_v26 = vshll.u32 %v7171_v7, 16  ;;  %v1033_v37 = vshrl.u32 %v7178_v13, 16  ;;  %v7188_v42 = vld [vmem:[#allocation2 + $0x54] sm:$0xf]  ;;  %v1372_v51 = vrot.slane %v1370_v25, 4 }
 0x1a0   : > { %5232 = vmatpush3.bf16.msra.mxu1 %v5966_v59  ;;  %v1345_v59 = vsel %vm7070_vm15, %v1340_v38, %v1344_v20  ;;  %v1194_v3 = vrot.slane %v1192_v53, 5  ;;  %v1198_v6 = vrot.slane %v1196_v55, 4  ;;  %v5978_v20 = vld [vmem:[#allocation9 + $0x38] sm:$0xff]   ;;  %v1036_v38 = vshll.u32 %v7178_v13, 16 }
 0x1a1   : > { %5233 = vmatprep.subr.bf16.mxu1 %v5968_v8  ;;  %v1357_v8 = vshrl.u32 %v7164_v56, 16  ;;  %v1355_v9 = vsel %vm7070_vm15, %v1350_v60, %v1354_v30  ;;  %v1190_v30 = vrot.slane %v1189_v15, 4  ;;  %v1378_v52 = vrot.slane %v1376_v26, 5  ;;  %v7191_v55 = vld [vmem:[#allocation2 + $0x58] sm:$0xf] }
 0x1a2   : > { %v4866_v14 = vcombine.low %v1345_v59, %v1355_v9  ;;  %v1199_v17 = vor.u32 %v1198_v6, %v1194_v3  ;;  %v1042_v53 = vshll.u32 %v7180_v19, 16  ;;  %v7193_v59 = vld [vmem:[#allocation9 + $0x80] sm:$0xff]   ;;  %v1035_v61 = vrot.slane %v1033_v37, 4 }
 0x1a3   : > { %v1038_v62 = vrot.slane %v1036_v38, 5  ;;  %v1373_v2 = vor.u32 %v1372_v51, %v1368_v24  ;;  %v1052_v12 = vshll.u32 %v7184_v27, 16  ;;  %v1394_v38 = vshrl.u32 %v7191_v55, 16 }
 0x1a4   : > { %5234 = vmatpush3.bf16.msra.mxu1 %v5970_v18  ;;  %v1359_v18 = vrot.slane %v1357_v8, 4  ;;  %v1200_v35 = vrot.slane %v1199_v17, 4  ;;  %v1044_v6 = vrot.slane %v1042_v53, 5  ;;  %v7199_v8 = vld [vmem:[#allocation2 + $0x5c] sm:$0x1]  ;;  %v1384_v17 = vshll.u32 %v7188_v42, 16 }
 0x1a5   : > { %5235 = vmatprep.subr.bf16.mxu1 %v5972_v23  ;;  %v1362_v23 = vrot.slane %v1360_v11, 5  ;;  %5532 = vmatmul.mubr.bf16.gmra.mrb[4].mxu1 %v4866_v14  ;;  %v1039_v9 = vor.u32 %v1038_v62, %v1035_v61  ;;  %v1046_v11 = vshrl.u32 %v7180_v19, 16  ;;  %v1381_v14 = vshrl.u32 %v7188_v42, 16 }
 0x1a6   : > { %v1205_v60 = vsel %vm7070_vm15, %v1200_v35, %v1204_v10  ;;  %v1374_v15 = vrot.slane %v1373_v2, 4  ;;  %v1054_v25 = vrot.slane %v1052_v12, 5  ;;  %v1386_v35 = vrot.slane %v1384_v17, 5 }
 0x1a7   : > { %v1363_v47 = vor.u32 %v1362_v23, %v1359_v18  ;;  %v1390_v18 = vshll.u32 %v7191_v55, 16  ;;  %v1040_v21 = vrot.slane %v1039_v9, 4  ;;  %v1048_v23 = vrot.slane %v1046_v11, 4  ;;  %v5990_v9 = vld [vmem:[#allocation9 + $0x1f0] sm:$0xff]  }
 0x1a8   : > { %5236 = vmatpush3.bf16.msra.mxu1 %v5974_v48  ;;  %v1195_v48 = vsel %vm7070_vm15, %v1190_v30, %v1194_v3  ;;  %v5983_v3 = vld [vmem:[#allocation9 + $0x1e0] sm:$0xff]   ;;  %v1383_v26 = vrot.slane %v1381_v14, 4  ;;  %v1379_v30 = vsel %vm7070_vm15, %v1374_v15, %v1378_v52  ;;  %v1400_v53 = vshll.u32 %v7199_v8, 16 }
 0x1a9   : > { %5237 = vmatprep.subr.bf16.mxu1 %v5976_v57  ;;  %v4860_v1 = vcombine.low %v1195_v48, %v1205_v60  ;;  %v1364_v57 = vrot.slane %v1363_v47, 4  ;;  %5297 = vmatprep.subr.bf16.mxu0 %v5983_v3  ;;  %v1392_v37 = vrot.slane %v1390_v18, 5  ;;  %v1049_v51 = vor.u32 %v1048_v23, %v1044_v6  ;;  %v5986_v48 = vld [vmem:[#allocation9 + $0x1a8] sm:$0xff]   ;;  %v7221_v3 = vld [vmem:[#allocation2 + $0x3c] sm:$0xf] }
 0x1aa   : > { %v1387_v60 = vor.u32 %v1386_v35, %v1383_v26  ;;  %v1396_v61 = vrot.slane %v1394_v38, 4  ;;  %v1045_v62 = vsel %vm7070_vm15, %v1040_v21, %v1044_v6  ;;  %v1402_v52 = vrot.slane %v1400_v53, 5  ;;  %v7225_v6 = vld [vmem:[#allocation2 + $0x44] sm:$0x1]  ;;  %v7232_v23 = vld [vmem:[#allocation2 + $0x30] sm:$0xf] }
 0x1ab   : > { %1725 = vmatprep.mubr.bf16.mxu0 %v4860_v1  ;;  %v1369_v10 = vsel %vm7070_vm15, %v1364_v57, %v1368_v24  ;;  %v5985_v24 = vld [vmem:[#allocation9 + $0x1e8] sm:$0xff]   ;;  %v1050_v1 = vrot.slane %v1049_v51, 4  ;;  %v4839_v15 = vcombine.low %v7052_v28, %v7054_v29  ;;  %v1207_v21 = vshrl.u32 %v7221_v3, 16  ;;  %v7234_v26 = vld [vmem:[#allocation2 + $0x34] sm:$0xf] }
 0x1ac   : > { %5238 = vmatpush3.bf16.msra.mxu1 %v5978_v20  ;;  %v5984_v20 = vld [vmem:[#allocation9 + $0x1a0] sm:$0xff]   ;;  %v4867_v47 = vcombine.low %v1369_v10, %v1379_v30  ;;  %v1388_v57 = vrot.slane %v1387_v60, 4  ;;  %v1397_v2 = vor.u32 %v1396_v61, %v1392_v37  ;;  %v1226_v28 = vshll.u32 %v7225_v6, 16  ;;  %v7240_v29 = vld [vmem:[#allocation2 + $0x38] sm:$0x1]  ;;  %v5991_v51 = vld [vmem:[#allocation9 + $0x1b0] sm:$0xff]  }
 0x1ad   : > { %5539 = vmatprep.subr.bf16.mxu1 %v7193_v59  ;;  %5298 = vmatpush3.bf16.msra.mxu0 %v5984_v20  ;;  %v1055_v14 = vsel %vm7070_vm15, %v1050_v1, %v1054_v25  ;;  %v7223_v10 = vld [vmem:[#allocation2 + $0x40] sm:$0xf]  ;;  %v1210_v25 = vshll.u32 %v7221_v3, 16  ;;  %v1209_v38 = vrot.slane %v1207_v21, 4 }
 0x1ae   : > { %5299 = vmatprep.subr.bf16.mxu0 %v5985_v24  ;;  %5535 = vmatprep.mubr.bf16.mxu1 %v4867_v47  ;;  %v4854_v17 = vcombine.low %v1045_v62, %v1055_v14  ;;  %v1393_v18 = vsel %vm7070_vm15, %v1388_v57, %v1392_v37  ;;  %v1398_v20 = vrot.slane %v1397_v2, 4  ;;  %v1216_v30 = vshll.u32 %v7223_v10, 16 }
 0x1af   : > { %v1220_v35 = vshrl.u32 %v7223_v10, 16  ;;  %v1057_v24 = vshrl.u32 %v7232_v23, 16  ;;  %v1060_v47 = vshll.u32 %v7232_v23, 16  ;;  %v1228_v62 = vrot.slane %v1226_v28, 5 }
 0x1b0   : > { %1726 = vmatmul.mubr.bf16.gmra.mrb[12].mxu0 %v4854_v17  ;;  %v1403_v37 = vsel %vm7070_vm15, %v1398_v20, %v1402_v52  ;;  %v1218_v60 = vrot.slane %v1216_v30, 5  ;;  %v1066_v2 = vshll.u32 %v7234_v26, 16  ;;  %v1070_v52 = vshrl.u32 %v7234_v26, 16 }
 0x1b1   : > { %5300 = vmatpush3.bf16.msra.mxu0 %v5986_v48  ;;  %v4868_v53 = vcombine.low %v1393_v18, %v1403_v37  ;;  %v1212_v48 = vrot.slane %v1210_v25, 5  ;;  %v1222_v61 = vrot.slane %v1220_v35, 4  ;;  %v1059_v1 = vrot.slane %v1057_v24, 4  ;;  %v5993_v18 = vld [vmem:[#allocation9 + $0x1f8] sm:$0xff]  }
 0x1b2   : > { %5301 = vmatprep.subr.bf16.mxu0 %v5990_v9  ;;  %v1062_v57 = vrot.slane %v1060_v47, 5  ;;  %v1076_v17 = vshll.u32 %v7240_v29, 16  ;;  %v1068_v21 = vrot.slane %v1066_v2, 5  ;;  %v1072_v35 = vrot.slane %v1070_v52, 4  ;;  %v7270_v52 = vld [vmem:[#allocation2 + $0x3c] sm:$0xf] }
 0x1b3   : > { %5536 = vmatmul.mubr.bf16.gmra.mrb[8].mxu1 %v4868_v53  ;;  %v1213_v9 = vor.u32 %v1212_v48, %v1209_v38  ;;  %v1223_v14 = vor.u32 %v1222_v61, %v1218_v60  ;;  %v4833_v24 = vcombine.low %v7060_v36, %v7062_v39  ;;  %v5994_v38 = vld [vmem:[#allocation9 + $0x1b8] sm:$0xff]   ;;  %v5987_v53 = vld [vmem:[#allocation9 + $0x88] sm:$0xff]   ;;  %v4840_v61 = vcombine.low %v7082_v40, %v7086_v46  ;;  %v7263_v39 = vld [vmem:[#allocation2 + $0x50] sm:$0x1] }
 0x1b4   : > { %2007 = vmatprep.mubr.bf16.mxu1 %v4839_v15  ;;  %v1063_v20 = vor.u32 %v1062_v57, %v1059_v1  ;;  %v1078_v28 = vrot.slane %v1076_v17, 5  ;;  %v7255_v48 = vld [vmem:[#allocation2 + $0x48] sm:$0xf]  ;;  %v7261_v36 = vld [vmem:[#allocation2 + $0x4c] sm:$0xf]  ;;  %v1250_v40 = vshll.u32 %v7263_v39, 16 }
 0x1b5   : > { %5302 = vmatpush3.bf16.msra.mxu0 %v5991_v51  ;;  %v1214_v25 = vrot.slane %v1213_v9, 4  ;;  %v1224_v30 = vrot.slane %v1223_v14, 4  ;;  %v1073_v51 = vor.u32 %v1072_v35, %v1068_v21  ;;  %v1234_v2 = vshll.u32 %v7255_v48, 16 }
 0x1b6   : > { %v1064_v37 = vrot.slane %v1063_v20, 4  ;;  %5303 = vmatprep.subr.bf16.mxu0 %v5993_v18  ;;  %v1240_v9 = vshll.u32 %v7261_v36, 16  ;;  %v1244_v14 = vshrl.u32 %v7261_v36, 16  ;;  %v7274_v18 = vld [vmem:[#allocation2 + $0x44] sm:$0x1] }
 0x1b7   : > { %v1219_v47 = vsel %vm7070_vm15, %v1214_v25, %v1218_v60  ;;  %v1229_v15 = vsel %vm7070_vm15, %v1224_v30, %v1228_v62  ;;  %v1231_v60 = vshrl.u32 %v7255_v48, 16  ;;  %v1074_v62 = vrot.slane %v1073_v51, 4 }
 0x1b8   : > { %v4861_v1 = vcombine.low %v1219_v47, %v1229_v15  ;;  %v1069_v57 = vsel %vm7070_vm15, %v1064_v37, %v1068_v21  ;;  %v1236_v20 = vrot.slane %v1234_v2, 5  ;;  %v7272_v21 = vld [vmem:[#allocation2 + $0x40] sm:$0xf]  ;;  %v4834_v25 = vcombine.low %v7096_v58, %v7098_v0 }
 0x1b9   : > { %5304 = vmatpush3.bf16.msra.mxu0 %v5994_v38  ;;  %v1233_v17 = vrot.slane %v1231_v60, 4  ;;  %v1079_v30 = vsel %vm7070_vm15, %v1074_v62, %v1078_v28  ;;  %v1242_v35 = vrot.slane %v1240_v9, 5  ;;  %v1246_v37 = vrot.slane %v1244_v14, 4 }
 0x1ba   : > { %1733 = vmatprep.mubr.bf16.mxu0 %v4861_v1  ;;  %v1252_v38 = vrot.slane %v1250_v40, 5  ;;  %v4855_v47 = vcombine.low %v1069_v57, %v1079_v30  ;;  %v1081_v51 = vshrl.u32 %v7270_v52, 16  ;;  %v1084_v1 = vshll.u32 %v7270_v52, 16 }
 0x1bb   : > { %2008 = vmatmul.mubr.bf16.vlgmr.msra.gmra.mrb[12].mxu1 %v4833_v24  ;;  %v1237_v15 = vor.u32 %v1236_v20, %v1233_v17  ;;  %v1247_v60 = vor.u32 %v1246_v37, %v1242_v35  ;;  %v1090_v58 = vshll.u32 %v7272_v21, 16  ;;  %v1094_v2 = vshrl.u32 %v7272_v21, 16  ;;  %v5992_v24 = vld [vmem:[#allocation9 + $0x90] sm:$0xff]   ;;  %v5997_v37 = vld [vmem:[#allocation9 + $0x98] sm:$0xff]  }
 0x1bc   : > { %5540 = vmatpush3.bf16.msra.mxu1 %v7193_v59  ;;  %2015 = vmatprep.mubr.bf16.mxu1 %v4840_v61  ;;  %v1100_v28 = vshll.u32 %v7274_v18, 16  ;;  %v1083_v57 = vrot.slane %v1081_v51, 4  ;;  %v1086_v9 = vrot.slane %v1084_v1, 5  ;;  %v6022_v59 = vld [vmem:[#allocation2 + $0x10] sm:$0xf] }
 0x1bd   : > { %5541 = vmatprep.subr.bf16.mxu1 %v5987_v53  ;;  %1734 = vmatmul.mubr.bf16.gmra.mrb[16].mxu0 %v4855_v47  ;;  %v1238_v62 = vrot.slane %v1237_v15, 4  ;;  %v2220_v14 = vrot.slane %v6022_v59, 5  ;;  %v1248_v61 = vrot.slane %v1247_v60, 4  ;;  %v1092_v40 = vrot.slane %v1090_v58, 5  ;;  %v2200_v60 = vld [vmem:[#allocation2 + $0xc] sm:$0xe] }
 0x1be   : > { %v1096_v17 = vrot.slane %v1094_v2, 4  ;;  %v1102_v20 = vrot.slane %v1100_v28, 5  ;;  %v1087_v47 = vor.u32 %v1086_v9, %v1083_v57  ;;  %v4841_v15 = vcombine.low %v7116_v32, %v7118_v33  ;;  %v6023_v2 = vld [vmem:[#allocation2 + $0x14] sm:$0x1] }
 0x1bf   : > { %v1243_v12 = vsel %vm7070_vm15, %v1238_v62, %v1242_v35  ;;  %v1253_v51 = vsel %vm7070_vm15, %v1248_v61, %v1252_v38  ;;  %v2222_v58 = vrot.slane %v2220_v14, 4  ;;  %v2223_v28 = vrot.slane %v6023_v2, 5  ;;  %v2201_v61 = vld [vmem:[#allocation2 + $0x18] sm:$0xe] }
 0x1c0   : > { %5542 = vmatpush3.bf16.msra.mxu1 %v5987_v53  ;;  %v1097_v1 = vor.u32 %v1096_v17, %v1092_v40  ;;  %v4862_v59 = vcombine.low %v1243_v12, %v1253_v51  ;;  %v1088_v11 = vrot.slane %v1087_v47, 4  ;;  %v4923_v50 = vrot.slane %v2200_v60, 9  ;;  %v6025_v53 = vld [vmem:[#allocation2 + $0x8] sm:$0x1] }
 0x1c1   : > { %5543 = vmatprep.subr.bf16.mxu1 %v5992_v24  ;;  %v2160_v35 = vrot.slane %v6024_v41, 5  ;;  %v2163_v62 = vrot.slane %v6025_v53, 5  ;;  %v2224_v32 = vsel %vm7288_vm2, %v2222_v58, %v2223_v28  ;;  %v4917_v9 = vrot.slane %v2137_v44, 9  ;;  %v6004_v28 = vld [vmem:[#allocation9 + $0xb0] sm:$0xff]  }
 0x1c2   : > { %v1098_v57 = vrot.slane %v1097_v1, 4  ;;  %1741 = vmatprep.mubr.bf16.mxu0 %v4862_v59  ;;  %v1093_v38 = vsel %vm7070_vm15, %v1088_v11, %v1092_v40  ;;  %v2221_v12 = vsel %vm7288_vm2, %v4923_v50, %v2220_v14  ;;  %v2227_v17 = vrot.slane %v7086_v46, 5  ;;  %v6000_v1 = vld [vmem:[#allocation9 + $0xa0] sm:$0xff]   ;;  %v2138_v14 = vld [vmem:[#allocation2 + $0xc] sm:$0xe] }
 0x1c3   : > { %2016 = vmatmul.mubr.bf16.gmra.mrb[16].mxu1 %v4834_v25  ;;  %v4941_v25 = vcombine.low %v2221_v12, %v2224_v32  ;;  %v2162_v47 = vrot.slane %v2160_v35, 4  ;;  %v4924_v51 = vrot.slane %v2201_v61, 9  ;;  %v2230_v11 = vrot.slane %v7088_v49, 5  ;;  %v6001_v49 = vld [vmem:[#allocation9 + $0xa8] sm:$0xff]   ;;  %v6007_v12 = vld [vmem:[#allocation9 + $0xb8] sm:$0xff]  }
 0x1c4   : > { %5544 = vmatpush3.bf16.msra.mxu1 %v5992_v24  ;;  %v1103_v41 = vsel %vm7070_vm15, %v1098_v57, %v1102_v20  ;;  %2023 = vmatprep.mubr.bf16.mxu1 %v4841_v15  ;;  %v2229_v58 = vrot.slane %v2227_v17, 4  ;;  %v4835_v50 = vcombine.low %v7129_v4, %v7133_v16  ;;  %v4842_v44 = vcombine.low %v7152_v31, %v7156_v43 }
 0x1c5   : > { %5545 = vmatprep.subr.bf16.mxu1 %v5997_v37  ;;  %v4856_v60 = vcombine.low %v1093_v38, %v1103_v41  ;;  %v2161_v46 = vsel %vm7288_vm2, %v4917_v9, %v2160_v35  ;;  %v2164_v24 = vsel %vm7288_vm2, %v2162_v47, %v2163_v62  ;;  %v2167_v40 = vrot.slane %v7098_v0, 5  ;;  %v2139_v38 = vld [vmem:[#allocation2 + $0x18] sm:$0xe] }
 0x1c6   : > { %v2228_v4 = vsel %vm7288_vm2, %v4924_v51, %v2227_v17  ;;  %v2231_v20 = vsel %vm7288_vm2, %v2229_v58, %v2230_v11  ;;  %v2234_v31 = vrot.slane %v7118_v33, 5  ;;  %v4935_v15 = vcombine.low %v2161_v46, %v2164_v24 }
 0x1c7   : > { %1742 = vmatmul.mubr.bf16.gmra.mrb[20].mxu0 %v4856_v60  ;;  %v4918_v2 = vrot.slane %v2138_v14, 9  ;;  %v4942_v59 = vcombine.low %v2228_v4, %v2231_v20  ;;  %v2169_v35 = vrot.slane %v2167_v40, 4  ;;  %v2170_v0 = vrot.slane %v7101_v5, 5 }
 0x1c8   : > { %5546 = vmatpush3.bf16.msra.mxu1 %v5997_v37  ;;  %2617 = vmatprep.mubr.bf16.mxu0 %v4941_v25  ;;  %v2202_v37 = vld [vmem:[#allocation2 + $0x24] sm:$0xe]  ;;  %v2236_v62 = vrot.slane %v2234_v31, 4  ;;  %v2237_v57 = vrot.slane %v7120_v34, 5  ;;  %v4836_v32 = vcombine.low %v7178_v13, %v7180_v19  ;;  %v4843_v33 = vcombine.low %v7221_v3, %v7223_v10  ;;  %v2203_v34 = vld [vmem:[#allocation2 + $0x30] sm:$0xe] }
 0x1c9   : > { %5547 = vmatprep.subr.bf16.mxu1 %v6000_v1  ;;  %v4925_v53 = vrot.slane %v2202_v37, 9  ;;  %v2168_v9 = vsel %vm7288_vm2, %v4918_v2, %v2167_v40  ;;  %v2171_v5 = vsel %vm7288_vm2, %v2169_v35, %v2170_v0  ;;  %v2174_v61 = vrot.slane %v7133_v16, 5 }
 0x1ca   : > { %v2241_v13 = vrot.slane %v7156_v43, 5  ;;  %v2238_v3 = vsel %vm7288_vm2, %v2236_v62, %v2237_v57  ;;  %v4919_v41 = vrot.slane %v2139_v38, 9  ;;  %v4936_v25 = vcombine.low %v2168_v9, %v2171_v5  ;;  %v7340_v43 = vld [vmem:[#allocation9 + $0x200] sm:$0xff]   ;;  %v6026_v62 = vld [vmem:[#allocation2 + $0x18] sm:$0xf] }
 0x1cb   : > { %2024 = vmatmul.mubr.bf16.gmra.mrb[20].mxu1 %v4835_v50  ;;  %v2235_v17 = vsel %vm7288_vm2, %v4925_v53, %v2234_v31  ;;  %v2177_v47 = vrot.slane %v7135_v22, 5  ;;  %v4926_v51 = vrot.slane %v2203_v34, 9  ;;  %v2176_v16 = vrot.slane %v2174_v61, 4  ;;  %v2265_v31 = vld [vmem:[#allocation2 + $0x54] sm:$0xe] }
 0x1cc   : > { %2031 = vmatprep.mubr.bf16.mxu1 %v4842_v44  ;;  %5548 = vmatpush3.bf16.msra.mxu1 %v6000_v1  ;;  %v4943_v1 = vcombine.low %v2235_v17, %v2238_v3  ;;  %v2243_v60 = vrot.slane %v2241_v13, 4  ;;  %v2244_v58 = vrot.slane %v7158_v45, 5  ;;  %v4837_v11 = vcombine.low %v7232_v23, %v7234_v26  ;;  %v2140_v44 = vld [vmem:[#allocation2 + $0x24] sm:$0xe]  ;;  %v2141_v9 = vld [vmem:[#allocation2 + $0x30] sm:$0xe] }
 0x1cd   : > { %5549 = vmatprep.subr.bf16.mxu1 %v6001_v49  ;;  %v4844_v50 = vcombine.low %v7255_v48, %v7261_v36  ;;  %v2175_v22 = vsel %vm7288_vm2, %v4919_v41, %v2174_v61  ;;  %v2178_v46 = vsel %vm7288_vm2, %v2176_v16, %v2177_v47  ;;  %v2181_v45 = vrot.slane %v7180_v19, 5  ;;  %v2204_v48 = vld [vmem:[#allocation2 + $0x3c] sm:$0xe]  ;;  %v2205_v3 = vld [vmem:[#allocation2 + $0x48] sm:$0xe] }
 0x1ce   : > { %v2242_v23 = vsel %vm7288_vm2, %v4926_v51, %v2241_v13  ;;  %v2245_v24 = vsel %vm7288_vm2, %v2243_v60, %v2244_v58  ;;  %v2248_v14 = vrot.slane %v7223_v10, 5  ;;  %v4920_v40 = vrot.slane %v2140_v44, 9  ;;  %v7400_v44 = vld [vmem:[#allocation2 + $0x28] sm:$0xf] }
 0x1cf   : > { %2618 = vmatmul.mubr.bf16.vlgmr.msra.gmra.mrb[24].mxu0 %v4935_v15  ;;  %v4937_v4 = vcombine.low %v2175_v22, %v2178_v46  ;;  %v2184_v20 = vrot.slane %v7184_v27, 5  ;;  %v4944_v19 = vcombine.low %v2242_v23, %v2245_v24  ;;  %v2183_v37 = vrot.slane %v2181_v45, 4  ;;  %v7365_v27 = vld [vmem:[#allocation2 + $0x1c] sm:$0xf]  ;;  %v6030_v46 = vld [vmem:[#allocation2 + $0x30] sm:$0xf] }
 0x1d0   : > { %5550 = vmatpush3.bf16.msra.mxu1 %v6001_v49  ;;  %2625 = vmatprep.mubr.bf16.mxu0 %v4942_v59  ;;  %v2264_v49 = vld [vmem:[#allocation2 + $0x48] sm:$0xe]  ;;  %v4927_v15 = vrot.slane %v2204_v48, 9  ;;  %v2251_v2 = vrot.slane %v7225_v6, 5  ;;  %v2308_v35 = vrot.slane %v7169_v63, 5  ;;  %v2311_v0 = vrot.slane %v7171_v7, 5 }
 0x1d1   : > { %5551 = vmatprep.subr.bf16.mxu1 %v6004_v28  ;;  %v4933_v59 = vrot.slane %v2264_v49, 9  ;;  %v4838_v10 = vcombine.low %v7270_v52, %v7272_v21  ;;  %v2182_v53 = vsel %vm7288_vm2, %v4920_v40, %v2181_v45  ;;  %v4845_v57 = vcombine.low %v6026_v62, %v7365_v27  ;;  %v7403_v45 = vld [vmem:[#allocation2 + $0x34] sm:$0xf]  ;;  %v6011_v48 = vld [vmem:[#allocation9 + $0x208] sm:$0xff]   ;;  %v6034_v62 = vld [vmem:[#allocation2 + $0x20] sm:$0x1] }
 0x1d2   : > { %v2315_v7 = vrot.slane %v7191_v55, 5  ;;  %v2318_v38 = vrot.slane %v7199_v8, 5  ;;  %v2185_v52 = vsel %vm7288_vm2, %v2183_v37, %v2184_v20  ;;  %v2188_v5 = vrot.slane %v7234_v26, 5 }
 0x1d3   : > { %2032 = vmatmul.mubr.bf16.gmra.mrb[24].mxu1 %v4836_v32  ;;  %v4934_v32 = vrot.slane %v2265_v31, 9  ;;  %v7370_v6 = vsel %vm7288_vm2, %v4933_v59, %v2308_v35  ;;  %v2255_v61 = vrot.slane %v7261_v36, 5  ;;  %v4938_v26 = vcombine.low %v2182_v53, %v2185_v52  ;;  %v7418_v59 = vld [vmem:[#allocation2 + $0x40] sm:$0xf] }
 0x1d4   : > { %2039 = vmatprep.mubr.bf16.mxu1 %v4843_v33  ;;  %5552 = vmatpush3.bf16.msra.mxu1 %v6004_v28  ;;  %v2250_v28 = vrot.slane %v2248_v14, 4  ;;  %v2310_v33 = vrot.slane %v2308_v35, 4  ;;  %v2317_v17 = vrot.slane %v2315_v7, 4  ;;  %v4921_v36 = vrot.slane %v2141_v9, 9 }
 0x1d5   : > { %5553 = vmatprep.subr.bf16.mxu1 %v6007_v12  ;;  %v7388_v8 = vsel %vm7288_vm2, %v4934_v32, %v2315_v7  ;;  %v2190_v51 = vrot.slane %v2188_v5, 4  ;;  %v4928_v60 = vrot.slane %v2205_v3, 9  ;;  %v2257_v58 = vrot.slane %v2255_v61, 4 }
 0x1d6   : > { %v2252_v34 = vsel %vm7288_vm2, %v2250_v28, %v2251_v2  ;;  %v7384_v13 = vsel %vm7288_vm2, %v2310_v33, %v2311_v0  ;;  %v4847_v23 = vcombine.low %v6030_v46, %v7403_v45  ;;  %v2260_v2 = vld [vmem:[#allocation2 + $0x18] sm:$0xe]  ;;  %v6032_v28 = vld [vmem:[#allocation2 + $0x3c] sm:$0xf]  ;;  %v8014_v32 = vcombine.low %v7164_v56, %v7169_v63  ;;  %v6016_v33 = vld [vmem:[#allocation9 + $0x220] sm:$0xff]  }
 0x1d7   : > { %2626 = vmatmul.mubr.bf16.gmra.mrb[28].mxu0 %v4936_v25  ;;  %v4951_v41 = vcombine.low %v7370_v6, %v7384_v13  ;;  %v7394_v25 = vsel %vm7288_vm2, %v2317_v17, %v2318_v38  ;;  %v2256_v40 = vsel %vm7288_vm2, %v4928_v60, %v2255_v61  ;;  %v4848_v35 = vcombine.low %v6032_v28, %v7418_v59  ;;  %v6020_v63 = vld [vmem:[#allocation9 + $0x230] sm:$0xff]   ;;  %v6035_v17 = vld [vmem:[#allocation2 + $0x2c] sm:$0x1] }
 0x1d8   : > { %5554 = vmatpush3.bf16.msra.mxu1 %v6007_v12  ;;  %2633 = vmatprep.mubr.bf16.mxu0 %v4943_v1  ;;  %v2249_v12 = vsel %vm7288_vm2, %v4927_v15, %v2248_v14  ;;  %v2191_v1 = vrot.slane %v7240_v29, 5  ;;  %v4952_v16 = vcombine.low %v7388_v8, %v7394_v25  ;;  %v2189_v29 = vsel %vm7288_vm2, %v4921_v36, %v2188_v5  ;;  %v2261_v5 = vld [vmem:[#allocation2 + $0x24] sm:$0xe] }
 0x1d9   : > { %5567 = vmatprep.subr.bf16.mxu1 %v7340_v43  ;;  %v4945_v47 = vcombine.low %v2249_v12, %v2252_v34  ;;  %v2195_v14 = vrot.slane %v7272_v21, 5  ;;  %v2198_v15 = vrot.slane %v7274_v18, 5  ;;  %v2280_v21 = vrot.slane %v7365_v27, 5  ;;  %v6017_v12 = vld [vmem:[#allocation9 + $0x228] sm:$0xff]   ;;  %v2262_v34 = vld [vmem:[#allocation2 + $0x30] sm:$0xe] }
 0x1da   : > { %v2192_v24 = vsel %vm7288_vm2, %v2190_v51, %v2191_v1  ;;  %v4929_v18 = vrot.slane %v2260_v2, 9  ;;  %v2283_v27 = vrot.slane %v6034_v62, 5  ;;  %v8015_v9 = vcombine.low %v7188_v42, %v7191_v55  ;;  %v6036_v55 = vld [vmem:[#allocation2 + $0x38] sm:$0x1] }
 0x1db   : > { %2040 = vmatmul.mubr.bf16.gmra.mrb[28].mxu1 %v4837_v11  ;;  %v2258_v11 = vrot.slane %v7263_v39, 5  ;;  %v2142_v39 = vld [vmem:[#allocation2 + $0x3c] sm:$0xe]  ;;  %v2197_v37 = vrot.slane %v2195_v14, 4  ;;  %v2282_v53 = vrot.slane %v2280_v21, 4  ;;  %v2287_v56 = vrot.slane %v7400_v44, 5 }
 0x1dc   : > { %2047 = vmatprep.mubr.bf16.mxu1 %v4844_v50  ;;  %v6028_v50 = vld [vmem:[#allocation2 + $0x24] sm:$0xf]  ;;  %v4922_v20 = vrot.slane %v2142_v39, 9  ;;  %v2281_v7 = vsel %vm7288_vm2, %v4929_v18, %v2280_v21  ;;  %v2294_v61 = vrot.slane %v7403_v45, 5  ;;  %v2290_v3 = vrot.slane %v6035_v17, 5 }
 0x1dd   : > { %v4846_v22 = vcombine.low %v6028_v50, %v7400_v44  ;;  %v2259_v49 = vsel %vm7288_vm2, %v2257_v58, %v2258_v11  ;;  %v2199_v0 = vsel %vm7288_vm2, %v2197_v37, %v2198_v15  ;;  %v2284_v38 = vsel %vm7288_vm2, %v2282_v53, %v2283_v27 }
 0x1de   : > { %v4946_v31 = vcombine.low %v2256_v40, %v2259_v49  ;;  %v4947_v52 = vcombine.low %v2281_v7, %v2284_v38  ;;  %v2289_v36 = vrot.slane %v2287_v56, 4  ;;  %v4931_v51 = vrot.slane %v2262_v34, 9 }
 0x1df   : > { %2634 = vmatmul.mubr.bf16.gmra.mrb[32].mxu0 %v4937_v4  ;;  %v4939_v4 = vcombine.low %v2189_v29, %v2192_v24  ;;  %v2296_v42 = vrot.slane %v2294_v61, 4  ;;  %v2297_v1 = vrot.slane %v6036_v55, 5  ;;  %v2301_v11 = vrot.slane %v7418_v59, 5  ;;  %v6037_v24 = vld [vmem:[#allocation2 + $0x44] sm:$0x1] }
 0x1e0   : > { %2641 = vmatprep.mubr.bf16.mxu0 %v4944_v19  ;;  %v6012_v19 = vld [vmem:[#allocation9 + $0x210] sm:$0xff]   ;;  %v2291_v58 = vsel %vm7288_vm2, %v2289_v36, %v2290_v3  ;;  %v2295_v50 = vsel %vm7288_vm2, %v4931_v51, %v2294_v61 }
 0x1e1   : > { %v2298_v44 = vsel %vm7288_vm2, %v2296_v42, %v2297_v1  ;;  %v2303_v29 = vrot.slane %v2301_v11, 4 }
 0x1e2   : > { %v4949_v45 = vcombine.low %v2295_v50, %v2298_v44 }
 0x1e3   : > { %2048 = vmatmul.mubr.bf16.gmra.mrb[32].mxu1 %v4838_v10  ;;  %v6013_v10 = vld [vmem:[#allocation9 + $0x218] sm:$0xff]  }
 0x1e4   : > { %5555 = vmatprep.mubr.bf16.mxu1 %v4845_v57 }
 0x1e7   : > { %2642 = vmatmul.mubr.bf16.gmra.mrb[36].mxu0 %v4938_v26  ;;  %v4930_v26 = vrot.slane %v2261_v5, 9 }
 0x1e8   : > { %2649 = vmatprep.mubr.bf16.mxu0 %v4945_v47  ;;  %v6021_v47 = vld [vmem:[#allocation9 + $0x238] sm:$0xff]  }
 0x1e9   : > { %v2288_v60 = vsel %vm7288_vm2, %v4930_v26, %v2287_v56 }
 0x1ea   : > { %v4948_v46 = vcombine.low %v2288_v60, %v2291_v58 }
 0x1eb   : > { %5556 = vmatmul.mubr.bf16.vlgmr.msra.gmra.mrb[0].mxu1 %v4846_v22  ;;  %v2263_v22 = vld [vmem:[#allocation2 + $0x3c] sm:$0xe] }
 0x1ec   : > { %5568 = vmatpush3.bf16.msra.mxu1 %v7340_v43  ;;  %5559 = vmatprep.mubr.bf16.mxu1 %v4847_v23  ;;  %v2196_v43 = vsel %vm7288_vm2, %v4922_v20, %v2195_v14  ;;  %v4932_v23 = vrot.slane %v2263_v22, 9 }
 0x1ed   : > { %5569 = vmatprep.subr.bf16.mxu1 %v6011_v48  ;;  %v4940_v57 = vcombine.low %v2196_v43, %v2199_v0 }
 0x1ee   : > { %v2302_v39 = vsel %vm7288_vm2, %v4932_v23, %v2301_v11 }
 0x1ef   : > { %2650 = vmatmul.mubr.bf16.gmra.mrb[40].mxu0 %v4939_v4 }
 0x1f0   : > { %5570 = vmatpush3.bf16.msra.mxu1 %v6011_v48  ;;  %2657 = vmatprep.mubr.bf16.mxu0 %v4946_v31  ;;  %v2304_v48 = vrot.slane %v6037_v24, 5 }
 0x1f1   : > { %5571 = vmatprep.subr.bf16.mxu1 %v6012_v19 }
 0x1f2   : > { %v2305_v14 = vsel %vm7288_vm2, %v2303_v29, %v2304_v48 }
 0x1f3   : > { %5560 = vmatmul.mubr.bf16.gmra.mrb[4].mxu1 %v4848_v35  ;;  %v4950_v40 = vcombine.low %v2302_v39, %v2305_v14 }
 0x1f4   : > { %5572 = vmatpush3.bf16.msra.mxu1 %v6012_v19  ;;  %5563 = vmatprep.mubr.bf16.mxu1 %v8014_v32 }
 0x1f5   : > { %5573 = vmatprep.subr.bf16.mxu1 %v6013_v10 }
 0x1f7   : > { %2658 = vmatmul.mubr.bf16.gmra.mrb[44].mxu0 %v4940_v57 }
 0x1f8   : > { %5574 = vmatpush3.bf16.msra.mxu1 %v6013_v10 }
 0x1f9   : > { %5575 = vmatprep.subr.bf16.mxu1 %v6016_v33 }
 0x1fb   : > { %5564 = vmatmul.mubr.bf16.gmra.mrb[8].mxu1 %v8015_v9 }
 0x1fc   : > { %5576 = vmatpush3.bf16.msra.mxu1 %v6016_v33  ;;  %5583 = vmatprep.mubr.bf16.mxu1 %v4947_v52 }
 0x1fd   : > { %5577 = vmatprep.subr.bf16.mxu1 %v6017_v12 }
 0x200   : > { %5578 = vmatpush3.bf16.msra.mxu1 %v6017_v12 }
 0x201   : > { %5579 = vmatprep.subr.bf16.mxu1 %v6020_v63 }
 0x204   : > { %5580 = vmatpush3.bf16.msra.mxu1 %v6020_v63 }
 0x205   : > { %5581 = vmatprep.subr.bf16.mxu1 %v6021_v47 }
 0x208   : > { %5582 = vmatpush3.bf16.msra.mxu1 %v6021_v47 }
 0x20b   : > { %5584 = vmatmul.mubr.bf16.vlgmr.msra.gmra.mrb[0].mxu1 %v4948_v46 }
 0x20c   : > { %5587 = vmatprep.mubr.bf16.mxu1 %v4949_v45 }
 0x213   : > { %5588 = vmatmul.mubr.bf16.gmra.mrb[4].mxu1 %v4950_v40 }
 0x214   : > { %5591 = vmatprep.mubr.bf16.mxu1 %v4951_v41 }
 0x21b   : > { %5592 = vmatmul.mubr.bf16.gmra.mrb[8].mxu1 %v4952_v16 }
 0x25a   : > { %v5173_v49 = vpop.f32.mrb[0].mxu0 }
 0x25b   : > { %v5174_v4 = vpop.f32.mrb[1].mxu0 }
 0x25c   : > { %v5175_v20 = vadd.f32 %v5174_v4, %v5173_v49  ;;  %v5176_v31 = vpop.f32.mrb[2].mxu0 }
 0x25d   : > { %v5177_v19 = vpop.f32.mrb[3].mxu0 }
 0x25e   : > { %v5178_v37 = vadd.f32 %v5177_v19, %v5176_v31 }
 0x263   : > { %v5179_v15 = vpop.f32.mrb[4].mxu0 }
 0x264   : > { %v5180_v21 = vpop.f32.mrb[5].mxu0 }
 0x265   : > { %v5181_v2 = vadd.f32 %v5180_v21, %v5179_v15  ;;  %v5182_v28 = vpop.f32.mrb[6].mxu0 }
 0x266   : > { %v5183_v59 = vpop.f32.mrb[7].mxu0 }
 0x267   : > { %v5184_v35 = vadd.f32 %v5183_v59, %v5182_v28 }
 0x271   : > { %v5185_v43 = vpop.f32.mrb[8].mxu0 }
 0x272   : > { %v5186_v0 = vpop.f32.mrb[9].mxu0 }
 0x273   : > { %v5187_v6 = vadd.f32 %v5186_v0, %v5185_v43  ;;  %v5188_v13 = vpop.f32.mrb[10].mxu0 }
 0x274   : > { %v5189_v41 = vpop.f32.mrb[11].mxu0 }
 0x275   : > { %v5190_v10 = vadd.f32 %v5189_v41, %v5188_v13 }
 0x283   : > { %v5191_v8 = vpop.f32.mrb[12].mxu0 }
 0x284   : > { %v5192_v25 = vpop.f32.mrb[13].mxu0 }
 0x285   : > { %v5193_v16 = vadd.f32 %v5192_v25, %v5191_v8  ;;  %v5194_v18 = vpop.f32.mrb[14].mxu0 }
 0x286   : > { %v5195_v53 = vpop.f32.mrb[15].mxu0 }
 0x287   : > { %v5196_v62 = vadd.f32 %v5195_v53, %v5194_v18 }
 0x28e   : > { %v5239_v27 = vpop.f32.mrb[12].mxu1 }
 0x28f   : > { %v5240_v57 = vpop.f32.mrb[13].mxu1 }
 0x290   : > { %v5241_v32 = vadd.f32 %v5240_v57, %v5239_v27  ;;  %v5242_v33 = vpop.f32.mrb[14].mxu1  ;;  %v5197_v38 = vpop.f32.mrb[16].mxu0 }
 0x291   : > { %v5243_v7 = vpop.f32.mrb[15].mxu1  ;;  %v5198_v9 = vpop.f32.mrb[17].mxu0 }
 0x292   : > { %v5670_v52 = vadd.f32 %v5241_v32, %v5175_v20  ;;  %v5244_v12 = vadd.f32 %v5243_v7, %v5242_v33  ;;  %v5199_v56 = vadd.f32 %v5198_v9, %v5197_v38  ;;  %v5200_v63 = vpop.f32.mrb[18].mxu0 }
 0x293   : > { %v5201_v61 = vpop.f32.mrb[19].mxu0 }
 0x294   : > { %v5676_v5 = vadd.f32 %v5244_v12, %v5178_v37  ;;  %v5202_v34 = vadd.f32 %v5201_v61, %v5200_v63 }
 0x296   : > { %v5245_v17 = vpop.f32.mrb[16].mxu1 }
 0x297   : > { %v5246_v3 = vpop.f32.mrb[17].mxu1 }
 0x298   : > { %v5247_v26 = vadd.f32 %v5246_v3, %v5245_v17  ;;  %v5248_v36 = vpop.f32.mrb[18].mxu1 }
 0x299   : > { %v5249_v47 = vpop.f32.mrb[19].mxu1 }
 0x29a   : > { %v5667_v51 = vadd.f32 %v5247_v26, %v5181_v2  ;;  %v5250_v42 = vadd.f32 %v5249_v47, %v5248_v36  ;;  %v5203_v55 = vpop.f32.mrb[20].mxu0 }
 0x29b   : > { %v5204_v60 = vpop.f32.mrb[21].mxu0 }
 0x29c   : > { %v5673_v1 = vadd.f32 %v5250_v42, %v5184_v35  ;;  %v5205_v58 = vadd.f32 %v5204_v60, %v5203_v55  ;;  %v5206_v11 = vpop.f32.mrb[22].mxu0 }
 0x29d   : > { %v5207_v50 = vpop.f32.mrb[23].mxu0 }
 0x29e   : > { %v5251_v44 = vpop.f32.mrb[20].mxu1  ;;  %v5208_v22 = vadd.f32 %v5207_v50, %v5206_v11 }
 0x29f   : > { %v5252_v46 = vpop.f32.mrb[21].mxu1 }
 0x2a0   : > { %v5253_v45 = vadd.f32 %v5252_v46, %v5251_v44  ;;  %v5254_v23 = vpop.f32.mrb[22].mxu1 }
 0x2a1   : > { %v5255_v29 = vpop.f32.mrb[23].mxu1 }
 0x2a2   : > { %v5682_v24 = vadd.f32 %v5253_v45, %v5187_v6  ;;  %v5256_v48 = vadd.f32 %v5255_v29, %v5254_v23  ;;  %v5305_v39 = vpop.f32.mrb[24].mxu0 }
 0x2a3   : > { %v5306_v14 = vpop.f32.mrb[25].mxu0 }
 0x2a4   : > { %v5688_v40 = vadd.f32 %v5256_v48, %v5190_v10  ;;  %v5307_v49 = vadd.f32 %v5306_v14, %v5305_v39  ;;  %v5308_v4 = vpop.f32.mrb[26].mxu0 }
 0x2a5   : > { %v5309_v20 = vpop.f32.mrb[27].mxu0 }
 0x2a6   : > { %v5257_v31 = vpop.f32.mrb[24].mxu1  ;;  %v5310_v19 = vadd.f32 %v5309_v20, %v5308_v4  ;;  %v7456_v15 = vadd.f32 %v5670_v52, %v5307_v49 }
 0x2a7   : > { %v5258_v37 = vpop.f32.mrb[25].mxu1 }
 0x2a8   : > { %v5259_v21 = vadd.f32 %v5258_v37, %v5257_v31  ;;  %v5260_v2 = vpop.f32.mrb[26].mxu1  ;;  %v7458_v59 = vadd.f32 %v5676_v5, %v5310_v19 }
 0x2a9   : > { %v5261_v28 = vpop.f32.mrb[27].mxu1 }
 0x2aa   : > { %v5679_v35 = vadd.f32 %v5259_v21, %v5193_v16  ;;  %v5262_v43 = vadd.f32 %v5261_v28, %v5260_v2  ;;  %v5311_v0 = vpop.f32.mrb[28].mxu0 }
 0x2ab   : > { %v5312_v6 = vpop.f32.mrb[29].mxu0 }
 0x2ac   : > { %v5685_v13 = vadd.f32 %v5262_v43, %v5196_v62  ;;  %v5313_v41 = vadd.f32 %v5312_v6, %v5311_v0  ;;  %v5314_v10 = vpop.f32.mrb[30].mxu0 }
 0x2ad   : > { %v5315_v8 = vpop.f32.mrb[31].mxu0 }
 0x2ae   : > { %v5263_v25 = vpop.f32.mrb[28].mxu1  ;;  %v5316_v18 = vadd.f32 %v5315_v8, %v5314_v10  ;;  %v5668_v27 = vadd.f32 %v5667_v51, %v5313_v41 }
 0x2af   : > { %v5264_v53 = vpop.f32.mrb[29].mxu1 }
 0x2b0   : > { %v5265_v57 = vadd.f32 %v5264_v53, %v5263_v25  ;;  %v5266_v32 = vpop.f32.mrb[30].mxu1  ;;  %v5674_v7 = vadd.f32 %v5673_v1, %v5316_v18 }
 0x2b1   : > { %v5267_v33 = vpop.f32.mrb[31].mxu1 }
 0x2b2   : > { %v5694_v38 = vadd.f32 %v5265_v57, %v5199_v56  ;;  %v5268_v52 = vadd.f32 %v5267_v33, %v5266_v32  ;;  %v5317_v12 = vpop.f32.mrb[32].mxu0 }
 0x2b3   : > { %v5318_v9 = vpop.f32.mrb[33].mxu0 }
 0x2b4   : > { %v5700_v16 = vadd.f32 %v5268_v52, %v5202_v34  ;;  %v5319_v63 = vadd.f32 %v5318_v9, %v5317_v12  ;;  %v5320_v5 = vpop.f32.mrb[34].mxu0 }
 0x2b5   : > { %v5321_v61 = vpop.f32.mrb[35].mxu0 }
 0x2b6   : > { %v5269_v62 = vpop.f32.mrb[32].mxu1  ;;  %v5322_v17 = vadd.f32 %v5321_v61, %v5320_v5  ;;  %v5683_v26 = vadd.f32 %v5682_v24, %v5319_v63 }
 0x2b7   : > { %v5270_v3 = vpop.f32.mrb[33].mxu1 }
 0x2b8   : > { %v5271_v36 = vadd.f32 %v5270_v3, %v5269_v62  ;;  %v5272_v47 = vpop.f32.mrb[34].mxu1  ;;  %v7460_v51 = vadd.f32 %v5688_v40, %v5322_v17  ;;  %v2933_v62 = vld [vmem:[#allocation2 + $0xc] sm:$0xf] }
 0x2b9   : > { %v5273_v42 = vpop.f32.mrb[35].mxu1 }
 0x2ba   : > { %v5691_v55 = vadd.f32 %v5271_v36, %v5205_v58  ;;  %v5274_v60 = vadd.f32 %v5273_v42, %v5272_v47  ;;  %v5323_v1 = vpop.f32.mrb[36].mxu0 }
 0x2bb   : > { %v5324_v56 = vpop.f32.mrb[37].mxu0 }
 0x2bc   : > { %v5697_v11 = vadd.f32 %v5274_v60, %v5208_v22  ;;  %v5325_v50 = vadd.f32 %v5324_v56, %v5323_v1  ;;  %v5326_v44 = vpop.f32.mrb[38].mxu0 }
 0x2bd   : > { %v5327_v34 = vpop.f32.mrb[39].mxu0 }
 0x2be   : > { %v5328_v46 = vadd.f32 %v5327_v34, %v5326_v44  ;;  %v5680_v45 = vadd.f32 %v5679_v35, %v5325_v50  ;;  %v2937_v44 = vld [vmem:[#allocation2 + $0x14] sm:$0x1] }
 0x2c0   : > { %v7462_v23 = vadd.f32 %v5685_v13, %v5328_v46 }
 0x2c2   : > { %v5329_v29 = vpop.f32.mrb[40].mxu0 }
 0x2c3   : > { %v5330_v48 = vpop.f32.mrb[41].mxu0 }
 0x2c4   : > { %v5331_v24 = vadd.f32 %v5330_v48, %v5329_v29  ;;  %v5332_v39 = vpop.f32.mrb[42].mxu0 }
 0x2c5   : > { %v5333_v14 = vpop.f32.mrb[43].mxu0 }
 0x2c6   : > { %v5334_v49 = vadd.f32 %v5333_v14, %v5332_v39  ;;  %v7464_v40 = vadd.f32 %v5694_v38, %v5331_v24  ;;  %v2930_v39 = vld [vmem:[#allocation2 + $0x8] sm:$0x1] }
 0x2c8   : > { %v7466_v58 = vadd.f32 %v5700_v16, %v5334_v49 }
 0x2ca   : > { %v5335_v4 = vpop.f32.mrb[44].mxu0 }
 0x2cb   : > { %v5336_v20 = vpop.f32.mrb[45].mxu0 }
 0x2cc   : > { %v5337_v22 = vadd.f32 %v5336_v20, %v5335_v4  ;;  %v5338_v31 = vpop.f32.mrb[46].mxu0 }
 0x2cd   : > { %v5339_v19 = vpop.f32.mrb[47].mxu0 }
 0x2ce   : > { %v5340_v37 = vadd.f32 %v5339_v19, %v5338_v31  ;;  %v7468_v21 = vadd.f32 %v5691_v55, %v5337_v22 }
 0x2d0   : > { %v7470_v2 = vadd.f32 %v5697_v11, %v5340_v37 }
 0x2de   : > { %v5585_v28 = vpop.f32.mrb[0].mxu1 }
 0x2df   : > { %v5669_v35 = vadd.f32 %v5668_v27, %v5585_v28  ;;  %v2700_v43 = vpop.f32.mrb[1].mxu1 }
 0x2e0   : > { %v5672_v0 = vadd.f32 %v7456_v15, %v2700_v43  ;;  %v5586_v6 = vpop.f32.mrb[2].mxu1 }
 0x2e1   : > { %v2761_v13 = vmax.f32 %v5669_v35, 0.0  ;;  %v5675_v41 = vadd.f32 %v5674_v7, %v5586_v6  ;;  %v2703_v10 = vpop.f32.mrb[3].mxu1 }
 0x2e2   : > { %v2759_v8 = vmax.f32 %v5672_v0, 0.0  ;;  %v5678_v25 = vadd.f32 %v7458_v59, %v2703_v10 }
 0x2e3   : > { %v5128_v18 = vpack.c.bf16 %v2761_v13, %v2761_v13  ;;  %v2762_v53 = vmax.f32 %v5675_v41, 0.0 }
 0x2e4   : > { %v5126_v57 = vpack.c.bf16 %v2759_v8, %v2759_v8  ;;  %v2760_v32 = vmax.f32 %v5678_v25, 0.0 }
 0x2e5   : > { %v2825_v33 = vshrl.u32 %v5128_v18, 16  ;;  %v5129_v38 = vpack.c.bf16 %v2762_v53, %v2762_v53  ;;  %v2828_v52 = vshll.u32 %v5128_v18, 16 }
 0x2e6   : > { %v2808_v12 = vshrl.u32 %v5126_v57, 16  ;;  %v2811_v9 = vshll.u32 %v5126_v57, 16  ;;  %v5127_v27 = vpack.c.bf16 %v2760_v32, %v2760_v32  ;;  %v5589_v16 = vpop.f32.mrb[4].mxu1  ;;  %v2947_v57 = vld [vmem:[#allocation2 + $0x24] sm:$0xf] }
 0x2e7   : > { %v2827_v63 = vrot.slane %v2825_v33, 7  ;;  %v2833_v15 = vshrl.u32 %v5129_v38, 16  ;;  %v2836_v5 = vshll.u32 %v5129_v38, 16  ;;  %v5681_v61 = vadd.f32 %v5680_v45, %v5589_v16  ;;  %v2716_v7 = vpop.f32.mrb[5].mxu1 }
 0x2e8   : > { %v2810_v17 = vrot.slane %v2808_v12, 7  ;;  %v2816_v3 = vshrl.u32 %v5127_v27, 16  ;;  %v2819_v59 = vshll.u32 %v5127_v27, 16  ;;  %v5684_v36 = vadd.f32 %v5683_v26, %v2716_v7  ;;  %v5590_v47 = vpop.f32.mrb[6].mxu1  ;;  %v6038_v26 = vld [vmem:[#allocation2] sm:$0xf] }
 0x2e9   : > { %v2830_v42 = vor.u32 %v2828_v52, %v2827_v63  ;;  %v2831_v55 = vrot.slane %v2827_v63, 4  ;;  %v2835_v60 = vrot.slane %v2833_v15, 7  ;;  %v2765_v1 = vmax.f32 %v5681_v61, 0.0  ;;  %v2719_v56 = vpop.f32.mrb[7].mxu1 }
 0x2ea   : > { %v2813_v11 = vor.u32 %v2811_v9, %v2810_v17  ;;  %v2814_v50 = vrot.slane %v2810_v17, 4  ;;  %v2818_v34 = vrot.slane %v2816_v3, 7  ;;  %v2763_v46 = vmax.f32 %v5684_v36, 0.0  ;;  %v2940_v9 = vld [vmem:[#allocation2 + $0x18] sm:$0xf] }
 0x2eb   : > { %v2934_v45 = vsel %vm6954_vm10, %v2830_v42, %v2933_v62  ;;  %v2838_v48 = vor.u32 %v2836_v5, %v2835_v60  ;;  %v2840_v24 = vrot.slane %v2835_v60, 4  ;;  %v5132_v14 = vpack.c.bf16 %v2765_v1, %v2765_v1 }
 0x2ec   : > { %2935 = vst [vmem:[#allocation2 + $0xc] sm:$0xf] %v2934_v45  ;;  %v2927_v49 = vsel %vm6954_vm10, %v2813_v11, %v6038_v26  ;;  %v2821_v4 = vor.u32 %v2819_v59, %v2818_v34  ;;  %v2823_v20 = vrot.slane %v2818_v34, 4  ;;  %v5130_v22 = vpack.c.bf16 %v2763_v46, %v2763_v46  ;;  %v2944_v46 = vld [vmem:[#allocation2 + $0x20] sm:$0x1] }
 0x2ed   : > { %2928 = vst [vmem:[#allocation2] sm:$0xf] %v2927_v49  ;;  %v2839_v19 = vsel %vm6959_vm11, %v2831_v55, %v2838_v48  ;;  %v2938_v28 = vsel %vm6964_vm12, %v2840_v24, %v2937_v44  ;;  %v2859_v35 = vshrl.u32 %v5132_v14, 16  ;;  %v2862_v6 = vshll.u32 %v5132_v14, 16 }
 0x2ee   : > { %2936 = vst [vmem:[#allocation2 + $0x10] sm:$0xf] %v2839_v19  ;;  %2939 = vst [vmem:[#allocation2 + $0x14] sm:$0x1] %v2938_v28  ;;  %v2822_v43 = vsel %vm6959_vm11, %v2814_v50, %v2821_v4  ;;  %v2931_v0 = vsel %vm6964_vm12, %v2823_v20, %v2930_v39  ;;  %v2842_v13 = vshrl.u32 %v5130_v22, 16  ;;  %v5593_v41 = vpop.f32.mrb[8].mxu1  ;;  %v5687_v8 = vadd.f32 %v7462_v23, %v5590_v47 }
 0x2ef   : > { %2929 = vst [vmem:[#allocation2 + $0x4] sm:$0xf] %v2822_v43  ;;  %2932 = vst [vmem:[#allocation2 + $0x8] sm:$0x1] %v2931_v0  ;;  %v2861_v10 = vrot.slane %v2859_v35, 7  ;;  %v5690_v25 = vadd.f32 %v7460_v51, %v2719_v56  ;;  %v5693_v18 = vadd.f32 %v7468_v21, %v5593_v41  ;;  %v2732_v53 = vpop.f32.mrb[9].mxu1 }
 0x2f0   : > { %v2844_v32 = vrot.slane %v2842_v13, 7  ;;  %v2845_v33 = vshll.u32 %v5130_v22, 16  ;;  %v5696_v38 = vadd.f32 %v7464_v40, %v2732_v53  ;;  %v5594_v52 = vpop.f32.mrb[10].mxu1  ;;  %v2766_v27 = vmax.f32 %v5687_v8, 0.0  ;;  %v2951_v50 = vld [vmem:[#allocation2 + $0x2c] sm:$0x1] }
 0x2f1   : > { %v2864_v12 = vor.u32 %v2862_v6, %v2861_v10  ;;  %v2764_v16 = vmax.f32 %v5690_v25, 0.0  ;;  %v2735_v63 = vpop.f32.mrb[11].mxu1  ;;  %v2769_v5 = vmax.f32 %v5693_v18, 0.0  ;;  %v5699_v7 = vadd.f32 %v7470_v2, %v5594_v52  ;;  %v2961_v4 = vld [vmem:[#allocation2 + $0x3c] sm:$0xf] }
 0x2f2   : > { %v2847_v15 = vor.u32 %v2845_v33, %v2844_v32  ;;  %v2767_v61 = vmax.f32 %v5696_v38, 0.0  ;;  %v5133_v23 = vpack.c.bf16 %v2766_v27, %v2766_v27  ;;  %v5702_v3 = vadd.f32 %v7466_v58, %v2735_v63  ;;  %v2954_v20 = vld [vmem:[#allocation2 + $0x30] sm:$0xf]  ;;  %v2965_v52 = vld [vmem:[#allocation2 + $0x44] sm:$0x1] }
 0x2f3   : > { %v2948_v51 = vsel %vm6954_vm10, %v2864_v12, %v2947_v57  ;;  %v5131_v21 = vpack.c.bf16 %v2764_v16, %v2764_v16  ;;  %v5136_v62 = vpack.c.bf16 %v2769_v5, %v2769_v5  ;;  %v2865_v59 = vrot.slane %v2861_v10, 4  ;;  %v2958_v12 = vld [vmem:[#allocation2 + $0x38] sm:$0x1] }
 0x2f4   : > { %2949 = vst [vmem:[#allocation2 + $0x24] sm:$0xf] %v2948_v51  ;;  %v2941_v40 = vsel %vm6954_vm10, %v2847_v15, %v2940_v9  ;;  %v5134_v17 = vpack.c.bf16 %v2767_v61, %v2767_v61  ;;  %v2848_v36 = vrot.slane %v2844_v32, 4  ;;  %v2867_v47 = vshrl.u32 %v5133_v23, 16  ;;  %v2971_v51 = vld [vmem:[#allocation2] sm:$0xf] (!%p4828_p10) }
 0x2f5   : > { %2942 = vst [vmem:[#allocation2 + $0x18] sm:$0xf] %v2941_v40  ;;  %v2850_v42 = vshrl.u32 %v5131_v21, 16  ;;  %v2870_v55 = vshll.u32 %v5133_v23, 16  ;;  %v2853_v60 = vshll.u32 %v5131_v21, 16  ;;  %v2893_v1 = vshrl.u32 %v5136_v62, 16 }
 0x2f6   : > { %v2876_v56 = vshrl.u32 %v5134_v17, 16  ;;  %v2869_v11 = vrot.slane %v2867_v47, 7  ;;  %v2896_v44 = vshll.u32 %v5136_v62, 16  ;;  %v2879_v34 = vshll.u32 %v5134_v17, 16  ;;  %v2975_v23 = vld [vmem:[#allocation2 + $0x8] sm:$0x1] (!%p4828_p10) }
 0x2f7   : > { %v2852_v2 = vrot.slane %v2850_v42, 7  ;;  %v2895_v45 = vrot.slane %v2893_v1, 7  ;;  %v2770_v24 = vmax.f32 %v5699_v7, 0.0  ;;  %v2768_v39 = vmax.f32 %v5702_v3, 0.0 }
 0x2f8   : > { %v2878_v48 = vrot.slane %v2876_v56, 7  ;;  %v2872_v58 = vor.u32 %v2870_v55, %v2869_v11  ;;  %v2874_v14 = vrot.slane %v2869_v11, 4  ;;  %v2972_v7 = vsel (!%p4828_p10), %vm6954_vm10, 0, %v2971_v51 }
 0x2f9   : > { %v2855_v26 = vor.u32 %v2853_v60, %v2852_v2  ;;  %v2857_v49 = vrot.slane %v2852_v2, 4  ;;  %v2898_v22 = vor.u32 %v2896_v44, %v2895_v45  ;;  %v5137_v41 = vpack.c.bf16 %v2770_v24, %v2770_v24  ;;  %2973 = vst [vmem:[#allocation2] sm:$0xf] (!%p4828_p10), %v2972_v7 }
 0x2fa   : > { %v2881_v19 = vor.u32 %v2879_v34, %v2878_v48  ;;  %v2873_v28 = vsel %vm6959_vm11, %v2865_v59, %v2872_v58  ;;  %v2952_v35 = vsel %vm6964_vm12, %v2874_v14, %v2951_v50  ;;  %v5135_v10 = vpack.c.bf16 %v2768_v39, %v2768_v39 }
 0x2fb   : > { %v2856_v43 = vsel %vm6959_vm11, %v2848_v36, %v2855_v26  ;;  %v2945_v0 = vsel %vm6964_vm12, %v2857_v49, %v2944_v46  ;;  %2950 = vst [vmem:[#allocation2 + $0x28] sm:$0xf] %v2873_v28  ;;  %2953 = vst [vmem:[#allocation2 + $0x2c] sm:$0x1] %v2952_v35  ;;  %v2962_v6 = vsel %vm6954_vm10, %v2898_v22, %v2961_v4  ;;  %v2901_v8 = vshrl.u32 %v5137_v41, 16 }
 0x2fc   : > { %2943 = vst [vmem:[#allocation2 + $0x1c] sm:$0xf] %v2856_v43  ;;  %2946 = vst [vmem:[#allocation2 + $0x20] sm:$0x1] %v2945_v0  ;;  %v2955_v13 = vsel %vm6954_vm10, %v2881_v19, %v2954_v20  ;;  %v2884_v25 = vshrl.u32 %v5135_v10, 16  ;;  %v2904_v53 = vshll.u32 %v5137_v41, 16 }
 0x2fd   : > { %2963 = vst [vmem:[#allocation2 + $0x3c] sm:$0xf] %v2962_v6  ;;  %2956 = vst [vmem:[#allocation2 + $0x30] sm:$0xf] %v2955_v13  ;;  %v2903_v18 = vrot.slane %v2901_v8, 7  ;;  %v2887_v32 = vshll.u32 %v5135_v10, 16 }
 0x2fe   : > { %v2886_v57 = vrot.slane %v2884_v25, 7  ;;  %v2899_v33 = vrot.slane %v2895_v45, 4  ;;  %v2882_v38 = vrot.slane %v2878_v48, 4  ;;  %2970 = sbr.rel (%p4828_p10) target bundleno = 773 (0x305), region = 84  ;;  %v6438_v40 = vmov (!%p4828_p10), 0  }
 0x2ff   : > { %v2906_v9 = vor.u32 %v2904_v53, %v2903_v18  ;;  %v2908_v27 = vrot.slane %v2903_v18, 4  ;;  %2974 = vst [vmem:[#allocation2 + $0x4] sm:$0xf] (!%p4828_p10), %v6438_v40  ;;  %v2976_v31 = vsel (!%p4828_p10), %vm6964_vm12, 0, %v2975_v23 }
 0x300   : > { %v2889_v16 = vor.u32 %v2887_v32, %v2886_v57  ;;  %v2891_v63 = vrot.slane %v2886_v57, 4  ;;  %2977 = vst [vmem:[#allocation2 + $0x8] sm:$0x1] (!%p4828_p10), %v2976_v31 }
 0x301   : > { %v2907_v29 = vsel %vm6959_vm11, %v2899_v33, %v2906_v9  ;;  %v2966_v15 = vsel %vm6964_vm12, %v2908_v27, %v2965_v52 }
 0x302   : > { %v2890_v5 = vsel %vm6959_vm11, %v2882_v38, %v2889_v16  ;;  %v2959_v61 = vsel %vm6964_vm12, %v2891_v63, %v2958_v12  ;;  %2964 = vst [vmem:[#allocation2 + $0x40] sm:$0xf] %v2907_v29  ;;  %2967 = vst [vmem:[#allocation2 + $0x44] sm:$0x1] %v2966_v15 }
 0x303   : > { %2957 = vst [vmem:[#allocation2 + $0x34] sm:$0xf] %v2890_v5  ;;  %2960 = vst [vmem:[#allocation2 + $0x38] sm:$0x1] %v2959_v61 }
 0x305 PF: > { %2980 = sbr.rel (%p4832_p0) target bundleno = 780 (0x30c), region = 88  ;;  %v2982_v37 = vld [vmem:[#allocation2 + $0x3c] sm:$0xf] (!%p4832_p0)  ;;  %v6439_v36 = vmov (!%p4832_p0), 0  }
 0x306   : > { %v2983_v59 = vsel (!%p4832_p0), %vm6954_vm10, 0, %v2982_v37  ;;  %2985 = vst [vmem:[#allocation2 + $0x40] sm:$0xf] (!%p4832_p0), %v6439_v36 }
 0x307   : > { %2984 = vst [vmem:[#allocation2 + $0x3c] sm:$0xf] (!%p4832_p0), %v2983_v59 }
 0x309   : > { %v2986_v17 = vld [vmem:[#allocation2 + $0x44] sm:$0x1] (!%p4832_p0) }
 0x30a   : > { %v2987_v42 = vsel (!%p4832_p0), %vm6964_vm12, 0, %v2986_v17 }
 0x30b   : > { %2988 = vst [vmem:[#allocation2 + $0x44] sm:$0x1] (!%p4832_p0), %v2987_v42 }
 0x30c PF: > { %v6039_v55 = vld [vmem:[#allocation11 + $0x100] sm:$0xff]   ;;  %v6043_v11 = vld [vmem:[#allocation11 + $0x108] sm:$0xff]   ;;  %v6047_v34 = vld [vmem:[#allocation11 + $0x110] sm:$0xff]   ;;  %s8025_s18 = sld [smem:[#allocation22_spill]]  ;;  %s8026_s19 = sld [smem:[#allocation23_spill]] }
 0x30d   : > { %v6040_v60 = vld [vmem:[#allocation11 + $0x40] sm:$0xff]   ;;  %5355 = vmatprep.subr.bf16.mxu0 %v6039_v55  ;;  %v6044_v50 = vld [vmem:[#allocation11 + $0x48] sm:$0xff]   ;;  %v6048_v46 = vld [vmem:[#allocation11 + $0x50] sm:$0xff]   ;;  %s4633_s8 = sshll.u32 %s6905_s10, 4  ;;  %s8027_s22 = sld [smem:[#allocation39_spill]]  ;;  %s7807_s8 = int_to_ptr.vmem [resolvable:$true] %s4633_s8 }
 0x30e   : > { %v6041_v1 = vld [vmem:[#allocation11 + $0xc0] sm:$0xff]   ;;  %5407 = vmatprep.subr.bf16.mxu1 %v6040_v60  ;;  %v6045_v2 = vld [vmem:[#allocation11 + $0xc8] sm:$0xff]   ;;  %v6049_v45 = vld [vmem:[#allocation11 + $0xd0] sm:$0xff]   ;;  %s4618_s20 = scalar_lea.sflag [#allocation5], %s6875_s12  ;;  %s6269_s14 = scalar_lea.vmem %s7807_s8, 1024 }
 0x30f   : > { %v6042_v56 = vld [vmem:[#allocation11] sm:$0xff]   ;;  %5356 = vmatpush3.bf16.msra.mxu0 %v6041_v1  ;;  %v6046_v44 = vld [vmem:[#allocation11 + $0x8] sm:$0xff]   ;;  %v6050_v48 = vld [vmem:[#allocation11 + $0x10] sm:$0xff]   ;;  %p6270_p13 = scmp.ne.s32.totalorder %s7807_s8, %s6269_s14  ;;  %p8029_p1 = scmp.ne.s32.totalorder %s7963_s9, 0 }
 0x310   : > { %5408 = vmatpush3.bf16.msra.mxu1 %v6042_v56  ;;  %5357 = vmatprep.subr.bf16.mxu0 %v6043_v11  ;;  %v6051_v24 = vld [vmem:[#allocation11 + $0x118] sm:$0xff]   ;;  %v6055_v26 = vld [vmem:[#allocation11 + $0x120] sm:$0xff]   ;;  %v6059_v22 = vld [vmem:[#allocation11 + $0x128] sm:$0xff]   ;;  %s6440_s30 = smov [#allocation12]  }
 0x311   : > { %5409 = vmatprep.subr.bf16.mxu1 %v6044_v50  ;;  %v6052_v39 = vld [vmem:[#allocation11 + $0x58] sm:$0xff]   ;;  %v6056_v49 = vld [vmem:[#allocation11 + $0x60] sm:$0xff]   ;;  %v6060_v19 = vld [vmem:[#allocation11 + $0x68] sm:$0xff]   ;;  %p6271_p8 = pnand %p6270_p13, %p8029_p1  ;;  %s6273_s11 = sshll.u32 %s6440_s30, 4  ;;  %s6274_s11 = int_to_ptr.vmem [resolvable:$false] %s6273_s11 }
 0x312   : > { %v6053_v58 = vld [vmem:[#allocation11 + $0xd8] sm:$0xff]   ;;  %v6057_v4 = vld [vmem:[#allocation11 + $0xe0] sm:$0xff]   ;;  %v6061_v28 = vld [vmem:[#allocation11 + $0xe8] sm:$0xff]   ;;  %s5112_s27 = sshll.u32 %s8025_s18, 3  ;;  %s5113_s3 = sshll.u32 %s8026_s19, 4 }
 0x313   : > { %5358 = vmatpush3.bf16.msra.mxu0 %v6045_v2  ;;  %v6054_v14 = vld [vmem:[#allocation11 + $0x18] sm:$0xff]   ;;  %v6058_v20 = vld [vmem:[#allocation11 + $0x20] sm:$0xff]   ;;  %v6062_v35 = vld [vmem:[#allocation11 + $0x28] sm:$0xff]   ;;  %s4630_s1 = sadd.s32 %s5113_s3, %s5112_s27  ;;  %s8028_s7 = smov %s8027_s22 }
 0x314   : > { %5410 = vmatpush3.bf16.msra.mxu1 %v6046_v44  ;;  %5359 = vmatprep.subr.bf16.mxu0 %v6047_v34  ;;  %v6063_v43 = vld [vmem:[#allocation11 + $0x130] sm:$0xff]   ;;  %v6067_v41 = vld [vmem:[#allocation11 + $0x138] sm:$0xff]   ;;  %v2997_v18 = vld [vmem:[#allocation2 + $0xc] sm:$0xf]  ;;  %p6272_p5 = pneg %p6271_p8  ;;  %s6275_s0 = scalar_lea.vmem %s6274_s11, 2048 }
 0x315   : > { %5411 = vmatprep.subr.bf16.mxu1 %v6048_v46  ;;  %v6064_v0 = vld [vmem:[#allocation11 + $0x70] sm:$0xff]   ;;  %v6068_v10 = vld [vmem:[#allocation11 + $0x78] sm:$0xff]   ;;  %v3238_v32 = vshrl.u32 %v2997_v18, 16  ;;  %v3241_v33 = vshll.u32 %v2997_v18, 16  ;;  %v2989_v12 = vld [vmem:[#allocation2] sm:$0xf]  ;;  %p6276_p6 = scmp.lt.s32.totalorder %s7807_s8, %s6274_s11  ;;  %p6277_p9 = scmp.lt.s32.totalorder %s6275_s0, %s6269_s14 }
 0x316   : > { %v6065_v6 = vld [vmem:[#allocation11 + $0xf0] sm:$0xff]   ;;  %v6069_v8 = vld [vmem:[#allocation11 + $0xf8] sm:$0xff]   ;;  %v7536_v16 = vld [vmem:[#allocation2 + $0x4] sm:$0xf]  ;;  %v3138_v23 = vshrl.u32 %v2989_v12, 16  ;;  %v3141_v21 = vshll.u32 %v2989_v12, 16 }
 0x317   : > { %5360 = vmatpush3.bf16.msra.mxu0 %v6049_v45  ;;  %v6066_v13 = vld [vmem:[#allocation11 + $0x30] sm:$0xff]   ;;  %v6070_v25 = vld [vmem:[#allocation11 + $0x38] sm:$0xff]   ;;  %v7538_v63 = vld [vmem:[#allocation2 + $0x8] sm:$0x1]  ;;  %v3240_v29 = vrot.slane %v3238_v32, 4  ;;  %v3243_v15 = vrot.slane %v3241_v33, 5  ;;  %v4991_v2 = vcombine.low %v2989_v12, %v7536_v16  ;;  %p6278_p11 = por %p6277_p9, %p6276_p6 }
 0x318   : > { %5412 = vmatpush3.bf16.msra.mxu1 %v6050_v48  ;;  %5361 = vmatprep.subr.bf16.mxu0 %v6051_v24  ;;  %v7528_v53 = vld [vmem:[#allocation2 + $0x10] sm:$0xf]  ;;  %v7530_v57 = vld [vmem:[#allocation2 + $0x14] sm:$0x1]  ;;  %v3147_v7 = vshll.u32 %v7536_v16, 16  ;;  %v3151_v31 = vshrl.u32 %v7536_v16, 16 }
 0x319   : > { %5413 = vmatprep.subr.bf16.mxu1 %v6052_v39  ;;  %v3247_v38 = vshll.u32 %v7528_v53, 16  ;;  %v3251_v52 = vshrl.u32 %v7528_v53, 16  ;;  %v3257_v9 = vshll.u32 %v7530_v57, 16  ;;  %v4995_v27 = vcombine.low %v2997_v18, %v7528_v53  ;;  %v6072_v17 = vld [vmem:[#allocation11 + $0x140] sm:$0xff]   ;;  %v6077_v39 = vld [vmem:[#allocation11 + $0x1c8] sm:$0xff]   ;;  %p6279_p3 = pnand %p6278_p11, %p6272_p5 }
 0x31a   : > { %v3244_v40 = vor.u32 %v3243_v15, %v3240_v29  ;;  %v3157_v37 = vshll.u32 %v7538_v63, 16  ;;  %v6074_v3 = vld [vmem:[#allocation11 + $0x1c0] sm:$0xff]   ;;  %v3140_v59 = vrot.slane %v3138_v23, 4  ;;  %v3143_v36 = vrot.slane %v3141_v21, 5  ;;  %v7562_v18 = vld [vmem:[#allocation2 + $0x10] sm:$0xf] }
 0x31b   : > { %5362 = vmatpush3.bf16.msra.mxu0 %v6053_v58  ;;  %v3249_v5 = vrot.slane %v3247_v38, 5  ;;  %v3253_v61 = vrot.slane %v3251_v52, 4  ;;  %v3259_v51 = vrot.slane %v3257_v9, 5  ;;  %3980 = vmatprep.mubr.bf16.mxu1 %v4995_v27  ;;  %v3149_v47 = vrot.slane %v3147_v7, 5  ;;  %v6075_v44 = vld [vmem:[#allocation11 + $0x180] sm:$0xff]  }
 0x31c   : > { %5414 = vmatpush3.bf16.msra.mxu1 %v6054_v14  ;;  %5363 = vmatprep.subr.bf16.mxu0 %v6055_v26  ;;  %v3245_v42 = vrot.slane %v3244_v40, 4  ;;  %v4135_v60 = vrot.slane %v7530_v57, 5  ;;  %v3153_v1 = vrot.slane %v3151_v31, 4  ;;  %v3144_v56 = vor.u32 %v3143_v36, %v3140_v59  ;;  %v6078_v14 = vld [vmem:[#allocation11 + $0x188] sm:$0xff]   ;;  %v2999_v26 = vld [vmem:[#allocation2 + $0x18] sm:$0xf] }
 0x31d   : > { %5415 = vmatprep.subr.bf16.mxu1 %v6056_v49  ;;  %v3254_v62 = vor.u32 %v3253_v61, %v3249_v5  ;;  %v3159_v11 = vrot.slane %v3157_v37, 5  ;;  %v4092_v50 = vrot.slane %v7536_v16, 5  ;;  %v7564_v32 = vld [vmem:[#allocation2 + $0x14] sm:$0x1]  ;;  %v3171_v29 = vshll.u32 %v7562_v18, 16 }
 0x31e   : > { %v3250_v34 = vsel %vm7070_vm15, %v3245_v42, %v3249_v5  ;;  %v3154_v45 = vor.u32 %v3153_v1, %v3149_v47  ;;  %v3145_v24 = vrot.slane %v3144_v56, 4  ;;  %v3175_v15 = vshrl.u32 %v7562_v18, 16  ;;  %v6080_v5 = vld [vmem:[#allocation11 + $0x150] sm:$0xff]   ;;  %v6084_v1 = vld [vmem:[#allocation11 + $0x158] sm:$0xff]  }
 0x31f   : > { %5364 = vmatpush3.bf16.msra.mxu0 %v6057_v4  ;;  %v3255_v55 = vrot.slane %v3254_v62, 4  ;;  %v7552_v4 = vld [vmem:[#allocation2 + $0x1c] sm:$0xf]  ;;  %v6082_v61 = vld [vmem:[#allocation11 + $0x1d0] sm:$0xff]   ;;  %v3181_v21 = vshll.u32 %v7564_v32, 16  ;;  %v3173_v31 = vrot.slane %v3171_v29, 5 }
 0x320   : > { %5416 = vmatpush3.bf16.msra.mxu1 %v6058_v20  ;;  %5365 = vmatprep.subr.bf16.mxu0 %v6059_v22  ;;  %v3155_v58 = vrot.slane %v3154_v45, 4  ;;  %v3150_v49 = vsel %vm7070_vm15, %v3145_v24, %v3149_v47  ;;  %v7554_v20 = vld [vmem:[#allocation2 + $0x20] sm:$0x1]  ;;  %v3262_v22 = vshrl.u32 %v2999_v26, 16  ;;  %v3177_v37 = vrot.slane %v3175_v15, 4  ;;  %v6086_v45 = vld [vmem:[#allocation11 + $0x198] sm:$0xff]  }
 0x321   : > { %5417 = vmatprep.subr.bf16.mxu1 %v6060_v19  ;;  %v3260_v46 = vsel %vm7070_vm15, %v3255_v55, %v3259_v51  ;;  %v3265_v19 = vshll.u32 %v2999_v26, 16  ;;  %v3183_v36 = vrot.slane %v3181_v21, 5  ;;  %v4095_v56 = vrot.slane %v7538_v63, 5  ;;  %v3001_v24 = vld [vmem:[#allocation2 + $0x24] sm:$0xf] }
 0x322   : > { %v5007_v48 = vcombine.low %v3250_v34, %v3260_v46  ;;  %v3178_v55 = vor.u32 %v3177_v37, %v3173_v31 }
 0x323   : > { %5366 = vmatpush3.bf16.msra.mxu0 %v6061_v28  ;;  %v3160_v28 = vsel %vm7070_vm15, %v3155_v58, %v3159_v11  ;;  %v7582_v58 = vld [vmem:[#allocation2 + $0x2c] sm:$0x1] }
 0x324   : > { %5418 = vmatpush3.bf16.msra.mxu1 %v6062_v35  ;;  %5367 = vmatprep.subr.bf16.mxu0 %v6063_v43  ;;  %v6076_v35 = vld [vmem:[#allocation11 + $0x148] sm:$0xff]   ;;  %v3271_v43 = vshll.u32 %v7552_v4, 16  ;;  %v3179_v46 = vrot.slane %v3178_v55, 4 }
 0x325   : > { %5419 = vmatprep.subr.bf16.mxu1 %v6064_v0  ;;  %3706 = vmatprep.mubr.bf16.mxu0 %v5007_v48  ;;  %v3275_v0 = vshrl.u32 %v7552_v4, 16  ;;  %v4132_v48 = vrot.slane %v7528_v53, 5 }
 0x326   : > { %v3273_v33 = vrot.slane %v3271_v43, 5 }
 0x327   : > { %5368 = vmatpush3.bf16.msra.mxu0 %v6065_v6  ;;  %v3281_v6 = vshll.u32 %v7554_v20, 16  ;;  %v3277_v38 = vrot.slane %v3275_v0, 4 }
 0x328   : > { %5420 = vmatpush3.bf16.msra.mxu1 %v6066_v13  ;;  %5369 = vmatprep.subr.bf16.mxu0 %v6067_v41  ;;  %v2991_v13 = vld [vmem:[#allocation2 + $0xc] sm:$0xf]  ;;  %v5003_v41 = vcombine.low %v3150_v49, %v3160_v28  ;;  %v3286_v49 = vshrl.u32 %v3001_v24, 16  ;;  %v7588_v28 = vld [vmem:[#allocation2 + $0x1c] sm:$0xf] }
 0x329   : > { %5421 = vmatprep.subr.bf16.mxu1 %v6068_v10  ;;  %v3264_v10 = vrot.slane %v3262_v22, 4  ;;  %v3283_v52 = vrot.slane %v3281_v6, 5  ;;  %v3162_v12 = vshrl.u32 %v2991_v13, 16  ;;  %v3165_v27 = vshll.u32 %v2991_v13, 16 }
 0x32a   : > { %v3278_v51 = vor.u32 %v3277_v38, %v3273_v33  ;;  %v4992_v7 = vcombine.low %v2991_v13, %v7562_v18  ;;  %v3289_v22 = vshll.u32 %v3001_v24, 16  ;;  %v3305_v13 = vshll.u32 %v7582_v58, 16 }
 0x32b   : > { %5370 = vmatpush3.bf16.msra.mxu0 %v6069_v8  ;;  %v3267_v8 = vrot.slane %v3265_v19, 5  ;;  %v3164_v23 = vrot.slane %v3162_v12, 4  ;;  %v3167_v62 = vrot.slane %v3165_v27, 5  ;;  %v2993_v19 = vld [vmem:[#allocation2 + $0x18] sm:$0xf] }
 0x32c   : > { %5422 = vmatpush3.bf16.msra.mxu1 %v6070_v25  ;;  %5595 = vmatprep.subr.bf16.mxu0 %v6072_v17  ;;  %v4996_v25 = vcombine.low %v2999_v26, %v7552_v4  ;;  %v3279_v59 = vrot.slane %v3278_v51, 4  ;;  %v3184_v26 = vsel %vm7070_vm15, %v3179_v46, %v3183_v36  ;;  %v3186_v38 = vshrl.u32 %v2993_v19, 16  ;;  %v6093_v36 = vld [vmem:[#allocation11 + $0x1e8] sm:$0xff]  }
 0x32d   : > { %5459 = vmatprep.subr.bf16.mxu1 %v6074_v3  ;;  %v3268_v9 = vor.u32 %v3267_v8, %v3264_v10  ;;  %v7572_v3 = vrot.slane %v4092_v50, 4  ;;  %v3168_v42 = vor.u32 %v3167_v62, %v3164_v23  ;;  %v6090_v10 = vld [vmem:[#allocation11 + $0x1e0] sm:$0xff]   ;;  %v3288_v8 = vrot.slane %v3286_v49, 4  ;;  %v6092_v23 = vld [vmem:[#allocation11 + $0x168] sm:$0xff]  }
 0x32e   : > { %3707 = vmatmul.mubr.bf16.vlgmr.msra.gmra.mrb[48].mxu0 %v5003_v41  ;;  %v3284_v11 = vsel %vm7070_vm15, %v3279_v59, %v3283_v52  ;;  %v7593_v41 = vld [vmem:[#allocation2 + $0x20] sm:$0x1]  ;;  %v3307_v27 = vrot.slane %v3305_v13, 5  ;;  %v3189_v29 = vshll.u32 %v2993_v19, 16  ;;  %v3199_v51 = vshrl.u32 %v7588_v28, 16 }
 0x32f   : > { %3981 = vmatmul.mubr.bf16.vlgmr.msra.gmra.mrb[36].mxu1 %v4991_v2  ;;  %5596 = vmatpush3.bf16.msra.mxu0 %v6072_v17  ;;  %v3269_v40 = vrot.slane %v3268_v9, 4  ;;  %v6083_v17 = vld [vmem:[#allocation11 + $0x190] sm:$0xff]   ;;  %v6085_v2 = vld [vmem:[#allocation11 + $0x1d8] sm:$0xff]   ;;  %v3169_v34 = vrot.slane %v3168_v42, 4  ;;  %v6091_v52 = vld [vmem:[#allocation11 + $0x1a0] sm:$0xff]   ;;  %v4993_v62 = vcombine.low %v2993_v19, %v7588_v28 }
 0x330   : > { %5460 = vmatpush3.bf16.msra.mxu1 %v6075_v44  ;;  %3988 = vmatprep.mubr.bf16.mxu1 %v4996_v25  ;;  %v3291_v25 = vrot.slane %v3289_v22, 5  ;;  %v3201_v59 = vrot.slane %v3199_v51, 4 }
 0x331   : > { %5461 = vmatprep.subr.bf16.mxu1 %v6077_v39  ;;  %5597 = vmatprep.subr.bf16.mxu0 %v6076_v35  ;;  %v3274_v47 = vsel %vm7070_vm15, %v3269_v40, %v3273_v33  ;;  %v7580_v39 = vld [vmem:[#allocation2 + $0x28] sm:$0xf]  ;;  %v3205_v40 = vshll.u32 %v7593_v41, 16 }
 0x332   : > { %v5008_v44 = vcombine.low %v3274_v47, %v3284_v11  ;;  %v3295_v0 = vshll.u32 %v7580_v39, 16  ;;  %v3299_v6 = vshrl.u32 %v7580_v39, 16  ;;  %v4997_v33 = vcombine.low %v3001_v24, %v7580_v39  ;;  %v7604_v24 = vld [vmem:[#allocation2 + $0x34] sm:$0xf] }
 0x333   : > { %5598 = vmatpush3.bf16.msra.mxu0 %v6076_v35  ;;  %v6088_v35 = vld [vmem:[#allocation11 + $0x160] sm:$0xff]   ;;  %v3292_v15 = vor.u32 %v3291_v25, %v3288_v8  ;;  %v3207_v42 = vrot.slane %v3205_v40, 5  ;;  %v3319_v19 = vshll.u32 %v7604_v24, 16  ;;  %v7616_v25 = vld [vmem:[#allocation2 + $0x28] sm:$0xf] }
 0x334   : > { %5462 = vmatpush3.bf16.msra.mxu1 %v6078_v14  ;;  %5599 = vmatprep.subr.bf16.mxu0 %v6080_v5  ;;  %v3174_v14 = vsel %vm7070_vm15, %v3169_v34, %v3173_v31  ;;  %v3297_v12 = vrot.slane %v3295_v0, 5  ;;  %v3301_v9 = vrot.slane %v3299_v6, 4  ;;  %v3003_v34 = vld [vmem:[#allocation2 + $0x30] sm:$0xf] }
 0x335   : > { %5463 = vmatprep.subr.bf16.mxu1 %v6082_v61  ;;  %3714 = vmatprep.mubr.bf16.mxu0 %v5008_v44  ;;  %v5004_v43 = vcombine.low %v3174_v14, %v3184_v26  ;;  %v3195_v61 = vshll.u32 %v7588_v28, 16  ;;  %v3293_v31 = vrot.slane %v3292_v15, 4  ;;  %v6094_v44 = vld [vmem:[#allocation11 + $0x1a8] sm:$0xff]   ;;  %v7606_v14 = vld [vmem:[#allocation2 + $0x38] sm:$0x1]  ;;  %v3310_v26 = vshrl.u32 %v3003_v34, 16 }
 0x336   : > { %v3302_v21 = vor.u32 %v3301_v9, %v3297_v12  ;;  %v3313_v22 = vshll.u32 %v3003_v34, 16  ;;  %v6096_v0 = vld [vmem:[#allocation11 + $0x170] sm:$0xff]   ;;  %v4998_v8 = vcombine.low %v3003_v34, %v7604_v24 }
 0x337   : > { %3989 = vmatmul.mubr.bf16.gmra.mrb[40].mxu1 %v4992_v7  ;;  %5600 = vmatpush3.bf16.msra.mxu0 %v6080_v5  ;;  %v3188_v5 = vrot.slane %v3186_v38, 4  ;;  %v3191_v7 = vrot.slane %v3189_v29, 5  ;;  %v3197_v37 = vrot.slane %v3195_v61, 5  ;;  %v3298_v55 = vsel %vm7070_vm15, %v3293_v31, %v3297_v12 }
 0x338   : > { %5464 = vmatpush3.bf16.msra.mxu1 %v6083_v17  ;;  %5601 = vmatprep.subr.bf16.mxu0 %v6084_v1  ;;  %v3303_v17 = vrot.slane %v3302_v21, 4  ;;  %v3312_v13 = vrot.slane %v3310_v26, 4  ;;  %v3321_v12 = vrot.slane %v3319_v19, 5  ;;  %v3219_v61 = vshll.u32 %v7616_v25, 16 }
 0x339   : > { %5465 = vmatprep.subr.bf16.mxu1 %v6085_v2  ;;  %3715 = vmatmul.mubr.bf16.gmra.mrb[52].mxu0 %v5004_v43  ;;  %v3192_v47 = vor.u32 %v3191_v7, %v3188_v5  ;;  %v3323_v43 = vshrl.u32 %v7604_v24, 16  ;;  %v3223_v7 = vshrl.u32 %v7616_v25, 16 }
 0x33a   : > { %3996 = vmatprep.mubr.bf16.mxu1 %v4997_v33  ;;  %v3308_v11 = vsel %vm7070_vm15, %v3303_v17, %v3307_v27  ;;  %v7618_v33 = vld [vmem:[#allocation2 + $0x2c] sm:$0x1]  ;;  %v6098_v27 = vld [vmem:[#allocation11 + $0x1f0] sm:$0xff]   ;;  %v3221_v31 = vrot.slane %v3219_v61, 5  ;;  %v4078_v61 = vld [vmem:[#allocation2] sm:$0xe] }
 0x33b   : > { %5602 = vmatpush3.bf16.msra.mxu0 %v6084_v1  ;;  %v3202_v1 = vor.u32 %v3201_v59, %v3197_v37  ;;  %v3193_v2 = vrot.slane %v3192_v47, 4  ;;  %v5009_v46 = vcombine.low %v3298_v55, %v3308_v11  ;;  %v3325_v9 = vrot.slane %v3323_v43, 4  ;;  %v6099_v59 = vld [vmem:[#allocation11 + $0x1b0] sm:$0xff]   ;;  %v4118_v43 = vld [vmem:[#allocation2 + $0xc] sm:$0xe] }
 0x33c   : > { %5466 = vmatpush3.bf16.msra.mxu1 %v6086_v45  ;;  %5603 = vmatprep.subr.bf16.mxu0 %v6088_v35  ;;  %v3229_v40 = vshll.u32 %v7618_v33, 16  ;;  %v3225_v47 = vrot.slane %v3223_v7, 4  ;;  %v4134_v11 = vrot.slane %v4132_v48, 4 }
 0x33d   : > { %5467 = vmatprep.subr.bf16.mxu1 %v6090_v10  ;;  %v3203_v45 = vrot.slane %v3202_v1, 4  ;;  %v3198_v49 = vsel %vm7070_vm15, %v3193_v2, %v3197_v37  ;;  %3722 = vmatprep.mubr.bf16.mxu0 %v5009_v46  ;;  %v3329_v10 = vshll.u32 %v7606_v14, 16  ;;  %v3326_v21 = vor.u32 %v3325_v9, %v3321_v12  ;;  %v6100_v1 = vld [vmem:[#allocation11 + $0x178] sm:$0xff]  }
 0x33e   : > { %v3226_v34 = vor.u32 %v3225_v47, %v3221_v31  ;;  %v6101_v46 = vld [vmem:[#allocation11 + $0x1f8] sm:$0xff]  }
 0x33f   : > { %3997 = vmatmul.mubr.bf16.gmra.mrb[44].mxu1 %v4993_v62  ;;  %5604 = vmatpush3.bf16.msra.mxu0 %v6088_v35  ;;  %v2995_v35 = vld [vmem:[#allocation2 + $0x24] sm:$0xf]  ;;  %v3208_v6 = vsel %vm7070_vm15, %v3203_v45, %v3207_v42  ;;  %v3331_v29 = vrot.slane %v3329_v10, 5  ;;  %v3327_v17 = vrot.slane %v3326_v21, 4  ;;  %v3231_v42 = vrot.slane %v3229_v40, 5 }
 0x340   : > { %5468 = vmatpush3.bf16.msra.mxu1 %v6091_v52  ;;  %5605 = vmatprep.subr.bf16.mxu0 %v6092_v23  ;;  %v5005_v38 = vcombine.low %v3198_v49, %v3208_v6  ;;  %v3315_v52 = vrot.slane %v3313_v22, 5  ;;  %v3210_v15 = vshrl.u32 %v2995_v35, 16  ;;  %v3213_v5 = vshll.u32 %v2995_v35, 16  ;;  %v6102_v22 = vld [vmem:[#allocation11 + $0x1b8] sm:$0xff]  }
 0x341   : > { %5469 = vmatprep.subr.bf16.mxu1 %v6093_v36  ;;  %4004 = vmatprep.mubr.bf16.mxu1 %v4998_v8  ;;  %v4994_v37 = vcombine.low %v2995_v35, %v7616_v25  ;;  %v4139_v45 = vrot.slane %v7552_v4, 5  ;;  %v3227_v19 = vrot.slane %v3226_v34, 4  ;;  %v7631_v35 = vld [vmem:[#allocation2 + $0x18] sm:$0xf]  ;;  %v4136_v10 = vsel %vm7288_vm2, %v4134_v11, %v4135_v60  ;;  %v7641_v8 = vld [vmem:[#allocation2 + $0x1c] sm:$0xf] }
 0x342   : > { %3723 = vmatmul.mubr.bf16.gmra.mrb[56].mxu0 %v5005_v38  ;;  %v3316_v51 = vor.u32 %v3315_v52, %v3312_v13  ;;  %v3215_v62 = vrot.slane %v3213_v5, 5  ;;  %v5067_v13 = vrot.slane %v4118_v43, 9  ;;  %v7643_v38 = vld [vmem:[#allocation2 + $0x20] sm:$0x1]  ;;  %v3338_v52 = vshrl.u32 %v7631_v35, 16 }
 0x343   : > { %5606 = vmatpush3.bf16.msra.mxu0 %v6092_v23  ;;  %v3212_v23 = vrot.slane %v3210_v15, 4  ;;  %v3341_v9 = vshll.u32 %v7631_v35, 16  ;;  %v3357_v5 = vshll.u32 %v7643_v38, 16  ;;  %v4079_v43 = vld [vmem:[#allocation2 + $0xc] sm:$0xe] }
 0x344   : > { %5470 = vmatpush3.bf16.msra.mxu1 %v6094_v44  ;;  %5607 = vmatprep.subr.bf16.mxu0 %v6096_v0  ;;  %v3317_v36 = vrot.slane %v3316_v51, 4  ;;  %v3332_v44 = vsel %vm7070_vm15, %v3327_v17, %v3331_v29  ;;  %v3351_v29 = vshrl.u32 %v7641_v8, 16  ;;  %v4133_v60 = vsel %vm7288_vm2, %v5067_v13, %v4132_v48  ;;  %v7664_v48 = vld [vmem:[#allocation2 + $0x28] sm:$0xf] }
 0x345   : > { %5471 = vmatprep.subr.bf16.mxu1 %v6098_v27  ;;  %v3216_v55 = vor.u32 %v3215_v62, %v3212_v23  ;;  %v3347_v27 = vshll.u32 %v7641_v8, 16  ;;  %v3340_v15 = vrot.slane %v3338_v52, 4  ;;  %v5079_v51 = vcombine.low %v4133_v60, %v4136_v10  ;;  %v7657_v23 = vld [vmem:[#allocation2 + $0x24] sm:$0xf] }
 0x346   : > { %v3322_v2 = vsel %vm7070_vm15, %v3317_v36, %v3321_v12  ;;  %v3232_v12 = vsel %vm7070_vm15, %v3227_v19, %v3231_v42  ;;  %v3343_v21 = vrot.slane %v3341_v9, 5  ;;  %v3353_v40 = vrot.slane %v3351_v29, 4 }
 0x347   : > { %5608 = vmatpush3.bf16.msra.mxu0 %v6096_v0  ;;  %4005 = vmatmul.mubr.bf16.gmra.mrb[48].mxu1 %v4994_v37  ;;  %v5010_v26 = vcombine.low %v3322_v2, %v3332_v44  ;;  %v3217_v49 = vrot.slane %v3216_v55, 4  ;;  %v7633_v0 = vld [vmem:[#allocation11 + $0x80] sm:$0xff]   ;;  %v3349_v7 = vrot.slane %v3347_v27, 5  ;;  %v4096_v62 = vsel %vm7288_vm2, %v7572_v3, %v4095_v56  ;;  %v7666_v37 = vld [vmem:[#allocation2 + $0x2c] sm:$0x1] }
 0x348   : > { %5472 = vmatpush3.bf16.msra.mxu1 %v6099_v59  ;;  %5609 = vmatprep.subr.bf16.mxu0 %v6100_v1  ;;  %v3359_v53 = vrot.slane %v3357_v5, 5  ;;  %v3344_v59 = vor.u32 %v3343_v21, %v3340_v15  ;;  %v3362_v17 = vshrl.u32 %v7657_v23, 16  ;;  %v3365_v47 = vshll.u32 %v7657_v23, 16  ;;  %v4119_v55 = vld [vmem:[#allocation2 + $0x18] sm:$0xe] }
 0x349   : > { %5473 = vmatprep.subr.bf16.mxu1 %v6101_v46  ;;  %3730 = vmatprep.mubr.bf16.mxu0 %v5010_v26  ;;  %v3222_v6 = vsel %vm7070_vm15, %v3217_v49, %v3221_v31  ;;  %v5063_v31 = vrot.slane %v4078_v61, 9  ;;  %v3354_v36 = vor.u32 %v3353_v40, %v3349_v7  ;;  %v3371_v3 = vshll.u32 %v7664_v48, 16 }
 0x34a   : > { %v5006_v57 = vcombine.low %v3222_v6, %v3232_v12  ;;  %4471 = vmatprep.mubr.bf16.mxu1 %v5079_v51  ;;  %v3375_v56 = vshrl.u32 %v7664_v48, 16  ;;  %v3381_v42 = vshll.u32 %v7666_v37, 16  ;;  %v3364_v44 = vrot.slane %v3362_v17, 4  ;;  %v4120_v12 = vld [vmem:[#allocation2 + $0x24] sm:$0xe] }
 0x34b   : > { %5610 = vmatpush3.bf16.msra.mxu0 %v6100_v1  ;;  %v4093_v63 = vsel %vm7288_vm2, %v5063_v31, %v4092_v50  ;;  %v3345_v1 = vrot.slane %v3344_v59, 4  ;;  %v3355_v11 = vrot.slane %v3354_v36, 4  ;;  %v3367_v34 = vrot.slane %v3365_v47, 5  ;;  %v6104_v31 = vld [vmem:[#allocation11 + $0x88] sm:$0xff]   ;;  %v7704_v17 = vld [vmem:[#allocation2 + $0x30] sm:$0xf] }
 0x34c   : > { %5474 = vmatpush3.bf16.msra.mxu1 %v6102_v22  ;;  %5619 = vmatprep.subr.bf16.mxu0 %v7633_v0  ;;  %v5075_v2 = vcombine.low %v4093_v63, %v4096_v62  ;;  %v3373_v46 = vrot.slane %v3371_v3, 5  ;;  %v3377_v26 = vrot.slane %v3375_v56, 4  ;;  %v3383_v49 = vrot.slane %v3381_v42, 5  ;;  %v4121_v62 = vld [vmem:[#allocation2 + $0x30] sm:$0xe] }
 0x34d   : > { %3731 = vmatmul.mubr.bf16.gmra.mrb[60].mxu0 %v5006_v57  ;;  %v3350_v16 = vsel %vm7070_vm15, %v3345_v1, %v3349_v7  ;;  %v3360_v50 = vsel %vm7070_vm15, %v3355_v11, %v3359_v53  ;;  %v5068_v22 = vrot.slane %v4119_v55, 9  ;;  %v4141_v19 = vrot.slane %v4139_v45, 4  ;;  %v7706_v47 = vld [vmem:[#allocation2 + $0x34] sm:$0xf]  ;;  %v7710_v42 = vld [vmem:[#allocation2 + $0x38] sm:$0x1] }
 0x34e   : > { %v5011_v6 = vcombine.low %v3350_v16, %v3360_v50  ;;  %v3368_v13 = vor.u32 %v3367_v34, %v3364_v44  ;;  %v3378_v10 = vor.u32 %v3377_v26, %v3373_v46  ;;  %v4142_v52 = vrot.slane %v7554_v20, 5  ;;  %v6105_v26 = vld [vmem:[#allocation11 + $0x90] sm:$0xff]  }
 0x34f   : > { %4472 = vmatmul.mubr.bf16.vlgmr.msra.gmra.mrb[52].mxu1 %v5075_v2  ;;  %v4140_v9 = vsel %vm7288_vm2, %v5068_v22, %v4139_v45  ;;  %v5064_v27 = vrot.slane %v4079_v43, 9  ;;  %v4099_v29 = vrot.slane %v7562_v18, 5  ;;  %v4102_v57 = vrot.slane %v7564_v32, 5  ;;  %v4080_v45 = vld [vmem:[#allocation2 + $0x18] sm:$0xe] }
 0x350   : > { %5611 = vmatprep.mubr.bf16.mxu0 %v5011_v6  ;;  %v3369_v60 = vrot.slane %v3368_v13, 4  ;;  %v3379_v15 = vrot.slane %v3378_v10, 4  ;;  %v4143_v5 = vsel %vm7288_vm2, %v4141_v19, %v4142_v52  ;;  %v5069_v61 = vrot.slane %v4120_v12, 9  ;;  %v7728_v43 = vld [vmem:[#allocation2 + $0x3c] sm:$0xf] }
 0x351   : > { %v5080_v51 = vcombine.low %v4140_v9, %v4143_v5  ;;  %v4100_v20 = vsel %vm7288_vm2, %v5064_v27, %v4099_v29  ;;  %v4101_v4 = vrot.slane %v4099_v29, 4  ;;  %v4146_v21 = vrot.slane %v7580_v39, 5  ;;  %v6106_v6 = vld [vmem:[#allocation11 + $0x98] sm:$0xff]   ;;  %v7732_v9 = vld [vmem:[#allocation2 + $0x40] sm:$0xf] }
 0x352   : > { %v3374_v18 = vsel %vm7070_vm15, %v3369_v60, %v3373_v46  ;;  %v3384_v32 = vsel %vm7070_vm15, %v3379_v15, %v3383_v49  ;;  %v4149_v7 = vrot.slane %v7582_v58, 5  ;;  %v5065_v40 = vrot.slane %v4080_v45, 9  ;;  %v4081_v46 = vld [vmem:[#allocation2 + $0x24] sm:$0xe]  ;;  %v7734_v15 = vld [vmem:[#allocation2 + $0x44] sm:$0x1] }
 0x353   : > { %v5012_v53 = vcombine.low %v3374_v18, %v3384_v32  ;;  %4479 = vmatprep.mubr.bf16.mxu1 %v5080_v51  ;;  %v4103_v59 = vsel %vm7288_vm2, %v4101_v4, %v4102_v57  ;;  %v4147_v39 = vsel %vm7288_vm2, %v5069_v61, %v4146_v21  ;;  %v4148_v36 = vrot.slane %v4146_v21, 4 }
 0x354   : > { %v5076_v63 = vcombine.low %v4100_v20, %v4103_v59  ;;  %v4106_v3 = vrot.slane %v7588_v28, 5  ;;  %v4109_v58 = vrot.slane %v7593_v41, 5  ;;  %v5070_v56 = vrot.slane %v4121_v62, 9 }
 0x355   : > { %5612 = vmatmul.mubr.bf16.vlgmr.msra.gmra.mrb[64].mxu0 %v5012_v53  ;;  %v4150_v55 = vsel %vm7288_vm2, %v4148_v36, %v4149_v7  ;;  %v4153_v1 = vrot.slane %v7604_v24, 5  ;;  %v4156_v11 = vrot.slane %v7606_v14, 5  ;;  %v3386_v2 = vshrl.u32 %v7704_v17, 16 }
 0x356   : > { %5620 = vmatpush3.bf16.msra.mxu0 %v7633_v0  ;;  %v5081_v44 = vcombine.low %v4147_v39, %v4150_v55  ;;  %v4107_v28 = vsel %vm7288_vm2, %v5065_v40, %v4106_v3  ;;  %v4108_v41 = vrot.slane %v4106_v3, 4  ;;  %v3389_v34 = vshll.u32 %v7704_v17, 16 }
 0x357   : > { %4480 = vmatmul.mubr.bf16.gmra.mrb[56].mxu1 %v5076_v63  ;;  %5621 = vmatprep.subr.bf16.mxu0 %v6104_v31  ;;  %v4154_v24 = vsel %vm7288_vm2, %v5070_v56, %v4153_v1  ;;  %v4155_v49 = vrot.slane %v4153_v1, 4  ;;  %v3388_v14 = vrot.slane %v3386_v2, 4  ;;  %v3395_v16 = vshll.u32 %v7706_v47, 16 }
 0x358   : > { %4487 = vmatprep.mubr.bf16.mxu1 %v5081_v44  ;;  %v4110_v0 = vsel %vm7288_vm2, %v4108_v41, %v4109_v58  ;;  %v3391_v50 = vrot.slane %v3389_v34, 5  ;;  %v3399_v22 = vshrl.u32 %v7706_v47, 16  ;;  %v3405_v19 = vshll.u32 %v7710_v42, 16  ;;  %v6108_v44 = vld [vmem:[#allocation11 + $0xa8] sm:$0xff]  }
 0x359   : > { %v5077_v13 = vcombine.low %v4107_v28, %v4110_v0  ;;  %v4157_v10 = vsel %vm7288_vm2, %v4155_v49, %v4156_v11  ;;  %v3397_v52 = vrot.slane %v3395_v16, 5  ;;  %v5066_v12 = vrot.slane %v4081_v46, 9  ;;  %v4159_v46 = vld [vmem:[#allocation2 + $0x24] sm:$0xe]  ;;  %v6109_v16 = vld [vmem:[#allocation11 + $0xb0] sm:$0xff]  }
 0x35a   : > { %5622 = vmatpush3.bf16.msra.mxu0 %v6104_v31  ;;  %v5082_v27 = vcombine.low %v4154_v24, %v4157_v10  ;;  %v3392_v29 = vor.u32 %v3391_v50, %v3388_v14  ;;  %v3401_v57 = vrot.slane %v3399_v22, 4  ;;  %v3407_v60 = vrot.slane %v3405_v19, 5  ;;  %v6107_v31 = vld [vmem:[#allocation11 + $0xa0] sm:$0xff]   ;;  %v6110_v22 = vld [vmem:[#allocation11 + $0xb8] sm:$0xff]  }
 0x35b   : > { %5623 = vmatprep.subr.bf16.mxu0 %v6105_v26  ;;  %v4113_v5 = vrot.slane %v7616_v25, 5  ;;  %v4116_v61 = vrot.slane %v7618_v33, 5  ;;  %v3410_v51 = vshrl.u32 %v7728_v43, 16  ;;  %v3413_v20 = vshll.u32 %v7728_v43, 16 }
 0x35c   : > { %v3393_v4 = vrot.slane %v3392_v29, 4  ;;  %v3402_v21 = vor.u32 %v3401_v57, %v3397_v52  ;;  %v3419_v45 = vshll.u32 %v7732_v9, 16  ;;  %v3423_v18 = vshrl.u32 %v7732_v9, 16  ;;  %v6115_v57 = vld [vmem:[#allocation11 + $0x210] sm:$0xff]  }
 0x35d   : > { %v4115_v32 = vrot.slane %v4113_v5, 4  ;;  %v3412_v7 = vrot.slane %v3410_v51, 4  ;;  %v3415_v40 = vrot.slane %v3413_v20, 5  ;;  %v4114_v59 = vsel %vm7288_vm2, %v5066_v12, %v4113_v5  ;;  %v6118_v5 = vld [vmem:[#allocation11 + $0x228] sm:$0xff]   ;;  %v4160_v20 = vld [vmem:[#allocation2 + $0x30] sm:$0xe] }
 0x35e   : > { %5624 = vmatpush3.bf16.msra.mxu0 %v6105_v26  ;;  %v3398_v25 = vsel %vm7070_vm15, %v3393_v4, %v3397_v52  ;;  %v3403_v62 = vrot.slane %v3402_v21, 4  ;;  %v3421_v33 = vrot.slane %v3419_v45, 5  ;;  %v3425_v53 = vrot.slane %v3423_v18, 4  ;;  %v6114_v52 = vld [vmem:[#allocation11 + $0x208] sm:$0xff]  }
 0x35f   : > { %4488 = vmatmul.mubr.bf16.gmra.mrb[60].mxu1 %v5077_v13  ;;  %5625 = vmatprep.subr.bf16.mxu0 %v6106_v6  ;;  %v4117_v39 = vsel %vm7288_vm2, %v4115_v32, %v4116_v61  ;;  %v3416_v36 = vor.u32 %v3415_v40, %v3412_v7  ;;  %v3429_v63 = vshll.u32 %v7734_v15, 16  ;;  %v4999_v34 = vcombine.low %v7631_v35, %v7641_v8  ;;  %v6121_v61 = vld [vmem:[#allocation11 + $0x230] sm:$0xff]   ;;  %v4161_v40 = vld [vmem:[#allocation2 + $0x3c] sm:$0xe] }
 0x360   : > { %4495 = vmatprep.mubr.bf16.mxu1 %v5082_v27  ;;  %v3408_v3 = vsel %vm7070_vm15, %v3403_v62, %v3407_v60  ;;  %v3426_v58 = vor.u32 %v3425_v53, %v3421_v33  ;;  %v5078_v11 = vcombine.low %v4114_v59, %v4117_v39  ;;  %v5072_v24 = vrot.slane %v4159_v46, 9  ;;  %v6116_v60 = vld [vmem:[#allocation11 + $0x218] sm:$0xff]  }
 0x361   : > { %v5013_v56 = vcombine.low %v3398_v25, %v3408_v3  ;;  %v3417_v55 = vrot.slane %v3416_v36, 4  ;;  %v3431_v1 = vrot.slane %v3429_v63, 5  ;;  %v4179_v49 = vrot.slane %v7664_v48, 5 }
 0x362   : > { %5626 = vmatpush3.bf16.msra.mxu0 %v6106_v6  ;;  %v3427_v2 = vrot.slane %v3426_v58, 4  ;;  %v4182_v14 = vrot.slane %v7666_v37, 5  ;;  %v6112_v37 = vld [vmem:[#allocation11 + $0x200] sm:$0xff]   ;;  %v4172_v19 = vrot.slane %v7641_v8, 5  ;;  %v4158_v6 = vld [vmem:[#allocation2 + $0x18] sm:$0xe]  ;;  %v5000_v13 = vcombine.low %v7657_v23, %v7664_v48 }
 0x363   : > { %5627 = vmatprep.subr.bf16.mxu0 %v6107_v31  ;;  %5615 = vmatprep.mubr.bf16.mxu0 %v5013_v56  ;;  %v3422_v28 = vsel %vm7070_vm15, %v3417_v55, %v3421_v33  ;;  %v7761_v0 = vsel %vm7288_vm2, %v5072_v24, %v4179_v49  ;;  %v4181_v54 = vrot.slane %v4179_v49, 4  ;;  %v5001_v10 = vcombine.low %v7704_v17, %v7706_v47 }
 0x364   : > { %v3432_v41 = vsel %vm7070_vm15, %v3427_v2, %v3431_v1  ;;  %v5071_v12 = vrot.slane %v4158_v6, 9  ;;  %v4174_v27 = vrot.slane %v4172_v19, 4  ;;  %v4175_v29 = vrot.slane %v7643_v38, 5  ;;  %v6117_v38 = vld [vmem:[#allocation11 + $0x220] sm:$0xff]  }
 0x365   : > { %v5014_v26 = vcombine.low %v3422_v28, %v3432_v41  ;;  %v4183_v35 = vsel %vm7288_vm2, %v4181_v54, %v4182_v14  ;;  %v5002_v48 = vcombine.low %v7728_v43, %v7732_v9  ;;  %v4186_v51 = vrot.slane %v7706_v47, 5  ;;  %v6122_v43 = vld [vmem:[#allocation11 + $0x238] sm:$0xff]  }
 0x366   : > { %5628 = vmatpush3.bf16.msra.mxu0 %v6107_v31  ;;  %v5084_v50 = vcombine.low %v7761_v0, %v4183_v35  ;;  %v4173_v8 = vsel %vm7288_vm2, %v5071_v12, %v4172_v19  ;;  %v4176_v23 = vsel %vm7288_vm2, %v4174_v27, %v4175_v29  ;;  %v5073_v4 = vrot.slane %v4160_v20, 9 }
 0x367   : > { %4496 = vmatmul.mubr.bf16.gmra.mrb[64].mxu1 %v5078_v11  ;;  %5629 = vmatprep.subr.bf16.mxu0 %v6108_v44  ;;  %v5083_v17 = vcombine.low %v4173_v8, %v4176_v23  ;;  %v4188_v21 = vrot.slane %v4186_v51, 4  ;;  %v4189_v45 = vrot.slane %v7710_v42, 5  ;;  %v4193_v18 = vrot.slane %v7732_v9, 5 }
 0x368   : > { %5616 = vmatmul.mubr.bf16.gmra.mrb[68].mxu0 %v5014_v26  ;;  %v4187_v32 = vsel %vm7288_vm2, %v5073_v4, %v4186_v51  ;;  %v5074_v25 = vrot.slane %v4161_v40, 9  ;;  %v4196_v33 = vrot.slane %v7734_v15, 5 }
 0x369   : > { %5635 = vmatprep.mubr.bf16.mxu0 %v4999_v34  ;;  %v4190_v7 = vsel %vm7288_vm2, %v4188_v21, %v4189_v45  ;;  %v4195_v62 = vrot.slane %v4193_v18, 4 }
 0x36a   : > { %5630 = vmatpush3.bf16.msra.mxu0 %v6108_v44  ;;  %v5085_v47 = vcombine.low %v4187_v32, %v4190_v7  ;;  %v4194_v42 = vsel %vm7288_vm2, %v5074_v25, %v4193_v18 }
 0x36b   : > { %5631 = vmatprep.subr.bf16.mxu0 %v6109_v16  ;;  %v4197_v9 = vsel %vm7288_vm2, %v4195_v62, %v4196_v33 }
 0x36c   : > { %v5086_v53 = vcombine.low %v4194_v42, %v4197_v9 }
 0x36e   : > { %5632 = vmatpush3.bf16.msra.mxu0 %v6109_v16 }
 0x36f   : > { %5633 = vmatprep.subr.bf16.mxu0 %v6110_v22 }
 0x372   : > { %5634 = vmatpush3.bf16.msra.mxu0 %v6110_v22 }
 0x373   : > { %5643 = vmatprep.subr.bf16.mxu0 %v6112_v37 }
 0x375   : > { %5636 = vmatmul.mubr.bf16.vlgmr.msra.gmra.mrb[64].mxu0 %v5000_v13 }
 0x376   : > { %5644 = vmatpush3.bf16.msra.mxu0 %v6112_v37  ;;  %5639 = vmatprep.mubr.bf16.mxu0 %v5001_v10 }
 0x377   : > { %5645 = vmatprep.subr.bf16.mxu0 %v6114_v52 }
 0x37a   : > { %5646 = vmatpush3.bf16.msra.mxu0 %v6114_v52 }
 0x37b   : > { %5647 = vmatprep.subr.bf16.mxu0 %v6115_v57 }
 0x37d   : > { %5640 = vmatmul.mubr.bf16.gmra.mrb[68].mxu0 %v5002_v48 }
 0x37e   : > { %5648 = vmatpush3.bf16.msra.mxu0 %v6115_v57  ;;  %5659 = vmatprep.mubr.bf16.mxu0 %v5083_v17 }
 0x37f   : > { %5649 = vmatprep.subr.bf16.mxu0 %v6116_v60 }
 0x382   : > { %5650 = vmatpush3.bf16.msra.mxu0 %v6116_v60 }
 0x383   : > { %5651 = vmatprep.subr.bf16.mxu0 %v6117_v38 }
 0x386   : > { %5652 = vmatpush3.bf16.msra.mxu0 %v6117_v38 }
 0x387   : > { %5653 = vmatprep.subr.bf16.mxu0 %v6118_v5 }
 0x38a   : > { %5654 = vmatpush3.bf16.msra.mxu0 %v6118_v5 }
 0x38b   : > { %5655 = vmatprep.subr.bf16.mxu0 %v6121_v61 }
 0x38e   : > { %5656 = vmatpush3.bf16.msra.mxu0 %v6121_v61 }
 0x38f   : > { %5657 = vmatprep.subr.bf16.mxu0 %v6122_v43 }
 0x392   : > { %5658 = vmatpush3.bf16.msra.mxu0 %v6122_v43 }
 0x395   : > { %5660 = vmatmul.mubr.bf16.vlgmr.msra.gmra.mrb[64].mxu0 %v5084_v50 }
 0x396   : > { %5663 = vmatprep.mubr.bf16.mxu0 %v5085_v47 }
 0x39d   : > { %5664 = vmatmul.mubr.bf16.gmra.mrb[68].mxu0 %v5086_v53 }
 0x401   : > { %v5371_v58 = vpop.f32.mrb[48].mxu0 }
 0x402   : > { %v5423_v31 = vpop.f32.mrb[36].mxu1  ;;  %v5372_v56 = vpop.f32.mrb[49].mxu0 }
 0x403   : > { %v5424_v59 = vpop.f32.mrb[37].mxu1  ;;  %v5373_v55 = vadd.f32 %v5372_v56, %v5371_v58  ;;  %v5374_v15 = vpop.f32.mrb[50].mxu0 }
 0x404   : > { %v5425_v39 = vadd.f32 %v5424_v59, %v5423_v31  ;;  %v5426_v36 = vpop.f32.mrb[38].mxu1  ;;  %v5375_v1 = vpop.f32.mrb[51].mxu0 }
 0x405   : > { %v5427_v63 = vpop.f32.mrb[39].mxu1  ;;  %v5376_v44 = vadd.f32 %v5375_v1, %v5374_v15 }
 0x406   : > { %v5428_v3 = vadd.f32 %v5427_v63, %v5426_v36  ;;  %v5706_v2 = vadd.f32 %v5425_v39, %v5373_v55 }
 0x408   : > { %v5712_v34 = vadd.f32 %v5428_v3, %v5376_v44 }
 0x40a   : > { %v5429_v11 = vpop.f32.mrb[40].mxu1 }
 0x40b   : > { %v5430_v28 = vpop.f32.mrb[41].mxu1 }
 0x40c   : > { %v5431_v41 = vadd.f32 %v5430_v28, %v5429_v11  ;;  %v5432_v30 = vpop.f32.mrb[42].mxu1  ;;  %v5377_v24 = vpop.f32.mrb[52].mxu0 }
 0x40d   : > { %v5433_v46 = vpop.f32.mrb[43].mxu1  ;;  %v5378_v49 = vpop.f32.mrb[53].mxu0 }
 0x40e   : > { %v5434_v26 = vadd.f32 %v5433_v46, %v5432_v30  ;;  %v5379_v14 = vadd.f32 %v5378_v49, %v5377_v24  ;;  %v5380_v16 = vpop.f32.mrb[54].mxu0 }
 0x40f   : > { %v5381_v0 = vpop.f32.mrb[55].mxu0 }
 0x410   : > { %v5703_v54 = vadd.f32 %v5431_v41, %v5379_v14  ;;  %v5382_v35 = vadd.f32 %v5381_v0, %v5380_v16  ;;  %v5154_v0 = vld [vmem:[%s6879_s5 + $0x8] sm:$0xff]  }
 0x412   : > { %v5435_v50 = vpop.f32.mrb[44].mxu1  ;;  %v5709_v37 = vadd.f32 %v5434_v26, %v5382_v35  ;;  %v5144_v35 = vunpack.c.l.bf16 %v5154_v0 }
 0x413   : > { %v5436_v22 = vpop.f32.mrb[45].mxu1 }
 0x414   : > { %v5437_v19 = vadd.f32 %v5436_v22, %v5435_v50  ;;  %v5438_v6 = vpop.f32.mrb[46].mxu1 }
 0x415   : > { %v5439_v13 = vpop.f32.mrb[47].mxu1  ;;  %v5383_v52 = vpop.f32.mrb[56].mxu0 }
 0x416   : > { %v5440_v10 = vadd.f32 %v5439_v13, %v5438_v6  ;;  %v5384_v12 = vpop.f32.mrb[57].mxu0  ;;  %v5145_v6 = vunpack.c.h.bf16 %v5154_v0 }
 0x417   : > { %v5385_v27 = vadd.f32 %v5384_v12, %v5383_v52  ;;  %v5386_v29 = vpop.f32.mrb[58].mxu0 }
 0x418   : > { %v5387_v57 = vpop.f32.mrb[59].mxu0 }
 0x419   : > { %v5718_v23 = vadd.f32 %v5437_v19, %v5385_v27  ;;  %v5388_v48 = vadd.f32 %v5387_v57, %v5386_v29 }
 0x41a   : > { %v5441_v8 = vpop.f32.mrb[48].mxu1 }
 0x41b   : > { %v5442_v17 = vpop.f32.mrb[49].mxu1  ;;  %v5724_v5 = vadd.f32 %v5440_v10, %v5388_v48 }
 0x41c   : > { %v5443_v60 = vadd.f32 %v5442_v17, %v5441_v8  ;;  %v5444_v38 = vpop.f32.mrb[50].mxu1 }
 0x41d   : > { %v5445_v61 = vpop.f32.mrb[51].mxu1 }
 0x41e   : > { %v5446_v51 = vadd.f32 %v5445_v61, %v5444_v38 }
 0x420   : > { %v5389_v20 = vpop.f32.mrb[60].mxu0 }
 0x421   : > { %v5390_v43 = vpop.f32.mrb[61].mxu0 }
 0x422   : > { %v5391_v4 = vadd.f32 %v5390_v43, %v5389_v20  ;;  %v5392_v21 = vpop.f32.mrb[62].mxu0  ;;  %v5475_v7 = vpop.f32.mrb[52].mxu1 }
 0x423   : > { %v5393_v45 = vpop.f32.mrb[63].mxu0  ;;  %v5476_v47 = vpop.f32.mrb[53].mxu1 }
 0x424   : > { %v5715_v18 = vadd.f32 %v5443_v60, %v5391_v4  ;;  %v5394_v32 = vadd.f32 %v5393_v45, %v5392_v21  ;;  %v5477_v25 = vadd.f32 %v5476_v47, %v5475_v7  ;;  %v5478_v62 = vpop.f32.mrb[54].mxu1  ;;  %v5155_v60 = vld [vmem:[%s6879_s5 + $0x10] sm:$0xff]  }
 0x425   : > { %v5479_v33 = vpop.f32.mrb[55].mxu1  ;;  %v5148_v4 = vunpack.c.l.bf16 %v5155_v60 }
 0x426   : > { %v5721_v40 = vadd.f32 %v5446_v51, %v5394_v32  ;;  %v5480_v42 = vadd.f32 %v5479_v33, %v5478_v62  ;;  %v5707_v9 = vadd.f32 %v5706_v2, %v5477_v25 }
 0x428   : > { %v5713_v53 = vadd.f32 %v5712_v34, %v5480_v42 }
 0x42a   : > { %v5481_v31 = vpop.f32.mrb[56].mxu1 }
 0x42b   : > { %v5482_v59 = vpop.f32.mrb[57].mxu1 }
 0x42c   : > { %v5483_v39 = vadd.f32 %v5482_v59, %v5481_v31  ;;  %v5484_v36 = vpop.f32.mrb[58].mxu1 }
 0x42d   : > { %v5485_v63 = vpop.f32.mrb[59].mxu1 }
 0x42e   : > { %v5486_v3 = vadd.f32 %v5485_v63, %v5484_v36  ;;  %v5704_v58 = vadd.f32 %v5703_v54, %v5483_v39  ;;  %v5139_v54 = vld [vmem:[%s6879_s5] sm:$0xff]  }
 0x42f   : > { %v5140_v22 = vunpack.c.l.bf16 %v5139_v54  ;;  %v5141_v52 = vunpack.c.h.bf16 %v5139_v54 }
 0x430   : > { %v5710_v56 = vadd.f32 %v5709_v37, %v5486_v3 }
 0x432   : > { %v5487_v55 = vpop.f32.mrb[60].mxu1 }
 0x433   : > { %v5488_v15 = vpop.f32.mrb[61].mxu1 }
 0x434   : > { %v5489_v1 = vadd.f32 %v5488_v15, %v5487_v55  ;;  %v5490_v11 = vpop.f32.mrb[62].mxu1 }
 0x435   : > { %v5491_v44 = vpop.f32.mrb[63].mxu1 }
 0x436   : > { %v5492_v28 = vadd.f32 %v5491_v44, %v5490_v11  ;;  %v5719_v41 = vadd.f32 %v5718_v23, %v5489_v1  ;;  %v5156_v23 = vld [vmem:[%s6879_s5 + $0x18] sm:$0xff]   ;;  %s5114_s5 = sshll.u32 %s4630_s1, 7 }
 0x437   : > { %v5152_v51 = vunpack.c.l.bf16 %v5156_v23  ;;  %s7805_s28 = scalar_lea.hbm %s8027_s22, %s5114_s5 }
 0x438   : > { %v5725_v30 = vadd.f32 %v5724_v5, %v5492_v28 }
 0x43a   : > { %v5493_v2 = vpop.f32.mrb[64].mxu1 }
 0x43b   : > { %v5494_v34 = vpop.f32.mrb[65].mxu1 }
 0x43c   : > { %v5495_v46 = vadd.f32 %v5494_v34, %v5493_v2  ;;  %v5496_v26 = vpop.f32.mrb[66].mxu1 }
 0x43d   : > { %v5497_v24 = vpop.f32.mrb[67].mxu1 }
 0x43e   : > { %v5498_v49 = vadd.f32 %v5497_v24, %v5496_v26  ;;  %v5716_v14 = vadd.f32 %v5715_v18, %v5495_v46  ;;  %v5153_v18 = vunpack.c.h.bf16 %v5156_v23 }
 0x440   : > { %v5722_v16 = vadd.f32 %v5721_v40, %v5498_v49  ;;  %v5149_v40 = vunpack.c.h.bf16 %v5155_v60 }
 0x468   : > { %v5661_v50 = vpop.f32.mrb[64].mxu0 }
 0x469   : > { %v5705_v37 = vadd.f32 %v5704_v58, %v5661_v50  ;;  %v4538_v19 = vpop.f32.mrb[65].mxu0 }
 0x46a   : > { %v5708_v13 = vadd.f32 %v5707_v9, %v4538_v19  ;;  %v5662_v10 = vpop.f32.mrb[66].mxu0 }
 0x46b   : > { %v4595_v12 = vadd.f32 %v5705_v37, %v5144_v35  ;;  %v5711_v27 = vadd.f32 %v5710_v56, %v5662_v10  ;;  %v4541_v29 = vpop.f32.mrb[67].mxu0 }
 0x46c   : > { %v4593_v57 = vadd.f32 %v5708_v13, %v5140_v22  ;;  %v5714_v8 = vadd.f32 %v5713_v53, %v4541_v29 }
 0x46d   : > { %v4603_v48 = vmax.f32 %v4595_v12, 0.0  ;;  %v4596_v17 = vadd.f32 %v5711_v27, %v5145_v6 }
 0x46e   : > { %v4601_v38 = vmax.f32 %v4593_v57, 0.0  ;;  %v4594_v5 = vadd.f32 %v5714_v8, %v5141_v52 }
 0x46f   : > { %4611 = vst [vmem:[%s6905_s10 + $0x10] sm:$0xff] %v4603_v48  ;;  %v4604_v61 = vmax.f32 %v4596_v17, 0.0 }
 0x470   : > { %4609 = vst [vmem:[%s6905_s10] sm:$0xff] %v4601_v38  ;;  %v4602_v20 = vmax.f32 %v4594_v5, 0.0  ;;  %v5665_v43 = vpop.f32.mrb[68].mxu0 }
 0x471   : > { %4612 = vst [vmem:[%s6905_s10 + $0x18] sm:$0xff] %v4604_v61  ;;  %v5717_v21 = vadd.f32 %v5716_v14, %v5665_v43  ;;  %v4554_v45 = vpop.f32.mrb[69].mxu0 }
 0x472   : > { %4610 = vst [vmem:[%s6905_s10 + $0x8] sm:$0xff] %v4602_v20  ;;  %v5720_v32 = vadd.f32 %v5719_v41, %v4554_v45  ;;  %v5666_v7 = vpop.f32.mrb[70].mxu0 }
 0x473   : > { %v4599_v47 = vadd.f32 %v5717_v21, %v5152_v51  ;;  %v5723_v25 = vadd.f32 %v5722_v16, %v5666_v7  ;;  %v4557_v62 = vpop.f32.mrb[71].mxu0 }
 0x474   : > { %v4597_v33 = vadd.f32 %v5720_v32, %v5148_v4  ;;  %v5726_v42 = vadd.f32 %v5725_v30, %v4557_v62 }
 0x475   : > { %v4607_v9 = vmax.f32 %v4599_v47, 0.0  ;;  %v4600_v53 = vadd.f32 %v5723_v25, %v5153_v18 }
 0x476   : > { %v4605_v31 = vmax.f32 %v4597_v33, 0.0  ;;  %v4598_v59 = vadd.f32 %v5726_v42, %v5149_v40 }
 0x477   : > { %4615 = vst [vmem:[%s6905_s10 + $0x30] sm:$0xff] %v4607_v9  ;;  %v4608_v39 = vmax.f32 %v4600_v53, 0.0 }
 0x478   : > { %4613 = vst [vmem:[%s6905_s10 + $0x20] sm:$0xff] %v4605_v31  ;;  %v4606_v36 = vmax.f32 %v4598_v59, 0.0 }
 0x479   : > { %4616 = vst [vmem:[%s6905_s10 + $0x38] sm:$0xff] %v4608_v39 }
 0x47a   : > { %4614 = vst [vmem:[%s6905_s10 + $0x28] sm:$0xff] %v4606_v36 }
 0x47b   : > { %6282 = shalt.err (!%p6279_p3)
}
 0x47c   : > { %s6283_s10 = scalar_lea.hbm %s7805_s28, 1024  ;;  %s6287_s19 = scalar_lea.hbm %s8028_s7, 4096 }
 0x47d   : > { %p6284_p7 = scmp.ne.s32.totalorder %s7805_s28, %s6283_s10  ;;  %p6288_p12 = scmp.lt.u32.totalorder %s7805_s28, %s8028_s7 }
 0x47e   : > { %p6289_p2 = scmp.lt.u32.totalorder %s6287_s19, %s6283_s10  ;;  %p6291_p13 = scmp.lt.u32.totalorder %s6283_s10, %s7805_s28 }
 0x47f   : > { %p6285_p4 = pnand %p6284_p7, %p8029_p1 }
 0x480   : > { %p6290_p0 = por %p6289_p2, %p6288_p12 }
 0x481   : > { %p6286_p10 = pneg %p6285_p4 }
 0x482   : > { %p6292_p8 = por %p6291_p13, %p6290_p0 }
 0x484   : > { %p6293_p5 = pnand %p6292_p8, %p6286_p10 }
 0x486   : > { %6296 = shalt.err (!%p6293_p5)
}
 0x487   : > { %s6441_s1 = smov 128   ;;  %s6442_s5 = smov 8  }
 0x488   : > { %5781 = dma.vmem_to_hbm [thread:$0]  (%p8029_p1), %s7807_s8, 1024, %s7805_s28, %s4618_s20, %s6441_s1, %s6441_s1, %s6442_s5  }
 0x489 PF: > { %p5809_p6 = scmp.ge.s32.totalorder %s6427_s6, 2  ;;  %s4648_s4 = sand.u32 1, %s6399_s24  }
 0x48a   : > { %p8030_p9 = scmp.ne.s32.totalorder %s7966_s2, 0  ;;  %s4649_s15 = scalar_lea.sflag [#allocation5], %s4648_s4 }
 0x48c   : > { %p5801_p11 = pnand %p5809_p6, %p8030_p9 }
 0x48e   : > { %6370 = dma.done.wait (!%p5801_p11), %s4649_s15, 1024  }
 0x48f   : > { %6372 = vsyncadd (!%p5801_p11), %s4649_s15, 4294966272  ;;  %s25_s6 = sadd.s32 1, %s6427_s6   ;;  %s8032_s18 = sld [smem:[#allocation19_spill]] }
 0x490   : > { %p7841_p3 = scmp.ge.s32.totalorder %s25_s6, 6   ;;  %s8033_s19 = sld [smem:[#allocation20_spill]] }
 0x491   : > { %s8034_s9 = sld [smem:[#allocation21_spill]]  ;;  %s8035_s12 = smov %s6633_s21 }
 0x492   : > { %s8036_s27 = sld [smem:[#allocation24_spill]]  ;;  %s8037_s28 = sld [smem:[#allocation25_spill]] }
 0x493   : > { %s8038_s29 = sld [smem:[#allocation27_spill]]  ;;  %s8039_s30 = sld [smem:[#allocation28_spill]] }
 0x494   : > { %s8041_s20 = smov %s8063_s16  ;;  %s8043_s22 = smov %s6395_s23 }
 0x495   : > { %s8044_s23 = smov %s8035_s12  ;;  %s8045_s24 = smov %s6403_s25 }
 0x496   : > { %s8046_s25 = smov %s6407_s26  ;;  %s8047_s26 = smov %s6724_s17 }
 0x497   : > { %s8042_s21 = smov %s8034_s9  ;;  %24 = sbr.rel (!%p7841_p3) target bundleno = 20 (0x14), region = 154 }
 0x49e   :  { %4654 = vsyncpa [#allocation4], 1 }
 0x49f   :  { %4656 = vsyncpa [#allocation4 + $0x1], 1 }
 0x4a0   :  { %4657 = vsyncpa [#allocation7], 1 }
 0x4a1   :  { %4659 = vsyncpa [#allocation7 + $0x1], 1 }
 0x4a2   :  { %4660 = vsyncpa [#allocation10], 1 }
 0x4a3   :  { %4661 = vsyncpa [#allocation5], 1 }
 0x4a4   :  { %4663 = vsyncpa [#allocation5 + $0x1], 1 }

</bundles_post_ra>
